<compile_context>
chip_gen: v7x
topology: tpu7x:2x2x1
jax: 0.10.0
libtpu: 0.0.40
codegen_flags: <defaults>
</compile_context>

<pallas_src>
import math

import jax
import jax.numpy as jnp
from jax import lax
from jax.experimental import pallas as pl
from jax.experimental.pallas import tpu as pltpu

# Scaled-down dims (module defaults are n_embd=768, n_head=6).
N_EMBD = 96
N_HEAD = 6
HEAD_DIM = N_EMBD // N_HEAD          # 16
C_PAD = 128                          # lane-dense padded channel count
EPS = 1.1920929e-07                  # torch.finfo(float32).eps (F.rms_norm default)


def block_kernel(x_ref, wqkv_ref, wo_ref, wfc_ref, wp2_ref,
                 cos_ref, sin_ref, o_ref):
    f32, bf16 = jnp.float32, jnp.bfloat16
    B, T, CP = x_ref.shape
    C, H, D = N_EMBD, N_HEAD, HEAD_DIM
    d2 = D // 2
    inv_c = 1.0 / C                                  # TRUE channel count

    def rms_norm_pad(z):
        # top-level RMSNorm over the TRUE C (padded lanes >= C are zero)
        ms = jnp.sum(z * z, axis=-1, keepdims=True) * inv_c
        return z * lax.rsqrt(ms + EPS)

    def head_rms(z):
        ms = jnp.mean(z * z, axis=-1, keepdims=True)
        return z * lax.rsqrt(ms + EPS)

    x = x_ref[...].reshape(B * T, CP)                # (B*T, 128) f32

    # -------- attention branch: x + c_proj(attn(rms_norm(x))) --------------
    xn = rms_norm_pad(x)
    qkv = jnp.dot(xn.astype(bf16), wqkv_ref[...],    # fused QKV, one MXU push
                  preferred_element_type=f32)        # (B*T, 3C) f32

    cos = cos_ref[...]                               # (T, D/2) f32 (bf16 values)
    sin = sin_ref[...]

    # causal mask built in-kernel (no DMA'd constant slab)
    row = lax.broadcasted_iota(jnp.int32, (T, T), 0)
    col = lax.broadcasted_iota(jnp.int32, (T, T), 1)
    causal = (row >= col).astype(f32)

    scale = 1.0 / math.sqrt(D)

    def rope(z):                                     # (T, D) -> (T, D)
        z1, z2 = z[:, :d2], z[:, d2:]
        return jnp.concatenate([z1 * cos + z2 * sin,
                                -z1 * sin + z2 * cos], axis=1)

    # per-(batch, head) attention, statically unrolled (B*H = 12 tiny tiles).
    y_rows = []
    for b in range(B):
        r0 = b * T
        head_cols = []
        for h in range(H):
            c0 = h * D
            qh = qkv[r0:r0 + T, c0:c0 + D]                       # (T, D)
            kh = qkv[r0:r0 + T, C + c0:C + c0 + D]
            vh = qkv[r0:r0 + T, 2 * C + c0:2 * C + c0 + D]
            qh = rope(head_rms(qh)) * scale          # fold 1/sqrt(D) into q
            kh = rope(head_rms(kh))
            s = lax.dot_general(qh.astype(bf16), kh.astype(bf16),
                                dimension_numbers=(((1,), (1,)), ((), ())),
                                preferred_element_type=f32)      # (T, T)
            # q/k are per-head RMS-normalised => |s| <= sqrt(D) ~ 4, so exp()
            # cannot overflow without the usual row-max subtraction.
            p = jnp.exp(s) * causal
            denom = jnp.sum(p, axis=-1, keepdims=True)           # lane row-sum
            p = p * pl.reciprocal(denom, approx=True)            # EUP slot
            head_cols.append(jnp.dot(p.astype(bf16), vh.astype(bf16),
                                     preferred_element_type=f32))  # (T, D)
        y_rows.append(jnp.concatenate(head_cols, axis=1))          # (T, C)
    y = jnp.concatenate(y_rows, axis=0)                            # (B*T, C)

    y = jnp.dot(y.astype(bf16), wo_ref[...], preferred_element_type=f32)
    x = x + y                                        # (B*T, CP), pad lanes stay 0

    # -------- MLP branch: x + c_proj(relu(c_fc(rms_norm(x)))^2) ------------
    xn2 = rms_norm_pad(x)
    hid = jnp.dot(xn2.astype(bf16), wfc_ref[...], preferred_element_type=f32)
    hid = jnp.square(jnp.maximum(hid, 0.0))
    m = jnp.dot(hid.astype(bf16), wp2_ref[...], preferred_element_type=f32)

    o_ref[...] = (x + m).reshape(B, T, CP)           # lane-dense full-vreg store


def make_rotary_tables(seq_len, head_dim, base=10000.0):
    """(T, D/2) cos/sin tables; values rounded through bf16 like the PyTorch cache."""
    inv_freq = 1.0 / (base ** (jnp.arange(0, head_dim, 2, dtype=jnp.float32) / head_dim))
    t = jnp.arange(seq_len, dtype=jnp.float32)
    freqs = jnp.outer(t, inv_freq)                   # (T, D//2)
    cos = jnp.cos(freqs).astype(jnp.bfloat16).astype(jnp.float32)
    sin = jnp.sin(freqs).astype(jnp.bfloat16).astype(jnp.float32)
    return cos, sin


def prepare_params(wq, wk, wv, wo, wfc, wp2):
    """One-time weight fusion / zero-padding to C_PAD / bf16 cast (hoisted out
    of the per-call forward, so it is not re-materialised every step)."""
    C, CP = N_EMBD, C_PAD
    bf16 = jnp.bfloat16
    wqkv = jnp.concatenate([wq, wk, wv], axis=1)                       # (C, 3C)
    wqkv = jnp.pad(wqkv, ((0, CP - C), (0, 0))).astype(bf16)           # (CP, 3C)
    wo_p = jnp.pad(wo, ((0, 0), (0, CP - C))).astype(bf16)             # (C, CP)
    wfc_p = jnp.pad(wfc, ((0, CP - C), (0, 0))).astype(bf16)           # (CP, 4C)
    wp2_p = jnp.pad(wp2, ((0, 0), (0, CP - C))).astype(bf16)           # (4C, CP)
    return wqkv, wo_p, wfc_p, wp2_p


@jax.jit
def block_forward(x, wqkv, wo_p, wfc_p, wp2_p, cos, sin):
    B, T, C = x.shape
    CP, H, D = C_PAD, N_HEAD, HEAD_DIM
    x_pad = jnp.pad(x, ((0, 0), (0, 0), (0, CP - C)))          # lane-dense input

    def const_spec(arr):
        nd = arr.ndim
        return pl.BlockSpec(arr.shape, lambda i, _nd=nd: (0,) * _nd)

    flops = (2 * B * T * CP * 3 * C            # fused qkv
             + 4 * B * H * T * T * D           # scores + p@v
             + 2 * B * T * C * CP              # attn c_proj
             + 2 * B * T * CP * 4 * C          # mlp c_fc
             + 2 * B * T * 4 * C * CP)         # mlp c_proj
    transcendentals = B * (H * T * T + 3 * H * T + 2 * T)      # exp + rsqrt + recip
    bytes_accessed = (2 * B * T * CP * 4
                      + 2 * (wqkv.size + wo_p.size + wfc_p.size + wp2_p.size)
                      + 4 * (cos.size + sin.size))

    out_pad = pl.pallas_call(
        block_kernel,
        out_shape=jax.ShapeDtypeStruct((B, T, CP), jnp.float32),
        grid=(1,),                              # toy shapes: fold B into one step
        in_specs=[
            pl.BlockSpec((B, T, CP), lambda i: (0, 0, 0)),      # x (padded)
            const_spec(wqkv), const_spec(wo_p),
            const_spec(wfc_p), const_spec(wp2_p),
            const_spec(cos), const_spec(sin),
        ],
        out_specs=pl.BlockSpec((B, T, CP), lambda i: (0, 0, 0)),
        compiler_params=pltpu.CompilerParams(
            dimension_semantics=("arbitrary",),
            vmem_limit_bytes=32 * 1024 * 1024),
        cost_estimate=pl.CostEstimate(
            flops=int(flops), transcendentals=int(transcendentals),
            bytes_accessed=int(bytes_accessed)),
    )(x_pad, wqkv, wo_p, wfc_p, wp2_p, cos, sin)
    return out_pad[..., :C]                     # strip lane padding


def block_reference(x, wq, wk, wv, wo, wfc, wp2, cos_half, sin_half):
    """Pure-JAX reference mirroring the PyTorch module (f32)."""
    B, T, C = x.shape
    H, D = N_HEAD, C // N_HEAD
    d2 = D // 2

    def rms(z):
        return z * lax.rsqrt(jnp.mean(z * z, axis=-1, keepdims=True) + EPS)

    xn = rms(x)
    q = (xn @ wq).reshape(B, T, H, D)
    k = (xn @ wk).reshape(B, T, H, D)
    v = (xn @ wv).reshape(B, T, H, D)
    q, k = rms(q), rms(k)

    def rope(z):
        z1, z2 = z[..., :d2], z[..., d2:]
        c = cos_half[None, :, None, :]
        s = sin_half[None, :, None, :]
        return jnp.concatenate([z1 * c + z2 * s, -z1 * s + z2 * c], axis=-1)

    q, k = rope(q), rope(k)
    q, k, v = (t.transpose(0, 2, 1, 3) for t in (q, k, v))     # (B, H, T, D)
    s = jnp.einsum('bhtd,bhud->bhtu', q, k) / math.sqrt(D)
    causal = jnp.tril(jnp.ones((T, T), bool))
    s = jnp.where(causal, s, -jnp.inf)
    p = jax.nn.softmax(s, axis=-1)
    y = jnp.einsum('bhtu,bhud->bhtd', p, v)
    y = y.transpose(0, 2, 1, 3).reshape(B, T, C)
    x = x + y @ wo
    hid = jnp.square(jnp.maximum(rms(x) @ wfc, 0.0))
    return x + hid @ wp2


if __name__ == "__main__":
    key = jax.random.PRNGKey(0)
    B, T, C = 2, 8, N_EMBD

    ks = jax.random.split(key, 7)
    x = jax.random.normal(ks[0], (B, T, C), dtype=jnp.float32)

    # Linear weights stored as (in, out) = W.T of the PyTorch nn.Linear.
    # NOTE: the PyTorch module zero-inits both c_proj weights; small random
    # values are used instead so the kernel exercises the full compute path.
    init = lambda k, shape: 0.02 * jax.random.normal(k, shape, dtype=jnp.float32)
    wq = init(ks[1], (C, C))
    wk = init(ks[2], (C, C))
    wv = init(ks[3], (C, C))
    wo = init(ks[4], (C, C))
    wfc = init(ks[5], (C, 4 * C))
    wp2 = init(ks[6], (4 * C, C))

    cos, sin = make_rotary_tables(T, HEAD_DIM)
    params = prepare_params(wq, wk, wv, wo, wfc, wp2)   # hoisted fuse/pad/bf16

    out = block_forward(x, *params, cos, sin)
    jax.block_until_ready(out)
    assert out.shape == (B, T, C) and out.dtype == jnp.float32

    # correctness vs. a pure-JAX reference (bf16 MXU inputs => loose tolerance)
    ref = block_reference(x, wq, wk, wv, wo, wfc, wp2, cos, sin)
    err = float(jnp.max(jnp.abs(out - ref)))
    assert err < 5e-2, f"max |kernel - reference| = {err}"
    print("KERNEL_OK")
</pallas_src>

<mosaic_0001>
module attributes {stable_mosaic.version = 11 : i64} {
  func.func @block_kernel(%arg0: i32, %arg1: memref<2x8x128xf32, #tpu.memory_space<vmem>>, %arg2: memref<128x288xbf16, #tpu.memory_space<vmem>>, %arg3: memref<96x128xbf16, #tpu.memory_space<vmem>>, %arg4: memref<128x384xbf16, #tpu.memory_space<vmem>>, %arg5: memref<384x128xbf16, #tpu.memory_space<vmem>>, %arg6: memref<8x8xf32, #tpu.memory_space<vmem>>, %arg7: memref<8x8xf32, #tpu.memory_space<vmem>>, %arg8: memref<2x8x128xf32, #tpu.memory_space<vmem>>) attributes {dimension_semantics = [#tpu.dimension_semantics<arbitrary>], iteration_bounds = array<i64: 1>, scalar_prefetch = 0 : i64, scratch_operands = 0 : i64, tpu.core_type = #tpu.core_type<tc>, window_params = [{pipeline_mode = #tpu.pipeline_mode<synchronous>, transform_indices = @transform_0, window_bounds = array<i64: 2, 8, 128>}, {pipeline_mode = #tpu.pipeline_mode<synchronous>, transform_indices = @transform_1, window_bounds = array<i64: 128, 288>}, {pipeline_mode = #tpu.pipeline_mode<synchronous>, transform_indices = @transform_2, window_bounds = array<i64: 96, 128>}, {pipeline_mode = #tpu.pipeline_mode<synchronous>, transform_indices = @transform_3, window_bounds = array<i64: 128, 384>}, {pipeline_mode = #tpu.pipeline_mode<synchronous>, transform_indices = @transform_4, window_bounds = array<i64: 384, 128>}, {pipeline_mode = #tpu.pipeline_mode<synchronous>, transform_indices = @transform_5, window_bounds = array<i64: 8, 8>}, {pipeline_mode = #tpu.pipeline_mode<synchronous>, transform_indices = @transform_6, window_bounds = array<i64: 8, 8>}, {pipeline_mode = #tpu.pipeline_mode<synchronous>, transform_indices = @transform_7, window_bounds = array<i64: 2, 8, 128>}]} {
    %c0 = arith.constant 0 : index
    %c0_0 = arith.constant 0 : index
    %c0_1 = arith.constant 0 : index
    %0 = vector.load %arg1[%c0, %c0_0, %c0_1] : memref<2x8x128xf32, #tpu.memory_space<vmem>>, vector<2x8x128xf32>
    %1 = vector.shape_cast %0 : vector<2x8x128xf32> to vector<16x128xf32>
    %2 = arith.mulf %1, %1 : vector<16x128xf32>
    %cst = arith.constant dense<0.000000e+00> : vector<16xf32>
    %3 = vector.multi_reduction <add>, %2, %cst [1] : vector<16x128xf32> to vector<16xf32>
    %4 = vector.shape_cast %3 : vector<16xf32> to vector<16x1xf32>
    %cst_2 = arith.constant 0.010416667 : f32
    %5 = vector.broadcast %cst_2 : f32 to vector<16x1xf32>
    %6 = arith.mulf %4, %5 : vector<16x1xf32>
    %cst_3 = arith.constant 1.1920929E-7 : f32
    %7 = vector.broadcast %cst_3 : f32 to vector<16x1xf32>
    %8 = arith.addf %6, %7 : vector<16x1xf32>
    %9 = math.rsqrt %8 : vector<16x1xf32>
    %10 = vector.broadcast %9 : vector<16x1xf32> to vector<16x128xf32>
    %11 = arith.mulf %1, %10 : vector<16x128xf32>
    %12 = arith.truncf %11 : vector<16x128xf32> to vector<16x128xbf16>
    %c0_4 = arith.constant 0 : index
    %c0_5 = arith.constant 0 : index
    %13 = vector.load %arg2[%c0_4, %c0_5] : memref<128x288xbf16, #tpu.memory_space<vmem>>, vector<128x288xbf16>
    %cst_6 = arith.constant dense<0.000000e+00> : vector<16x288xf32>
    %14 = tpu.matmul %12, %13, %cst_6 {dimension_numbers = #tpu.dot_dimension_numbers<[1], [0], [0], [1], [0, 0, 1, 1], [], []>} : vector<16x128xbf16>, vector<128x288xbf16>, vector<16x288xf32> -> vector<16x288xf32>
    %c0_7 = arith.constant 0 : index
    %c0_8 = arith.constant 0 : index
    %15 = vector.load %arg6[%c0_7, %c0_8] : memref<8x8xf32, #tpu.memory_space<vmem>>, vector<8x8xf32>
    %c0_9 = arith.constant 0 : index
    %c0_10 = arith.constant 0 : index
    %16 = vector.load %arg7[%c0_9, %c0_10] : memref<8x8xf32, #tpu.memory_space<vmem>>, vector<8x8xf32>
    %17 = tpu.iota {dimensions = array<i32: 0>} : vector<8x8xi32>
    %18 = tpu.iota {dimensions = array<i32: 1>} : vector<8x8xi32>
    %19 = arith.cmpi sge, %17, %18 : vector<8x8xi32>
    %20 = arith.extui %19 : vector<8x8xi1> to vector<8x8xi32>
    %21 = arith.sitofp %20 : vector<8x8xi32> to vector<8x8xf32>
    %22 = vector.extract_strided_slice %14 {offsets = [0, 0], sizes = [8, 16], strides = [1, 1]} : vector<16x288xf32> to vector<8x16xf32>
    %23 = vector.extract_strided_slice %14 {offsets = [0, 96], sizes = [8, 16], strides = [1, 1]} : vector<16x288xf32> to vector<8x16xf32>
    %24 = vector.extract_strided_slice %14 {offsets = [0, 192], sizes = [8, 16], strides = [1, 1]} : vector<16x288xf32> to vector<8x16xf32>
    %25 = arith.mulf %22, %22 : vector<8x16xf32>
    %cst_11 = arith.constant dense<0.000000e+00> : vector<8xf32>
    %26 = vector.multi_reduction <add>, %25, %cst_11 [1] : vector<8x16xf32> to vector<8xf32>
    %27 = vector.shape_cast %26 : vector<8xf32> to vector<8x1xf32>
    %cst_12 = arith.constant 1.600000e+01 : f32
    %28 = vector.broadcast %cst_12 : f32 to vector<8x1xf32>
    %29 = arith.divf %27, %28 : vector<8x1xf32>
    %cst_13 = arith.constant 1.1920929E-7 : f32
    %30 = vector.broadcast %cst_13 : f32 to vector<8x1xf32>
    %31 = arith.addf %29, %30 : vector<8x1xf32>
    %32 = math.rsqrt %31 : vector<8x1xf32>
    %33 = vector.broadcast %32 : vector<8x1xf32> to vector<8x16xf32>
    %34 = arith.mulf %22, %33 : vector<8x16xf32>
    %35 = vector.extract_strided_slice %34 {offsets = [0, 0], sizes = [8, 8], strides = [1, 1]} : vector<8x16xf32> to vector<8x8xf32>
    %36 = vector.extract_strided_slice %34 {offsets = [0, 8], sizes = [8, 8], strides = [1, 1]} : vector<8x16xf32> to vector<8x8xf32>
    %37 = arith.mulf %35, %15 : vector<8x8xf32>
    %38 = arith.mulf %36, %16 : vector<8x8xf32>
    %39 = arith.addf %37, %38 : vector<8x8xf32>
    %cst_14 = arith.constant 0.000000e+00 : f32
    %40 = vector.broadcast %cst_14 : f32 to vector<8x8xf32>
    %41 = arith.subf %40, %35 : vector<8x8xf32>
    %42 = arith.mulf %41, %16 : vector<8x8xf32>
    %43 = arith.mulf %36, %15 : vector<8x8xf32>
    %44 = arith.addf %42, %43 : vector<8x8xf32>
    %45 = tpu.concatenate %39, %44 in 1 : vector<8x8xf32>, vector<8x8xf32> -> vector<8x16xf32>
    %cst_15 = arith.constant 2.500000e-01 : f32
    %46 = vector.broadcast %cst_15 : f32 to vector<8x16xf32>
    %47 = arith.mulf %45, %46 : vector<8x16xf32>
    %48 = arith.mulf %23, %23 : vector<8x16xf32>
    %cst_16 = arith.constant dense<0.000000e+00> : vector<8xf32>
    %49 = vector.multi_reduction <add>, %48, %cst_16 [1] : vector<8x16xf32> to vector<8xf32>
    %50 = vector.shape_cast %49 : vector<8xf32> to vector<8x1xf32>
    %cst_17 = arith.constant 1.600000e+01 : f32
    %51 = vector.broadcast %cst_17 : f32 to vector<8x1xf32>
    %52 = arith.divf %50, %51 : vector<8x1xf32>
    %cst_18 = arith.constant 1.1920929E-7 : f32
    %53 = vector.broadcast %cst_18 : f32 to vector<8x1xf32>
    %54 = arith.addf %52, %53 : vector<8x1xf32>
    %55 = math.rsqrt %54 : vector<8x1xf32>
    %56 = vector.broadcast %55 : vector<8x1xf32> to vector<8x16xf32>
    %57 = arith.mulf %23, %56 : vector<8x16xf32>
    %58 = vector.extract_strided_slice %57 {offsets = [0, 0], sizes = [8, 8], strides = [1, 1]} : vector<8x16xf32> to vector<8x8xf32>
    %59 = vector.extract_strided_slice %57 {offsets = [0, 8], sizes = [8, 8], strides = [1, 1]} : vector<8x16xf32> to vector<8x8xf32>
    %60 = arith.mulf %58, %15 : vector<8x8xf32>
    %61 = arith.mulf %59, %16 : vector<8x8xf32>
    %62 = arith.addf %60, %61 : vector<8x8xf32>
    %cst_19 = arith.constant 0.000000e+00 : f32
    %63 = vector.broadcast %cst_19 : f32 to vector<8x8xf32>
    %64 = arith.subf %63, %58 : vector<8x8xf32>
    %65 = arith.mulf %64, %16 : vector<8x8xf32>
    %66 = arith.mulf %59, %15 : vector<8x8xf32>
    %67 = arith.addf %65, %66 : vector<8x8xf32>
    %68 = tpu.concatenate %62, %67 in 1 : vector<8x8xf32>, vector<8x8xf32> -> vector<8x16xf32>
    %69 = arith.truncf %47 : vector<8x16xf32> to vector<8x16xbf16>
    %70 = arith.truncf %68 : vector<8x16xf32> to vector<8x16xbf16>
    %cst_20 = arith.constant dense<0.000000e+00> : vector<8x8xf32>
    %71 = tpu.matmul %69, %70, %cst_20 {dimension_numbers = #tpu.dot_dimension_numbers<[1], [1], [0], [0], [0, 0, 1, 0], [], []>} : vector<8x16xbf16>, vector<8x16xbf16>, vector<8x8xf32> -> vector<8x8xf32>
    %72 = math.exp %71 : vector<8x8xf32>
    %73 = arith.mulf %72, %21 : vector<8x8xf32>
    %cst_21 = arith.constant dense<0.000000e+00> : vector<8xf32>
    %74 = vector.multi_reduction <add>, %73, %cst_21 [1] : vector<8x8xf32> to vector<8xf32>
    %75 = vector.shape_cast %74 : vector<8xf32> to vector<8x1xf32>
    %76 = tpu.reciprocal %75 {approx = true} : vector<8x1xf32> -> vector<8x1xf32>
    %77 = vector.broadcast %76 : vector<8x1xf32> to vector<8x8xf32>
    %78 = arith.mulf %73, %77 : vector<8x8xf32>
    %79 = arith.truncf %78 : vector<8x8xf32> to vector<8x8xbf16>
    %80 = arith.truncf %24 : vector<8x16xf32> to vector<8x16xbf16>
    %cst_22 = arith.constant dense<0.000000e+00> : vector<8x16xf32>
    %81 = tpu.matmul %79, %80, %cst_22 {dimension_numbers = #tpu.dot_dimension_numbers<[1], [0], [0], [1], [0, 0, 1, 1], [], []>} : vector<8x8xbf16>, vector<8x16xbf16>, vector<8x16xf32> -> vector<8x16xf32>
    %82 = vector.extract_strided_slice %14 {offsets = [0, 16], sizes = [8, 16], strides = [1, 1]} : vector<16x288xf32> to vector<8x16xf32>
    %83 = vector.extract_strided_slice %14 {offsets = [0, 112], sizes = [8, 16], strides = [1, 1]} : vector<16x288xf32> to vector<8x16xf32>
    %84 = vector.extract_strided_slice %14 {offsets = [0, 208], sizes = [8, 16], strides = [1, 1]} : vector<16x288xf32> to vector<8x16xf32>
    %85 = arith.mulf %82, %82 : vector<8x16xf32>
    %cst_23 = arith.constant dense<0.000000e+00> : vector<8xf32>
    %86 = vector.multi_reduction <add>, %85, %cst_23 [1] : vector<8x16xf32> to vector<8xf32>
    %87 = vector.shape_cast %86 : vector<8xf32> to vector<8x1xf32>
    %cst_24 = arith.constant 1.600000e+01 : f32
    %88 = vector.broadcast %cst_24 : f32 to vector<8x1xf32>
    %89 = arith.divf %87, %88 : vector<8x1xf32>
    %cst_25 = arith.constant 1.1920929E-7 : f32
    %90 = vector.broadcast %cst_25 : f32 to vector<8x1xf32>
    %91 = arith.addf %89, %90 : vector<8x1xf32>
    %92 = math.rsqrt %91 : vector<8x1xf32>
    %93 = vector.broadcast %92 : vector<8x1xf32> to vector<8x16xf32>
    %94 = arith.mulf %82, %93 : vector<8x16xf32>
    %95 = vector.extract_strided_slice %94 {offsets = [0, 0], sizes = [8, 8], strides = [1, 1]} : vector<8x16xf32> to vector<8x8xf32>
    %96 = vector.extract_strided_slice %94 {offsets = [0, 8], sizes = [8, 8], strides = [1, 1]} : vector<8x16xf32> to vector<8x8xf32>
    %97 = arith.mulf %95, %15 : vector<8x8xf32>
    %98 = arith.mulf %96, %16 : vector<8x8xf32>
    %99 = arith.addf %97, %98 : vector<8x8xf32>
    %cst_26 = arith.constant 0.000000e+00 : f32
    %100 = vector.broadcast %cst_26 : f32 to vector<8x8xf32>
    %101 = arith.subf %100, %95 : vector<8x8xf32>
    %102 = arith.mulf %101, %16 : vector<8x8xf32>
    %103 = arith.mulf %96, %15 : vector<8x8xf32>
    %104 = arith.addf %102, %103 : vector<8x8xf32>
    %105 = tpu.concatenate %99, %104 in 1 : vector<8x8xf32>, vector<8x8xf32> -> vector<8x16xf32>
    %cst_27 = arith.constant 2.500000e-01 : f32
    %106 = vector.broadcast %cst_27 : f32 to vector<8x16xf32>
    %107 = arith.mulf %105, %106 : vector<8x16xf32>
    %108 = arith.mulf %83, %83 : vector<8x16xf32>
    %cst_28 = arith.constant dense<0.000000e+00> : vector<8xf32>
    %109 = vector.multi_reduction <add>, %108, %cst_28 [1] : vector<8x16xf32> to vector<8xf32>
    %110 = vector.shape_cast %109 : vector<8xf32> to vector<8x1xf32>
    %cst_29 = arith.constant 1.600000e+01 : f32
    %111 = vector.broadcast %cst_29 : f32 to vector<8x1xf32>
    %112 = arith.divf %110, %111 : vector<8x1xf32>
    %cst_30 = arith.constant 1.1920929E-7 : f32
    %113 = vector.broadcast %cst_30 : f32 to vector<8x1xf32>
    %114 = arith.addf %112, %113 : vector<8x1xf32>
    %115 = math.rsqrt %114 : vector<8x1xf32>
    %116 = vector.broadcast %115 : vector<8x1xf32> to vector<8x16xf32>
    %117 = arith.mulf %83, %116 : vector<8x16xf32>
    %118 = vector.extract_strided_slice %117 {offsets = [0, 0], sizes = [8, 8], strides = [1, 1]} : vector<8x16xf32> to vector<8x8xf32>
    %119 = vector.extract_strided_slice %117 {offsets = [0, 8], sizes = [8, 8], strides = [1, 1]} : vector<8x16xf32> to vector<8x8xf32>
    %120 = arith.mulf %118, %15 : vector<8x8xf32>
    %121 = arith.mulf %119, %16 : vector<8x8xf32>
    %122 = arith.addf %120, %121 : vector<8x8xf32>
    %cst_31 = arith.constant 0.000000e+00 : f32
    %123 = vector.broadcast %cst_31 : f32 to vector<8x8xf32>
    %124 = arith.subf %123, %118 : vector<8x8xf32>
    %125 = arith.mulf %124, %16 : vector<8x8xf32>
    %126 = arith.mulf %119, %15 : vector<8x8xf32>
    %127 = arith.addf %125, %126 : vector<8x8xf32>
    %128 = tpu.concatenate %122, %127 in 1 : vector<8x8xf32>, vector<8x8xf32> -> vector<8x16xf32>
    %129 = arith.truncf %107 : vector<8x16xf32> to vector<8x16xbf16>
    %130 = arith.truncf %128 : vector<8x16xf32> to vector<8x16xbf16>
    %cst_32 = arith.constant dense<0.000000e+00> : vector<8x8xf32>
    %131 = tpu.matmul %129, %130, %cst_32 {dimension_numbers = #tpu.dot_dimension_numbers<[1], [1], [0], [0], [0, 0, 1, 0], [], []>} : vector<8x16xbf16>, vector<8x16xbf16>, vector<8x8xf32> -> vector<8x8xf32>
    %132 = math.exp %131 : vector<8x8xf32>
    %133 = arith.mulf %132, %21 : vector<8x8xf32>
    %cst_33 = arith.constant dense<0.000000e+00> : vector<8xf32>
    %134 = vector.multi_reduction <add>, %133, %cst_33 [1] : vector<8x8xf32> to vector<8xf32>
    %135 = vector.shape_cast %134 : vector<8xf32> to vector<8x1xf32>
    %136 = tpu.reciprocal %135 {approx = true} : vector<8x1xf32> -> vector<8x1xf32>
    %137 = vector.broadcast %136 : vector<8x1xf32> to vector<8x8xf32>
    %138 = arith.mulf %133, %137 : vector<8x8xf32>
    %139 = arith.truncf %138 : vector<8x8xf32> to vector<8x8xbf16>
    %140 = arith.truncf %84 : vector<8x16xf32> to vector<8x16xbf16>
    %cst_34 = arith.constant dense<0.000000e+00> : vector<8x16xf32>
    %141 = tpu.matmul %139, %140, %cst_34 {dimension_numbers = #tpu.dot_dimension_numbers<[1], [0], [0], [1], [0, 0, 1, 1], [], []>} : vector<8x8xbf16>, vector<8x16xbf16>, vector<8x16xf32> -> vector<8x16xf32>
    %142 = vector.extract_strided_slice %14 {offsets = [0, 32], sizes = [8, 16], strides = [1, 1]} : vector<16x288xf32> to vector<8x16xf32>
    %143 = vector.extract_strided_slice %14 {offsets = [0, 128], sizes = [8, 16], strides = [1, 1]} : vector<16x288xf32> to vector<8x16xf32>
    %144 = vector.extract_strided_slice %14 {offsets = [0, 224], sizes = [8, 16], strides = [1, 1]} : vector<16x288xf32> to vector<8x16xf32>
    %145 = arith.mulf %142, %142 : vector<8x16xf32>
    %cst_35 = arith.constant dense<0.000000e+00> : vector<8xf32>
    %146 = vector.multi_reduction <add>, %145, %cst_35 [1] : vector<8x16xf32> to vector<8xf32>
    %147 = vector.shape_cast %146 : vector<8xf32> to vector<8x1xf32>
    %cst_36 = arith.constant 1.600000e+01 : f32
    %148 = vector.broadcast %cst_36 : f32 to vector<8x1xf32>
    %149 = arith.divf %147, %148 : vector<8x1xf32>
    %cst_37 = arith.constant 1.1920929E-7 : f32
    %150 = vector.broadcast %cst_37 : f32 to vector<8x1xf32>
    %151 = arith.addf %149, %150 : vector<8x1xf32>
    %152 = math.rsqrt %151 : vector<8x1xf32>
    %153 = vector.broadcast %152 : vector<8x1xf32> to vector<8x16xf32>
    %154 = arith.mulf %142, %153 : vector<8x16xf32>
    %155 = vector.extract_strided_slice %154 {offsets = [0, 0], sizes = [8, 8], strides = [1, 1]} : vector<8x16xf32> to vector<8x8xf32>
    %156 = vector.extract_strided_slice %154 {offsets = [0, 8], sizes = [8, 8], strides = [1, 1]} : vector<8x16xf32> to vector<8x8xf32>
    %157 = arith.mulf %155, %15 : vector<8x8xf32>
    %158 = arith.mulf %156, %16 : vector<8x8xf32>
    %159 = arith.addf %157, %158 : vector<8x8xf32>
    %cst_38 = arith.constant 0.000000e+00 : f32
    %160 = vector.broadcast %cst_38 : f32 to vector<8x8xf32>
    %161 = arith.subf %160, %155 : vector<8x8xf32>
    %162 = arith.mulf %161, %16 : vector<8x8xf32>
    %163 = arith.mulf %156, %15 : vector<8x8xf32>
    %164 = arith.addf %162, %163 : vector<8x8xf32>
    %165 = tpu.concatenate %159, %164 in 1 : vector<8x8xf32>, vector<8x8xf32> -> vector<8x16xf32>
    %cst_39 = arith.constant 2.500000e-01 : f32
    %166 = vector.broadcast %cst_39 : f32 to vector<8x16xf32>
    %167 = arith.mulf %165, %166 : vector<8x16xf32>
    %168 = arith.mulf %143, %143 : vector<8x16xf32>
    %cst_40 = arith.constant dense<0.000000e+00> : vector<8xf32>
    %169 = vector.multi_reduction <add>, %168, %cst_40 [1] : vector<8x16xf32> to vector<8xf32>
    %170 = vector.shape_cast %169 : vector<8xf32> to vector<8x1xf32>
    %cst_41 = arith.constant 1.600000e+01 : f32
    %171 = vector.broadcast %cst_41 : f32 to vector<8x1xf32>
    %172 = arith.divf %170, %171 : vector<8x1xf32>
    %cst_42 = arith.constant 1.1920929E-7 : f32
    %173 = vector.broadcast %cst_42 : f32 to vector<8x1xf32>
    %174 = arith.addf %172, %173 : vector<8x1xf32>
    %175 = math.rsqrt %174 : vector<8x1xf32>
    %176 = vector.broadcast %175 : vector<8x1xf32> to vector<8x16xf32>
    %177 = arith.mulf %143, %176 : vector<8x16xf32>
    %178 = vector.extract_strided_slice %177 {offsets = [0, 0], sizes = [8, 8], strides = [1, 1]} : vector<8x16xf32> to vector<8x8xf32>
    %179 = vector.extract_strided_slice %177 {offsets = [0, 8], sizes = [8, 8], strides = [1, 1]} : vector<8x16xf32> to vector<8x8xf32>
    %180 = arith.mulf %178, %15 : vector<8x8xf32>
    %181 = arith.mulf %179, %16 : vector<8x8xf32>
    %182 = arith.addf %180, %181 : vector<8x8xf32>
    %cst_43 = arith.constant 0.000000e+00 : f32
    %183 = vector.broadcast %cst_43 : f32 to vector<8x8xf32>
    %184 = arith.subf %183, %178 : vector<8x8xf32>
    %185 = arith.mulf %184, %16 : vector<8x8xf32>
    %186 = arith.mulf %179, %15 : vector<8x8xf32>
    %187 = arith.addf %185, %186 : vector<8x8xf32>
    %188 = tpu.concatenate %182, %187 in 1 : vector<8x8xf32>, vector<8x8xf32> -> vector<8x16xf32>
    %189 = arith.truncf %167 : vector<8x16xf32> to vector<8x16xbf16>
    %190 = arith.truncf %188 : vector<8x16xf32> to vector<8x16xbf16>
    %cst_44 = arith.constant dense<0.000000e+00> : vector<8x8xf32>
    %191 = tpu.matmul %189, %190, %cst_44 {dimension_numbers = #tpu.dot_dimension_numbers<[1], [1], [0], [0], [0, 0, 1, 0], [], []>} : vector<8x16xbf16>, vector<8x16xbf16>, vector<8x8xf32> -> vector<8x8xf32>
    %192 = math.exp %191 : vector<8x8xf32>
    %193 = arith.mulf %192, %21 : vector<8x8xf32>
    %cst_45 = arith.constant dense<0.000000e+00> : vector<8xf32>
    %194 = vector.multi_reduction <add>, %193, %cst_45 [1] : vector<8x8xf32> to vector<8xf32>
    %195 = vector.shape_cast %194 : vector<8xf32> to vector<8x1xf32>
    %196 = tpu.reciprocal %195 {approx = true} : vector<8x1xf32> -> vector<8x1xf32>
    %197 = vector.broadcast %196 : vector<8x1xf32> to vector<8x8xf32>
    %198 = arith.mulf %193, %197 : vector<8x8xf32>
    %199 = arith.truncf %198 : vector<8x8xf32> to vector<8x8xbf16>
    %200 = arith.truncf %144 : vector<8x16xf32> to vector<8x16xbf16>
    %cst_46 = arith.constant dense<0.000000e+00> : vector<8x16xf32>
    %201 = tpu.matmul %199, %200, %cst_46 {dimension_numbers = #tpu.dot_dimension_numbers<[1], [0], [0], [1], [0, 0, 1, 1], [], []>} : vector<8x8xbf16>, vector<8x16xbf16>, vector<8x16xf32> -> vector<8x16xf32>
    %202 = vector.extract_strided_slice %14 {offsets = [0, 48], sizes = [8, 16], strides = [1, 1]} : vector<16x288xf32> to vector<8x16xf32>
    %203 = vector.extract_strided_slice %14 {offsets = [0, 144], sizes = [8, 16], strides = [1, 1]} : vector<16x288xf32> to vector<8x16xf32>
    %204 = vector.extract_strided_slice %14 {offsets = [0, 240], sizes = [8, 16], strides = [1, 1]} : vector<16x288xf32> to vector<8x16xf32>
    %205 = arith.mulf %202, %202 : vector<8x16xf32>
    %cst_47 = arith.constant dense<0.000000e+00> : vector<8xf32>
    %206 = vector.multi_reduction <add>, %205, %cst_47 [1] : vector<8x16xf32> to vector<8xf32>
    %207 = vector.shape_cast %206 : vector<8xf32> to vector<8x1xf32>
    %cst_48 = arith.constant 1.600000e+01 : f32
    %208 = vector.broadcast %cst_48 : f32 to vector<8x1xf32>
    %209 = arith.divf %207, %208 : vector<8x1xf32>
    %cst_49 = arith.constant 1.1920929E-7 : f32
    %210 = vector.broadcast %cst_49 : f32 to vector<8x1xf32>
    %211 = arith.addf %209, %210 : vector<8x1xf32>
    %212 = math.rsqrt %211 : vector<8x1xf32>
    %213 = vector.broadcast %212 : vector<8x1xf32> to vector<8x16xf32>
    %214 = arith.mulf %202, %213 : vector<8x16xf32>
    %215 = vector.extract_strided_slice %214 {offsets = [0, 0], sizes = [8, 8], strides = [1, 1]} : vector<8x16xf32> to vector<8x8xf32>
    %216 = vector.extract_strided_slice %214 {offsets = [0, 8], sizes = [8, 8], strides = [1, 1]} : vector<8x16xf32> to vector<8x8xf32>
    %217 = arith.mulf %215, %15 : vector<8x8xf32>
    %218 = arith.mulf %216, %16 : vector<8x8xf32>
    %219 = arith.addf %217, %218 : vector<8x8xf32>
    %cst_50 = arith.constant 0.000000e+00 : f32
    %220 = vector.broadcast %cst_50 : f32 to vector<8x8xf32>
    %221 = arith.subf %220, %215 : vector<8x8xf32>
    %222 = arith.mulf %221, %16 : vector<8x8xf32>
    %223 = arith.mulf %216, %15 : vector<8x8xf32>
    %224 = arith.addf %222, %223 : vector<8x8xf32>
    %225 = tpu.concatenate %219, %224 in 1 : vector<8x8xf32>, vector<8x8xf32> -> vector<8x16xf32>
    %cst_51 = arith.constant 2.500000e-01 : f32
    %226 = vector.broadcast %cst_51 : f32 to vector<8x16xf32>
    %227 = arith.mulf %225, %226 : vector<8x16xf32>
    %228 = arith.mulf %203, %203 : vector<8x16xf32>
    %cst_52 = arith.constant dense<0.000000e+00> : vector<8xf32>
    %229 = vector.multi_reduction <add>, %228, %cst_52 [1] : vector<8x16xf32> to vector<8xf32>
    %230 = vector.shape_cast %229 : vector<8xf32> to vector<8x1xf32>
    %cst_53 = arith.constant 1.600000e+01 : f32
    %231 = vector.broadcast %cst_53 : f32 to vector<8x1xf32>
    %232 = arith.divf %230, %231 : vector<8x1xf32>
    %cst_54 = arith.constant 1.1920929E-7 : f32
    %233 = vector.broadcast %cst_54 : f32 to vector<8x1xf32>
    %234 = arith.addf %232, %233 : vector<8x1xf32>
    %235 = math.rsqrt %234 : vector<8x1xf32>
    %236 = vector.broadcast %235 : vector<8x1xf32> to vector<8x16xf32>
    %237 = arith.mulf %203, %236 : vector<8x16xf32>
    %238 = vector.extract_strided_slice %237 {offsets = [0, 0], sizes = [8, 8], strides = [1, 1]} : vector<8x16xf32> to vector<8x8xf32>
    %239 = vector.extract_strided_slice %237 {offsets = [0, 8], sizes = [8, 8], strides = [1, 1]} : vector<8x16xf32> to vector<8x8xf32>
    %240 = arith.mulf %238, %15 : vector<8x8xf32>
    %241 = arith.mulf %239, %16 : vector<8x8xf32>
    %242 = arith.addf %240, %241 : vector<8x8xf32>
    %cst_55 = arith.constant 0.000000e+00 : f32
    %243 = vector.broadcast %cst_55 : f32 to vector<8x8xf32>
    %244 = arith.subf %243, %238 : vector<8x8xf32>
    %245 = arith.mulf %244, %16 : vector<8x8xf32>
    %246 = arith.mulf %239, %15 : vector<8x8xf32>
    %247 = arith.addf %245, %246 : vector<8x8xf32>
    %248 = tpu.concatenate %242, %247 in 1 : vector<8x8xf32>, vector<8x8xf32> -> vector<8x16xf32>
    %249 = arith.truncf %227 : vector<8x16xf32> to vector<8x16xbf16>
    %250 = arith.truncf %248 : vector<8x16xf32> to vector<8x16xbf16>
    %cst_56 = arith.constant dense<0.000000e+00> : vector<8x8xf32>
    %251 = tpu.matmul %249, %250, %cst_56 {dimension_numbers = #tpu.dot_dimension_numbers<[1], [1], [0], [0], [0, 0, 1, 0], [], []>} : vector<8x16xbf16>, vector<8x16xbf16>, vector<8x8xf32> -> vector<8x8xf32>
    %252 = math.exp %251 : vector<8x8xf32>
    %253 = arith.mulf %252, %21 : vector<8x8xf32>
    %cst_57 = arith.constant dense<0.000000e+00> : vector<8xf32>
    %254 = vector.multi_reduction <add>, %253, %cst_57 [1] : vector<8x8xf32> to vector<8xf32>
    %255 = vector.shape_cast %254 : vector<8xf32> to vector<8x1xf32>
    %256 = tpu.reciprocal %255 {approx = true} : vector<8x1xf32> -> vector<8x1xf32>
    %257 = vector.broadcast %256 : vector<8x1xf32> to vector<8x8xf32>
    %258 = arith.mulf %253, %257 : vector<8x8xf32>
    %259 = arith.truncf %258 : vector<8x8xf32> to vector<8x8xbf16>
    %260 = arith.truncf %204 : vector<8x16xf32> to vector<8x16xbf16>
    %cst_58 = arith.constant dense<0.000000e+00> : vector<8x16xf32>
    %261 = tpu.matmul %259, %260, %cst_58 {dimension_numbers = #tpu.dot_dimension_numbers<[1], [0], [0], [1], [0, 0, 1, 1], [], []>} : vector<8x8xbf16>, vector<8x16xbf16>, vector<8x16xf32> -> vector<8x16xf32>
    %262 = vector.extract_strided_slice %14 {offsets = [0, 64], sizes = [8, 16], strides = [1, 1]} : vector<16x288xf32> to vector<8x16xf32>
    %263 = vector.extract_strided_slice %14 {offsets = [0, 160], sizes = [8, 16], strides = [1, 1]} : vector<16x288xf32> to vector<8x16xf32>
    %264 = vector.extract_strided_slice %14 {offsets = [0, 256], sizes = [8, 16], strides = [1, 1]} : vector<16x288xf32> to vector<8x16xf32>
    %265 = arith.mulf %262, %262 : vector<8x16xf32>
    %cst_59 = arith.constant dense<0.000000e+00> : vector<8xf32>
    %266 = vector.multi_reduction <add>, %265, %cst_59 [1] : vector<8x16xf32> to vector<8xf32>
    %267 = vector.shape_cast %266 : vector<8xf32> to vector<8x1xf32>
    %cst_60 = arith.constant 1.600000e+01 : f32
    %268 = vector.broadcast %cst_60 : f32 to vector<8x1xf32>
    %269 = arith.divf %267, %268 : vector<8x1xf32>
    %cst_61 = arith.constant 1.1920929E-7 : f32
    %270 = vector.broadcast %cst_61 : f32 to vector<8x1xf32>
    %271 = arith.addf %269, %270 : vector<8x1xf32>
    %272 = math.rsqrt %271 : vector<8x1xf32>
    %273 = vector.broadcast %272 : vector<8x1xf32> to vector<8x16xf32>
    %274 = arith.mulf %262, %273 : vector<8x16xf32>
    %275 = vector.extract_strided_slice %274 {offsets = [0, 0], sizes = [8, 8], strides = [1, 1]} : vector<8x16xf32> to vector<8x8xf32>
    %276 = vector.extract_strided_slice %274 {offsets = [0, 8], sizes = [8, 8], strides = [1, 1]} : vector<8x16xf32> to vector<8x8xf32>
    %277 = arith.mulf %275, %15 : vector<8x8xf32>
    %278 = arith.mulf %276, %16 : vector<8x8xf32>
    %279 = arith.addf %277, %278 : vector<8x8xf32>
    %cst_62 = arith.constant 0.000000e+00 : f32
    %280 = vector.broadcast %cst_62 : f32 to vector<8x8xf32>
    %281 = arith.subf %280, %275 : vector<8x8xf32>
    %282 = arith.mulf %281, %16 : vector<8x8xf32>
    %283 = arith.mulf %276, %15 : vector<8x8xf32>
    %284 = arith.addf %282, %283 : vector<8x8xf32>
    %285 = tpu.concatenate %279, %284 in 1 : vector<8x8xf32>, vector<8x8xf32> -> vector<8x16xf32>
    %cst_63 = arith.constant 2.500000e-01 : f32
    %286 = vector.broadcast %cst_63 : f32 to vector<8x16xf32>
    %287 = arith.mulf %285, %286 : vector<8x16xf32>
    %288 = arith.mulf %263, %263 : vector<8x16xf32>
    %cst_64 = arith.constant dense<0.000000e+00> : vector<8xf32>
    %289 = vector.multi_reduction <add>, %288, %cst_64 [1] : vector<8x16xf32> to vector<8xf32>
    %290 = vector.shape_cast %289 : vector<8xf32> to vector<8x1xf32>
    %cst_65 = arith.constant 1.600000e+01 : f32
    %291 = vector.broadcast %cst_65 : f32 to vector<8x1xf32>
    %292 = arith.divf %290, %291 : vector<8x1xf32>
    %cst_66 = arith.constant 1.1920929E-7 : f32
    %293 = vector.broadcast %cst_66 : f32 to vector<8x1xf32>
    %294 = arith.addf %292, %293 : vector<8x1xf32>
    %295 = math.rsqrt %294 : vector<8x1xf32>
    %296 = vector.broadcast %295 : vector<8x1xf32> to vector<8x16xf32>
    %297 = arith.mulf %263, %296 : vector<8x16xf32>
    %298 = vector.extract_strided_slice %297 {offsets = [0, 0], sizes = [8, 8], strides = [1, 1]} : vector<8x16xf32> to vector<8x8xf32>
    %299 = vector.extract_strided_slice %297 {offsets = [0, 8], sizes = [8, 8], strides = [1, 1]} : vector<8x16xf32> to vector<8x8xf32>
    %300 = arith.mulf %298, %15 : vector<8x8xf32>
    %301 = arith.mulf %299, %16 : vector<8x8xf32>
    %302 = arith.addf %300, %301 : vector<8x8xf32>
    %cst_67 = arith.constant 0.000000e+00 : f32
    %303 = vector.broadcast %cst_67 : f32 to vector<8x8xf32>
    %304 = arith.subf %303, %298 : vector<8x8xf32>
    %305 = arith.mulf %304, %16 : vector<8x8xf32>
    %306 = arith.mulf %299, %15 : vector<8x8xf32>
    %307 = arith.addf %305, %306 : vector<8x8xf32>
    %308 = tpu.concatenate %302, %307 in 1 : vector<8x8xf32>, vector<8x8xf32> -> vector<8x16xf32>
    %309 = arith.truncf %287 : vector<8x16xf32> to vector<8x16xbf16>
    %310 = arith.truncf %308 : vector<8x16xf32> to vector<8x16xbf16>
    %cst_68 = arith.constant dense<0.000000e+00> : vector<8x8xf32>
    %311 = tpu.matmul %309, %310, %cst_68 {dimension_numbers = #tpu.dot_dimension_numbers<[1], [1], [0], [0], [0, 0, 1, 0], [], []>} : vector<8x16xbf16>, vector<8x16xbf16>, vector<8x8xf32> -> vector<8x8xf32>
    %312 = math.exp %311 : vector<8x8xf32>
    %313 = arith.mulf %312, %21 : vector<8x8xf32>
    %cst_69 = arith.constant dense<0.000000e+00> : vector<8xf32>
    %314 = vector.multi_reduction <add>, %313, %cst_69 [1] : vector<8x8xf32> to vector<8xf32>
    %315 = vector.shape_cast %314 : vector<8xf32> to vector<8x1xf32>
    %316 = tpu.reciprocal %315 {approx = true} : vector<8x1xf32> -> vector<8x1xf32>
    %317 = vector.broadcast %316 : vector<8x1xf32> to vector<8x8xf32>
    %318 = arith.mulf %313, %317 : vector<8x8xf32>
    %319 = arith.truncf %318 : vector<8x8xf32> to vector<8x8xbf16>
    %320 = arith.truncf %264 : vector<8x16xf32> to vector<8x16xbf16>
    %cst_70 = arith.constant dense<0.000000e+00> : vector<8x16xf32>
    %321 = tpu.matmul %319, %320, %cst_70 {dimension_numbers = #tpu.dot_dimension_numbers<[1], [0], [0], [1], [0, 0, 1, 1], [], []>} : vector<8x8xbf16>, vector<8x16xbf16>, vector<8x16xf32> -> vector<8x16xf32>
    %322 = vector.extract_strided_slice %14 {offsets = [0, 80], sizes = [8, 16], strides = [1, 1]} : vector<16x288xf32> to vector<8x16xf32>
    %323 = vector.extract_strided_slice %14 {offsets = [0, 176], sizes = [8, 16], strides = [1, 1]} : vector<16x288xf32> to vector<8x16xf32>
    %324 = vector.extract_strided_slice %14 {offsets = [0, 272], sizes = [8, 16], strides = [1, 1]} : vector<16x288xf32> to vector<8x16xf32>
    %325 = arith.mulf %322, %322 : vector<8x16xf32>
    %cst_71 = arith.constant dense<0.000000e+00> : vector<8xf32>
    %326 = vector.multi_reduction <add>, %325, %cst_71 [1] : vector<8x16xf32> to vector<8xf32>
    %327 = vector.shape_cast %326 : vector<8xf32> to vector<8x1xf32>
    %cst_72 = arith.constant 1.600000e+01 : f32
    %328 = vector.broadcast %cst_72 : f32 to vector<8x1xf32>
    %329 = arith.divf %327, %328 : vector<8x1xf32>
    %cst_73 = arith.constant 1.1920929E-7 : f32
    %330 = vector.broadcast %cst_73 : f32 to vector<8x1xf32>
    %331 = arith.addf %329, %330 : vector<8x1xf32>
    %332 = math.rsqrt %331 : vector<8x1xf32>
    %333 = vector.broadcast %332 : vector<8x1xf32> to vector<8x16xf32>
    %334 = arith.mulf %322, %333 : vector<8x16xf32>
    %335 = vector.extract_strided_slice %334 {offsets = [0, 0], sizes = [8, 8], strides = [1, 1]} : vector<8x16xf32> to vector<8x8xf32>
    %336 = vector.extract_strided_slice %334 {offsets = [0, 8], sizes = [8, 8], strides = [1, 1]} : vector<8x16xf32> to vector<8x8xf32>
    %337 = arith.mulf %335, %15 : vector<8x8xf32>
    %338 = arith.mulf %336, %16 : vector<8x8xf32>
    %339 = arith.addf %337, %338 : vector<8x8xf32>
    %cst_74 = arith.constant 0.000000e+00 : f32
    %340 = vector.broadcast %cst_74 : f32 to vector<8x8xf32>
    %341 = arith.subf %340, %335 : vector<8x8xf32>
    %342 = arith.mulf %341, %16 : vector<8x8xf32>
    %343 = arith.mulf %336, %15 : vector<8x8xf32>
    %344 = arith.addf %342, %343 : vector<8x8xf32>
    %345 = tpu.concatenate %339, %344 in 1 : vector<8x8xf32>, vector<8x8xf32> -> vector<8x16xf32>
    %cst_75 = arith.constant 2.500000e-01 : f32
    %346 = vector.broadcast %cst_75 : f32 to vector<8x16xf32>
    %347 = arith.mulf %345, %346 : vector<8x16xf32>
    %348 = arith.mulf %323, %323 : vector<8x16xf32>
    %cst_76 = arith.constant dense<0.000000e+00> : vector<8xf32>
    %349 = vector.multi_reduction <add>, %348, %cst_76 [1] : vector<8x16xf32> to vector<8xf32>
    %350 = vector.shape_cast %349 : vector<8xf32> to vector<8x1xf32>
    %cst_77 = arith.constant 1.600000e+01 : f32
    %351 = vector.broadcast %cst_77 : f32 to vector<8x1xf32>
    %352 = arith.divf %350, %351 : vector<8x1xf32>
    %cst_78 = arith.constant 1.1920929E-7 : f32
    %353 = vector.broadcast %cst_78 : f32 to vector<8x1xf32>
    %354 = arith.addf %352, %353 : vector<8x1xf32>
    %355 = math.rsqrt %354 : vector<8x1xf32>
    %356 = vector.broadcast %355 : vector<8x1xf32> to vector<8x16xf32>
    %357 = arith.mulf %323, %356 : vector<8x16xf32>
    %358 = vector.extract_strided_slice %357 {offsets = [0, 0], sizes = [8, 8], strides = [1, 1]} : vector<8x16xf32> to vector<8x8xf32>
    %359 = vector.extract_strided_slice %357 {offsets = [0, 8], sizes = [8, 8], strides = [1, 1]} : vector<8x16xf32> to vector<8x8xf32>
    %360 = arith.mulf %358, %15 : vector<8x8xf32>
    %361 = arith.mulf %359, %16 : vector<8x8xf32>
    %362 = arith.addf %360, %361 : vector<8x8xf32>
    %cst_79 = arith.constant 0.000000e+00 : f32
    %363 = vector.broadcast %cst_79 : f32 to vector<8x8xf32>
    %364 = arith.subf %363, %358 : vector<8x8xf32>
    %365 = arith.mulf %364, %16 : vector<8x8xf32>
    %366 = arith.mulf %359, %15 : vector<8x8xf32>
    %367 = arith.addf %365, %366 : vector<8x8xf32>
    %368 = tpu.concatenate %362, %367 in 1 : vector<8x8xf32>, vector<8x8xf32> -> vector<8x16xf32>
    %369 = arith.truncf %347 : vector<8x16xf32> to vector<8x16xbf16>
    %370 = arith.truncf %368 : vector<8x16xf32> to vector<8x16xbf16>
    %cst_80 = arith.constant dense<0.000000e+00> : vector<8x8xf32>
    %371 = tpu.matmul %369, %370, %cst_80 {dimension_numbers = #tpu.dot_dimension_numbers<[1], [1], [0], [0], [0, 0, 1, 0], [], []>} : vector<8x16xbf16>, vector<8x16xbf16>, vector<8x8xf32> -> vector<8x8xf32>
    %372 = math.exp %371 : vector<8x8xf32>
    %373 = arith.mulf %372, %21 : vector<8x8xf32>
    %cst_81 = arith.constant dense<0.000000e+00> : vector<8xf32>
    %374 = vector.multi_reduction <add>, %373, %cst_81 [1] : vector<8x8xf32> to vector<8xf32>
    %375 = vector.shape_cast %374 : vector<8xf32> to vector<8x1xf32>
    %376 = tpu.reciprocal %375 {approx = true} : vector<8x1xf32> -> vector<8x1xf32>
    %377 = vector.broadcast %376 : vector<8x1xf32> to vector<8x8xf32>
    %378 = arith.mulf %373, %377 : vector<8x8xf32>
    %379 = arith.truncf %378 : vector<8x8xf32> to vector<8x8xbf16>
    %380 = arith.truncf %324 : vector<8x16xf32> to vector<8x16xbf16>
    %cst_82 = arith.constant dense<0.000000e+00> : vector<8x16xf32>
    %381 = tpu.matmul %379, %380, %cst_82 {dimension_numbers = #tpu.dot_dimension_numbers<[1], [0], [0], [1], [0, 0, 1, 1], [], []>} : vector<8x8xbf16>, vector<8x16xbf16>, vector<8x16xf32> -> vector<8x16xf32>
    %382 = tpu.concatenate %81, %141, %201, %261, %321, %381 in 1 : vector<8x16xf32>, vector<8x16xf32>, vector<8x16xf32>, vector<8x16xf32>, vector<8x16xf32>, vector<8x16xf32> -> vector<8x96xf32>
    %383 = vector.extract_strided_slice %14 {offsets = [8, 0], sizes = [8, 16], strides = [1, 1]} : vector<16x288xf32> to vector<8x16xf32>
    %384 = vector.extract_strided_slice %14 {offsets = [8, 96], sizes = [8, 16], strides = [1, 1]} : vector<16x288xf32> to vector<8x16xf32>
    %385 = vector.extract_strided_slice %14 {offsets = [8, 192], sizes = [8, 16], strides = [1, 1]} : vector<16x288xf32> to vector<8x16xf32>
    %386 = arith.mulf %383, %383 : vector<8x16xf32>
    %cst_83 = arith.constant dense<0.000000e+00> : vector<8xf32>
    %387 = vector.multi_reduction <add>, %386, %cst_83 [1] : vector<8x16xf32> to vector<8xf32>
    %388 = vector.shape_cast %387 : vector<8xf32> to vector<8x1xf32>
    %cst_84 = arith.constant 1.600000e+01 : f32
    %389 = vector.broadcast %cst_84 : f32 to vector<8x1xf32>
    %390 = arith.divf %388, %389 : vector<8x1xf32>
    %cst_85 = arith.constant 1.1920929E-7 : f32
    %391 = vector.broadcast %cst_85 : f32 to vector<8x1xf32>
    %392 = arith.addf %390, %391 : vector<8x1xf32>
    %393 = math.rsqrt %392 : vector<8x1xf32>
    %394 = vector.broadcast %393 : vector<8x1xf32> to vector<8x16xf32>
    %395 = arith.mulf %383, %394 : vector<8x16xf32>
    %396 = vector.extract_strided_slice %395 {offsets = [0, 0], sizes = [8, 8], strides = [1, 1]} : vector<8x16xf32> to vector<8x8xf32>
    %397 = vector.extract_strided_slice %395 {offsets = [0, 8], sizes = [8, 8], strides = [1, 1]} : vector<8x16xf32> to vector<8x8xf32>
    %398 = arith.mulf %396, %15 : vector<8x8xf32>
    %399 = arith.mulf %397, %16 : vector<8x8xf32>
    %400 = arith.addf %398, %399 : vector<8x8xf32>
    %cst_86 = arith.constant 0.000000e+00 : f32
    %401 = vector.broadcast %cst_86 : f32 to vector<8x8xf32>
    %402 = arith.subf %401, %396 : vector<8x8xf32>
    %403 = arith.mulf %402, %16 : vector<8x8xf32>
    %404 = arith.mulf %397, %15 : vector<8x8xf32>
    %405 = arith.addf %403, %404 : vector<8x8xf32>
    %406 = tpu.concatenate %400, %405 in 1 : vector<8x8xf32>, vector<8x8xf32> -> vector<8x16xf32>
    %cst_87 = arith.constant 2.500000e-01 : f32
    %407 = vector.broadcast %cst_87 : f32 to vector<8x16xf32>
    %408 = arith.mulf %406, %407 : vector<8x16xf32>
    %409 = arith.mulf %384, %384 : vector<8x16xf32>
    %cst_88 = arith.constant dense<0.000000e+00> : vector<8xf32>
    %410 = vector.multi_reduction <add>, %409, %cst_88 [1] : vector<8x16xf32> to vector<8xf32>
    %411 = vector.shape_cast %410 : vector<8xf32> to vector<8x1xf32>
    %cst_89 = arith.constant 1.600000e+01 : f32
    %412 = vector.broadcast %cst_89 : f32 to vector<8x1xf32>
    %413 = arith.divf %411, %412 : vector<8x1xf32>
    %cst_90 = arith.constant 1.1920929E-7 : f32
    %414 = vector.broadcast %cst_90 : f32 to vector<8x1xf32>
    %415 = arith.addf %413, %414 : vector<8x1xf32>
    %416 = math.rsqrt %415 : vector<8x1xf32>
    %417 = vector.broadcast %416 : vector<8x1xf32> to vector<8x16xf32>
    %418 = arith.mulf %384, %417 : vector<8x16xf32>
    %419 = vector.extract_strided_slice %418 {offsets = [0, 0], sizes = [8, 8], strides = [1, 1]} : vector<8x16xf32> to vector<8x8xf32>
    %420 = vector.extract_strided_slice %418 {offsets = [0, 8], sizes = [8, 8], strides = [1, 1]} : vector<8x16xf32> to vector<8x8xf32>
    %421 = arith.mulf %419, %15 : vector<8x8xf32>
    %422 = arith.mulf %420, %16 : vector<8x8xf32>
    %423 = arith.addf %421, %422 : vector<8x8xf32>
    %cst_91 = arith.constant 0.000000e+00 : f32
    %424 = vector.broadcast %cst_91 : f32 to vector<8x8xf32>
    %425 = arith.subf %424, %419 : vector<8x8xf32>
    %426 = arith.mulf %425, %16 : vector<8x8xf32>
    %427 = arith.mulf %420, %15 : vector<8x8xf32>
    %428 = arith.addf %426, %427 : vector<8x8xf32>
    %429 = tpu.concatenate %423, %428 in 1 : vector<8x8xf32>, vector<8x8xf32> -> vector<8x16xf32>
    %430 = arith.truncf %408 : vector<8x16xf32> to vector<8x16xbf16>
    %431 = arith.truncf %429 : vector<8x16xf32> to vector<8x16xbf16>
    %cst_92 = arith.constant dense<0.000000e+00> : vector<8x8xf32>
    %432 = tpu.matmul %430, %431, %cst_92 {dimension_numbers = #tpu.dot_dimension_numbers<[1], [1], [0], [0], [0, 0, 1, 0], [], []>} : vector<8x16xbf16>, vector<8x16xbf16>, vector<8x8xf32> -> vector<8x8xf32>
    %433 = math.exp %432 : vector<8x8xf32>
    %434 = arith.mulf %433, %21 : vector<8x8xf32>
    %cst_93 = arith.constant dense<0.000000e+00> : vector<8xf32>
    %435 = vector.multi_reduction <add>, %434, %cst_93 [1] : vector<8x8xf32> to vector<8xf32>
    %436 = vector.shape_cast %435 : vector<8xf32> to vector<8x1xf32>
    %437 = tpu.reciprocal %436 {approx = true} : vector<8x1xf32> -> vector<8x1xf32>
    %438 = vector.broadcast %437 : vector<8x1xf32> to vector<8x8xf32>
    %439 = arith.mulf %434, %438 : vector<8x8xf32>
    %440 = arith.truncf %439 : vector<8x8xf32> to vector<8x8xbf16>
    %441 = arith.truncf %385 : vector<8x16xf32> to vector<8x16xbf16>
    %cst_94 = arith.constant dense<0.000000e+00> : vector<8x16xf32>
    %442 = tpu.matmul %440, %441, %cst_94 {dimension_numbers = #tpu.dot_dimension_numbers<[1], [0], [0], [1], [0, 0, 1, 1], [], []>} : vector<8x8xbf16>, vector<8x16xbf16>, vector<8x16xf32> -> vector<8x16xf32>
    %443 = vector.extract_strided_slice %14 {offsets = [8, 16], sizes = [8, 16], strides = [1, 1]} : vector<16x288xf32> to vector<8x16xf32>
    %444 = vector.extract_strided_slice %14 {offsets = [8, 112], sizes = [8, 16], strides = [1, 1]} : vector<16x288xf32> to vector<8x16xf32>
    %445 = vector.extract_strided_slice %14 {offsets = [8, 208], sizes = [8, 16], strides = [1, 1]} : vector<16x288xf32> to vector<8x16xf32>
    %446 = arith.mulf %443, %443 : vector<8x16xf32>
    %cst_95 = arith.constant dense<0.000000e+00> : vector<8xf32>
    %447 = vector.multi_reduction <add>, %446, %cst_95 [1] : vector<8x16xf32> to vector<8xf32>
    %448 = vector.shape_cast %447 : vector<8xf32> to vector<8x1xf32>
    %cst_96 = arith.constant 1.600000e+01 : f32
    %449 = vector.broadcast %cst_96 : f32 to vector<8x1xf32>
    %450 = arith.divf %448, %449 : vector<8x1xf32>
    %cst_97 = arith.constant 1.1920929E-7 : f32
    %451 = vector.broadcast %cst_97 : f32 to vector<8x1xf32>
    %452 = arith.addf %450, %451 : vector<8x1xf32>
    %453 = math.rsqrt %452 : vector<8x1xf32>
    %454 = vector.broadcast %453 : vector<8x1xf32> to vector<8x16xf32>
    %455 = arith.mulf %443, %454 : vector<8x16xf32>
    %456 = vector.extract_strided_slice %455 {offsets = [0, 0], sizes = [8, 8], strides = [1, 1]} : vector<8x16xf32> to vector<8x8xf32>
    %457 = vector.extract_strided_slice %455 {offsets = [0, 8], sizes = [8, 8], strides = [1, 1]} : vector<8x16xf32> to vector<8x8xf32>
    %458 = arith.mulf %456, %15 : vector<8x8xf32>
    %459 = arith.mulf %457, %16 : vector<8x8xf32>
    %460 = arith.addf %458, %459 : vector<8x8xf32>
    %cst_98 = arith.constant 0.000000e+00 : f32
    %461 = vector.broadcast %cst_98 : f32 to vector<8x8xf32>
    %462 = arith.subf %461, %456 : vector<8x8xf32>
    %463 = arith.mulf %462, %16 : vector<8x8xf32>
    %464 = arith.mulf %457, %15 : vector<8x8xf32>
    %465 = arith.addf %463, %464 : vector<8x8xf32>
    %466 = tpu.concatenate %460, %465 in 1 : vector<8x8xf32>, vector<8x8xf32> -> vector<8x16xf32>
    %cst_99 = arith.constant 2.500000e-01 : f32
    %467 = vector.broadcast %cst_99 : f32 to vector<8x16xf32>
    %468 = arith.mulf %466, %467 : vector<8x16xf32>
    %469 = arith.mulf %444, %444 : vector<8x16xf32>
    %cst_100 = arith.constant dense<0.000000e+00> : vector<8xf32>
    %470 = vector.multi_reduction <add>, %469, %cst_100 [1] : vector<8x16xf32> to vector<8xf32>
    %471 = vector.shape_cast %470 : vector<8xf32> to vector<8x1xf32>
    %cst_101 = arith.constant 1.600000e+01 : f32
    %472 = vector.broadcast %cst_101 : f32 to vector<8x1xf32>
    %473 = arith.divf %471, %472 : vector<8x1xf32>
    %cst_102 = arith.constant 1.1920929E-7 : f32
    %474 = vector.broadcast %cst_102 : f32 to vector<8x1xf32>
    %475 = arith.addf %473, %474 : vector<8x1xf32>
    %476 = math.rsqrt %475 : vector<8x1xf32>
    %477 = vector.broadcast %476 : vector<8x1xf32> to vector<8x16xf32>
    %478 = arith.mulf %444, %477 : vector<8x16xf32>
    %479 = vector.extract_strided_slice %478 {offsets = [0, 0], sizes = [8, 8], strides = [1, 1]} : vector<8x16xf32> to vector<8x8xf32>
    %480 = vector.extract_strided_slice %478 {offsets = [0, 8], sizes = [8, 8], strides = [1, 1]} : vector<8x16xf32> to vector<8x8xf32>
    %481 = arith.mulf %479, %15 : vector<8x8xf32>
    %482 = arith.mulf %480, %16 : vector<8x8xf32>
    %483 = arith.addf %481, %482 : vector<8x8xf32>
    %cst_103 = arith.constant 0.000000e+00 : f32
    %484 = vector.broadcast %cst_103 : f32 to vector<8x8xf32>
    %485 = arith.subf %484, %479 : vector<8x8xf32>
    %486 = arith.mulf %485, %16 : vector<8x8xf32>
    %487 = arith.mulf %480, %15 : vector<8x8xf32>
    %488 = arith.addf %486, %487 : vector<8x8xf32>
    %489 = tpu.concatenate %483, %488 in 1 : vector<8x8xf32>, vector<8x8xf32> -> vector<8x16xf32>
    %490 = arith.truncf %468 : vector<8x16xf32> to vector<8x16xbf16>
    %491 = arith.truncf %489 : vector<8x16xf32> to vector<8x16xbf16>
    %cst_104 = arith.constant dense<0.000000e+00> : vector<8x8xf32>
    %492 = tpu.matmul %490, %491, %cst_104 {dimension_numbers = #tpu.dot_dimension_numbers<[1], [1], [0], [0], [0, 0, 1, 0], [], []>} : vector<8x16xbf16>, vector<8x16xbf16>, vector<8x8xf32> -> vector<8x8xf32>
    %493 = math.exp %492 : vector<8x8xf32>
    %494 = arith.mulf %493, %21 : vector<8x8xf32>
    %cst_105 = arith.constant dense<0.000000e+00> : vector<8xf32>
    %495 = vector.multi_reduction <add>, %494, %cst_105 [1] : vector<8x8xf32> to vector<8xf32>
    %496 = vector.shape_cast %495 : vector<8xf32> to vector<8x1xf32>
    %497 = tpu.reciprocal %496 {approx = true} : vector<8x1xf32> -> vector<8x1xf32>
    %498 = vector.broadcast %497 : vector<8x1xf32> to vector<8x8xf32>
    %499 = arith.mulf %494, %498 : vector<8x8xf32>
    %500 = arith.truncf %499 : vector<8x8xf32> to vector<8x8xbf16>
    %501 = arith.truncf %445 : vector<8x16xf32> to vector<8x16xbf16>
    %cst_106 = arith.constant dense<0.000000e+00> : vector<8x16xf32>
    %502 = tpu.matmul %500, %501, %cst_106 {dimension_numbers = #tpu.dot_dimension_numbers<[1], [0], [0], [1], [0, 0, 1, 1], [], []>} : vector<8x8xbf16>, vector<8x16xbf16>, vector<8x16xf32> -> vector<8x16xf32>
    %503 = vector.extract_strided_slice %14 {offsets = [8, 32], sizes = [8, 16], strides = [1, 1]} : vector<16x288xf32> to vector<8x16xf32>
    %504 = vector.extract_strided_slice %14 {offsets = [8, 128], sizes = [8, 16], strides = [1, 1]} : vector<16x288xf32> to vector<8x16xf32>
    %505 = vector.extract_strided_slice %14 {offsets = [8, 224], sizes = [8, 16], strides = [1, 1]} : vector<16x288xf32> to vector<8x16xf32>
    %506 = arith.mulf %503, %503 : vector<8x16xf32>
    %cst_107 = arith.constant dense<0.000000e+00> : vector<8xf32>
    %507 = vector.multi_reduction <add>, %506, %cst_107 [1] : vector<8x16xf32> to vector<8xf32>
    %508 = vector.shape_cast %507 : vector<8xf32> to vector<8x1xf32>
    %cst_108 = arith.constant 1.600000e+01 : f32
    %509 = vector.broadcast %cst_108 : f32 to vector<8x1xf32>
    %510 = arith.divf %508, %509 : vector<8x1xf32>
    %cst_109 = arith.constant 1.1920929E-7 : f32
    %511 = vector.broadcast %cst_109 : f32 to vector<8x1xf32>
    %512 = arith.addf %510, %511 : vector<8x1xf32>
    %513 = math.rsqrt %512 : vector<8x1xf32>
    %514 = vector.broadcast %513 : vector<8x1xf32> to vector<8x16xf32>
    %515 = arith.mulf %503, %514 : vector<8x16xf32>
    %516 = vector.extract_strided_slice %515 {offsets = [0, 0], sizes = [8, 8], strides = [1, 1]} : vector<8x16xf32> to vector<8x8xf32>
    %517 = vector.extract_strided_slice %515 {offsets = [0, 8], sizes = [8, 8], strides = [1, 1]} : vector<8x16xf32> to vector<8x8xf32>
    %518 = arith.mulf %516, %15 : vector<8x8xf32>
    %519 = arith.mulf %517, %16 : vector<8x8xf32>
    %520 = arith.addf %518, %519 : vector<8x8xf32>
    %cst_110 = arith.constant 0.000000e+00 : f32
    %521 = vector.broadcast %cst_110 : f32 to vector<8x8xf32>
    %522 = arith.subf %521, %516 : vector<8x8xf32>
    %523 = arith.mulf %522, %16 : vector<8x8xf32>
    %524 = arith.mulf %517, %15 : vector<8x8xf32>
    %525 = arith.addf %523, %524 : vector<8x8xf32>
    %526 = tpu.concatenate %520, %525 in 1 : vector<8x8xf32>, vector<8x8xf32> -> vector<8x16xf32>
    %cst_111 = arith.constant 2.500000e-01 : f32
    %527 = vector.broadcast %cst_111 : f32 to vector<8x16xf32>
    %528 = arith.mulf %526, %527 : vector<8x16xf32>
    %529 = arith.mulf %504, %504 : vector<8x16xf32>
    %cst_112 = arith.constant dense<0.000000e+00> : vector<8xf32>
    %530 = vector.multi_reduction <add>, %529, %cst_112 [1] : vector<8x16xf32> to vector<8xf32>
    %531 = vector.shape_cast %530 : vector<8xf32> to vector<8x1xf32>
    %cst_113 = arith.constant 1.600000e+01 : f32
    %532 = vector.broadcast %cst_113 : f32 to vector<8x1xf32>
    %533 = arith.divf %531, %532 : vector<8x1xf32>
    %cst_114 = arith.constant 1.1920929E-7 : f32
    %534 = vector.broadcast %cst_114 : f32 to vector<8x1xf32>
    %535 = arith.addf %533, %534 : vector<8x1xf32>
    %536 = math.rsqrt %535 : vector<8x1xf32>
    %537 = vector.broadcast %536 : vector<8x1xf32> to vector<8x16xf32>
    %538 = arith.mulf %504, %537 : vector<8x16xf32>
    %539 = vector.extract_strided_slice %538 {offsets = [0, 0], sizes = [8, 8], strides = [1, 1]} : vector<8x16xf32> to vector<8x8xf32>
    %540 = vector.extract_strided_slice %538 {offsets = [0, 8], sizes = [8, 8], strides = [1, 1]} : vector<8x16xf32> to vector<8x8xf32>
    %541 = arith.mulf %539, %15 : vector<8x8xf32>
    %542 = arith.mulf %540, %16 : vector<8x8xf32>
    %543 = arith.addf %541, %542 : vector<8x8xf32>
    %cst_115 = arith.constant 0.000000e+00 : f32
    %544 = vector.broadcast %cst_115 : f32 to vector<8x8xf32>
    %545 = arith.subf %544, %539 : vector<8x8xf32>
    %546 = arith.mulf %545, %16 : vector<8x8xf32>
    %547 = arith.mulf %540, %15 : vector<8x8xf32>
    %548 = arith.addf %546, %547 : vector<8x8xf32>
    %549 = tpu.concatenate %543, %548 in 1 : vector<8x8xf32>, vector<8x8xf32> -> vector<8x16xf32>
    %550 = arith.truncf %528 : vector<8x16xf32> to vector<8x16xbf16>
    %551 = arith.truncf %549 : vector<8x16xf32> to vector<8x16xbf16>
    %cst_116 = arith.constant dense<0.000000e+00> : vector<8x8xf32>
    %552 = tpu.matmul %550, %551, %cst_116 {dimension_numbers = #tpu.dot_dimension_numbers<[1], [1], [0], [0], [0, 0, 1, 0], [], []>} : vector<8x16xbf16>, vector<8x16xbf16>, vector<8x8xf32> -> vector<8x8xf32>
    %553 = math.exp %552 : vector<8x8xf32>
    %554 = arith.mulf %553, %21 : vector<8x8xf32>
    %cst_117 = arith.constant dense<0.000000e+00> : vector<8xf32>
    %555 = vector.multi_reduction <add>, %554, %cst_117 [1] : vector<8x8xf32> to vector<8xf32>
    %556 = vector.shape_cast %555 : vector<8xf32> to vector<8x1xf32>
    %557 = tpu.reciprocal %556 {approx = true} : vector<8x1xf32> -> vector<8x1xf32>
    %558 = vector.broadcast %557 : vector<8x1xf32> to vector<8x8xf32>
    %559 = arith.mulf %554, %558 : vector<8x8xf32>
    %560 = arith.truncf %559 : vector<8x8xf32> to vector<8x8xbf16>
    %561 = arith.truncf %505 : vector<8x16xf32> to vector<8x16xbf16>
    %cst_118 = arith.constant dense<0.000000e+00> : vector<8x16xf32>
    %562 = tpu.matmul %560, %561, %cst_118 {dimension_numbers = #tpu.dot_dimension_numbers<[1], [0], [0], [1], [0, 0, 1, 1], [], []>} : vector<8x8xbf16>, vector<8x16xbf16>, vector<8x16xf32> -> vector<8x16xf32>
    %563 = vector.extract_strided_slice %14 {offsets = [8, 48], sizes = [8, 16], strides = [1, 1]} : vector<16x288xf32> to vector<8x16xf32>
    %564 = vector.extract_strided_slice %14 {offsets = [8, 144], sizes = [8, 16], strides = [1, 1]} : vector<16x288xf32> to vector<8x16xf32>
    %565 = vector.extract_strided_slice %14 {offsets = [8, 240], sizes = [8, 16], strides = [1, 1]} : vector<16x288xf32> to vector<8x16xf32>
    %566 = arith.mulf %563, %563 : vector<8x16xf32>
    %cst_119 = arith.constant dense<0.000000e+00> : vector<8xf32>
    %567 = vector.multi_reduction <add>, %566, %cst_119 [1] : vector<8x16xf32> to vector<8xf32>
    %568 = vector.shape_cast %567 : vector<8xf32> to vector<8x1xf32>
    %cst_120 = arith.constant 1.600000e+01 : f32
    %569 = vector.broadcast %cst_120 : f32 to vector<8x1xf32>
    %570 = arith.divf %568, %569 : vector<8x1xf32>
    %cst_121 = arith.constant 1.1920929E-7 : f32
    %571 = vector.broadcast %cst_121 : f32 to vector<8x1xf32>
    %572 = arith.addf %570, %571 : vector<8x1xf32>
    %573 = math.rsqrt %572 : vector<8x1xf32>
    %574 = vector.broadcast %573 : vector<8x1xf32> to vector<8x16xf32>
    %575 = arith.mulf %563, %574 : vector<8x16xf32>
    %576 = vector.extract_strided_slice %575 {offsets = [0, 0], sizes = [8, 8], strides = [1, 1]} : vector<8x16xf32> to vector<8x8xf32>
    %577 = vector.extract_strided_slice %575 {offsets = [0, 8], sizes = [8, 8], strides = [1, 1]} : vector<8x16xf32> to vector<8x8xf32>
    %578 = arith.mulf %576, %15 : vector<8x8xf32>
    %579 = arith.mulf %577, %16 : vector<8x8xf32>
    %580 = arith.addf %578, %579 : vector<8x8xf32>
    %cst_122 = arith.constant 0.000000e+00 : f32
    %581 = vector.broadcast %cst_122 : f32 to vector<8x8xf32>
    %582 = arith.subf %581, %576 : vector<8x8xf32>
    %583 = arith.mulf %582, %16 : vector<8x8xf32>
    %584 = arith.mulf %577, %15 : vector<8x8xf32>
    %585 = arith.addf %583, %584 : vector<8x8xf32>
    %586 = tpu.concatenate %580, %585 in 1 : vector<8x8xf32>, vector<8x8xf32> -> vector<8x16xf32>
    %cst_123 = arith.constant 2.500000e-01 : f32
    %587 = vector.broadcast %cst_123 : f32 to vector<8x16xf32>
    %588 = arith.mulf %586, %587 : vector<8x16xf32>
    %589 = arith.mulf %564, %564 : vector<8x16xf32>
    %cst_124 = arith.constant dense<0.000000e+00> : vector<8xf32>
    %590 = vector.multi_reduction <add>, %589, %cst_124 [1] : vector<8x16xf32> to vector<8xf32>
    %591 = vector.shape_cast %590 : vector<8xf32> to vector<8x1xf32>
    %cst_125 = arith.constant 1.600000e+01 : f32
    %592 = vector.broadcast %cst_125 : f32 to vector<8x1xf32>
    %593 = arith.divf %591, %592 : vector<8x1xf32>
    %cst_126 = arith.constant 1.1920929E-7 : f32
    %594 = vector.broadcast %cst_126 : f32 to vector<8x1xf32>
    %595 = arith.addf %593, %594 : vector<8x1xf32>
    %596 = math.rsqrt %595 : vector<8x1xf32>
    %597 = vector.broadcast %596 : vector<8x1xf32> to vector<8x16xf32>
    %598 = arith.mulf %564, %597 : vector<8x16xf32>
    %599 = vector.extract_strided_slice %598 {offsets = [0, 0], sizes = [8, 8], strides = [1, 1]} : vector<8x16xf32> to vector<8x8xf32>
    %600 = vector.extract_strided_slice %598 {offsets = [0, 8], sizes = [8, 8], strides = [1, 1]} : vector<8x16xf32> to vector<8x8xf32>
    %601 = arith.mulf %599, %15 : vector<8x8xf32>
    %602 = arith.mulf %600, %16 : vector<8x8xf32>
    %603 = arith.addf %601, %602 : vector<8x8xf32>
    %cst_127 = arith.constant 0.000000e+00 : f32
    %604 = vector.broadcast %cst_127 : f32 to vector<8x8xf32>
    %605 = arith.subf %604, %599 : vector<8x8xf32>
    %606 = arith.mulf %605, %16 : vector<8x8xf32>
    %607 = arith.mulf %600, %15 : vector<8x8xf32>
    %608 = arith.addf %606, %607 : vector<8x8xf32>
    %609 = tpu.concatenate %603, %608 in 1 : vector<8x8xf32>, vector<8x8xf32> -> vector<8x16xf32>
    %610 = arith.truncf %588 : vector<8x16xf32> to vector<8x16xbf16>
    %611 = arith.truncf %609 : vector<8x16xf32> to vector<8x16xbf16>
    %cst_128 = arith.constant dense<0.000000e+00> : vector<8x8xf32>
    %612 = tpu.matmul %610, %611, %cst_128 {dimension_numbers = #tpu.dot_dimension_numbers<[1], [1], [0], [0], [0, 0, 1, 0], [], []>} : vector<8x16xbf16>, vector<8x16xbf16>, vector<8x8xf32> -> vector<8x8xf32>
    %613 = math.exp %612 : vector<8x8xf32>
    %614 = arith.mulf %613, %21 : vector<8x8xf32>
    %cst_129 = arith.constant dense<0.000000e+00> : vector<8xf32>
    %615 = vector.multi_reduction <add>, %614, %cst_129 [1] : vector<8x8xf32> to vector<8xf32>
    %616 = vector.shape_cast %615 : vector<8xf32> to vector<8x1xf32>
    %617 = tpu.reciprocal %616 {approx = true} : vector<8x1xf32> -> vector<8x1xf32>
    %618 = vector.broadcast %617 : vector<8x1xf32> to vector<8x8xf32>
    %619 = arith.mulf %614, %618 : vector<8x8xf32>
    %620 = arith.truncf %619 : vector<8x8xf32> to vector<8x8xbf16>
    %621 = arith.truncf %565 : vector<8x16xf32> to vector<8x16xbf16>
    %cst_130 = arith.constant dense<0.000000e+00> : vector<8x16xf32>
    %622 = tpu.matmul %620, %621, %cst_130 {dimension_numbers = #tpu.dot_dimension_numbers<[1], [0], [0], [1], [0, 0, 1, 1], [], []>} : vector<8x8xbf16>, vector<8x16xbf16>, vector<8x16xf32> -> vector<8x16xf32>
    %623 = vector.extract_strided_slice %14 {offsets = [8, 64], sizes = [8, 16], strides = [1, 1]} : vector<16x288xf32> to vector<8x16xf32>
    %624 = vector.extract_strided_slice %14 {offsets = [8, 160], sizes = [8, 16], strides = [1, 1]} : vector<16x288xf32> to vector<8x16xf32>
    %625 = vector.extract_strided_slice %14 {offsets = [8, 256], sizes = [8, 16], strides = [1, 1]} : vector<16x288xf32> to vector<8x16xf32>
    %626 = arith.mulf %623, %623 : vector<8x16xf32>
    %cst_131 = arith.constant dense<0.000000e+00> : vector<8xf32>
    %627 = vector.multi_reduction <add>, %626, %cst_131 [1] : vector<8x16xf32> to vector<8xf32>
    %628 = vector.shape_cast %627 : vector<8xf32> to vector<8x1xf32>
    %cst_132 = arith.constant 1.600000e+01 : f32
    %629 = vector.broadcast %cst_132 : f32 to vector<8x1xf32>
    %630 = arith.divf %628, %629 : vector<8x1xf32>
    %cst_133 = arith.constant 1.1920929E-7 : f32
    %631 = vector.broadcast %cst_133 : f32 to vector<8x1xf32>
    %632 = arith.addf %630, %631 : vector<8x1xf32>
    %633 = math.rsqrt %632 : vector<8x1xf32>
    %634 = vector.broadcast %633 : vector<8x1xf32> to vector<8x16xf32>
    %635 = arith.mulf %623, %634 : vector<8x16xf32>
    %636 = vector.extract_strided_slice %635 {offsets = [0, 0], sizes = [8, 8], strides = [1, 1]} : vector<8x16xf32> to vector<8x8xf32>
    %637 = vector.extract_strided_slice %635 {offsets = [0, 8], sizes = [8, 8], strides = [1, 1]} : vector<8x16xf32> to vector<8x8xf32>
    %638 = arith.mulf %636, %15 : vector<8x8xf32>
    %639 = arith.mulf %637, %16 : vector<8x8xf32>
    %640 = arith.addf %638, %639 : vector<8x8xf32>
    %cst_134 = arith.constant 0.000000e+00 : f32
    %641 = vector.broadcast %cst_134 : f32 to vector<8x8xf32>
    %642 = arith.subf %641, %636 : vector<8x8xf32>
    %643 = arith.mulf %642, %16 : vector<8x8xf32>
    %644 = arith.mulf %637, %15 : vector<8x8xf32>
    %645 = arith.addf %643, %644 : vector<8x8xf32>
    %646 = tpu.concatenate %640, %645 in 1 : vector<8x8xf32>, vector<8x8xf32> -> vector<8x16xf32>
    %cst_135 = arith.constant 2.500000e-01 : f32
    %647 = vector.broadcast %cst_135 : f32 to vector<8x16xf32>
    %648 = arith.mulf %646, %647 : vector<8x16xf32>
    %649 = arith.mulf %624, %624 : vector<8x16xf32>
    %cst_136 = arith.constant dense<0.000000e+00> : vector<8xf32>
    %650 = vector.multi_reduction <add>, %649, %cst_136 [1] : vector<8x16xf32> to vector<8xf32>
    %651 = vector.shape_cast %650 : vector<8xf32> to vector<8x1xf32>
    %cst_137 = arith.constant 1.600000e+01 : f32
    %652 = vector.broadcast %cst_137 : f32 to vector<8x1xf32>
    %653 = arith.divf %651, %652 : vector<8x1xf32>
    %cst_138 = arith.constant 1.1920929E-7 : f32
    %654 = vector.broadcast %cst_138 : f32 to vector<8x1xf32>
    %655 = arith.addf %653, %654 : vector<8x1xf32>
    %656 = math.rsqrt %655 : vector<8x1xf32>
    %657 = vector.broadcast %656 : vector<8x1xf32> to vector<8x16xf32>
    %658 = arith.mulf %624, %657 : vector<8x16xf32>
    %659 = vector.extract_strided_slice %658 {offsets = [0, 0], sizes = [8, 8], strides = [1, 1]} : vector<8x16xf32> to vector<8x8xf32>
    %660 = vector.extract_strided_slice %658 {offsets = [0, 8], sizes = [8, 8], strides = [1, 1]} : vector<8x16xf32> to vector<8x8xf32>
    %661 = arith.mulf %659, %15 : vector<8x8xf32>
    %662 = arith.mulf %660, %16 : vector<8x8xf32>
    %663 = arith.addf %661, %662 : vector<8x8xf32>
    %cst_139 = arith.constant 0.000000e+00 : f32
    %664 = vector.broadcast %cst_139 : f32 to vector<8x8xf32>
    %665 = arith.subf %664, %659 : vector<8x8xf32>
    %666 = arith.mulf %665, %16 : vector<8x8xf32>
    %667 = arith.mulf %660, %15 : vector<8x8xf32>
    %668 = arith.addf %666, %667 : vector<8x8xf32>
    %669 = tpu.concatenate %663, %668 in 1 : vector<8x8xf32>, vector<8x8xf32> -> vector<8x16xf32>
    %670 = arith.truncf %648 : vector<8x16xf32> to vector<8x16xbf16>
    %671 = arith.truncf %669 : vector<8x16xf32> to vector<8x16xbf16>
    %cst_140 = arith.constant dense<0.000000e+00> : vector<8x8xf32>
    %672 = tpu.matmul %670, %671, %cst_140 {dimension_numbers = #tpu.dot_dimension_numbers<[1], [1], [0], [0], [0, 0, 1, 0], [], []>} : vector<8x16xbf16>, vector<8x16xbf16>, vector<8x8xf32> -> vector<8x8xf32>
    %673 = math.exp %672 : vector<8x8xf32>
    %674 = arith.mulf %673, %21 : vector<8x8xf32>
    %cst_141 = arith.constant dense<0.000000e+00> : vector<8xf32>
    %675 = vector.multi_reduction <add>, %674, %cst_141 [1] : vector<8x8xf32> to vector<8xf32>
    %676 = vector.shape_cast %675 : vector<8xf32> to vector<8x1xf32>
    %677 = tpu.reciprocal %676 {approx = true} : vector<8x1xf32> -> vector<8x1xf32>
    %678 = vector.broadcast %677 : vector<8x1xf32> to vector<8x8xf32>
    %679 = arith.mulf %674, %678 : vector<8x8xf32>
    %680 = arith.truncf %679 : vector<8x8xf32> to vector<8x8xbf16>
    %681 = arith.truncf %625 : vector<8x16xf32> to vector<8x16xbf16>
    %cst_142 = arith.constant dense<0.000000e+00> : vector<8x16xf32>
    %682 = tpu.matmul %680, %681, %cst_142 {dimension_numbers = #tpu.dot_dimension_numbers<[1], [0], [0], [1], [0, 0, 1, 1], [], []>} : vector<8x8xbf16>, vector<8x16xbf16>, vector<8x16xf32> -> vector<8x16xf32>
    %683 = vector.extract_strided_slice %14 {offsets = [8, 80], sizes = [8, 16], strides = [1, 1]} : vector<16x288xf32> to vector<8x16xf32>
    %684 = vector.extract_strided_slice %14 {offsets = [8, 176], sizes = [8, 16], strides = [1, 1]} : vector<16x288xf32> to vector<8x16xf32>
    %685 = vector.extract_strided_slice %14 {offsets = [8, 272], sizes = [8, 16], strides = [1, 1]} : vector<16x288xf32> to vector<8x16xf32>
    %686 = arith.mulf %683, %683 : vector<8x16xf32>
    %cst_143 = arith.constant dense<0.000000e+00> : vector<8xf32>
    %687 = vector.multi_reduction <add>, %686, %cst_143 [1] : vector<8x16xf32> to vector<8xf32>
    %688 = vector.shape_cast %687 : vector<8xf32> to vector<8x1xf32>
    %cst_144 = arith.constant 1.600000e+01 : f32
    %689 = vector.broadcast %cst_144 : f32 to vector<8x1xf32>
    %690 = arith.divf %688, %689 : vector<8x1xf32>
    %cst_145 = arith.constant 1.1920929E-7 : f32
    %691 = vector.broadcast %cst_145 : f32 to vector<8x1xf32>
    %692 = arith.addf %690, %691 : vector<8x1xf32>
    %693 = math.rsqrt %692 : vector<8x1xf32>
    %694 = vector.broadcast %693 : vector<8x1xf32> to vector<8x16xf32>
    %695 = arith.mulf %683, %694 : vector<8x16xf32>
    %696 = vector.extract_strided_slice %695 {offsets = [0, 0], sizes = [8, 8], strides = [1, 1]} : vector<8x16xf32> to vector<8x8xf32>
    %697 = vector.extract_strided_slice %695 {offsets = [0, 8], sizes = [8, 8], strides = [1, 1]} : vector<8x16xf32> to vector<8x8xf32>
    %698 = arith.mulf %696, %15 : vector<8x8xf32>
    %699 = arith.mulf %697, %16 : vector<8x8xf32>
    %700 = arith.addf %698, %699 : vector<8x8xf32>
    %cst_146 = arith.constant 0.000000e+00 : f32
    %701 = vector.broadcast %cst_146 : f32 to vector<8x8xf32>
    %702 = arith.subf %701, %696 : vector<8x8xf32>
    %703 = arith.mulf %702, %16 : vector<8x8xf32>
    %704 = arith.mulf %697, %15 : vector<8x8xf32>
    %705 = arith.addf %703, %704 : vector<8x8xf32>
    %706 = tpu.concatenate %700, %705 in 1 : vector<8x8xf32>, vector<8x8xf32> -> vector<8x16xf32>
    %cst_147 = arith.constant 2.500000e-01 : f32
    %707 = vector.broadcast %cst_147 : f32 to vector<8x16xf32>
    %708 = arith.mulf %706, %707 : vector<8x16xf32>
    %709 = arith.mulf %684, %684 : vector<8x16xf32>
    %cst_148 = arith.constant dense<0.000000e+00> : vector<8xf32>
    %710 = vector.multi_reduction <add>, %709, %cst_148 [1] : vector<8x16xf32> to vector<8xf32>
    %711 = vector.shape_cast %710 : vector<8xf32> to vector<8x1xf32>
    %cst_149 = arith.constant 1.600000e+01 : f32
    %712 = vector.broadcast %cst_149 : f32 to vector<8x1xf32>
    %713 = arith.divf %711, %712 : vector<8x1xf32>
    %cst_150 = arith.constant 1.1920929E-7 : f32
    %714 = vector.broadcast %cst_150 : f32 to vector<8x1xf32>
    %715 = arith.addf %713, %714 : vector<8x1xf32>
    %716 = math.rsqrt %715 : vector<8x1xf32>
    %717 = vector.broadcast %716 : vector<8x1xf32> to vector<8x16xf32>
    %718 = arith.mulf %684, %717 : vector<8x16xf32>
    %719 = vector.extract_strided_slice %718 {offsets = [0, 0], sizes = [8, 8], strides = [1, 1]} : vector<8x16xf32> to vector<8x8xf32>
    %720 = vector.extract_strided_slice %718 {offsets = [0, 8], sizes = [8, 8], strides = [1, 1]} : vector<8x16xf32> to vector<8x8xf32>
    %721 = arith.mulf %719, %15 : vector<8x8xf32>
    %722 = arith.mulf %720, %16 : vector<8x8xf32>
    %723 = arith.addf %721, %722 : vector<8x8xf32>
    %cst_151 = arith.constant 0.000000e+00 : f32
    %724 = vector.broadcast %cst_151 : f32 to vector<8x8xf32>
    %725 = arith.subf %724, %719 : vector<8x8xf32>
    %726 = arith.mulf %725, %16 : vector<8x8xf32>
    %727 = arith.mulf %720, %15 : vector<8x8xf32>
    %728 = arith.addf %726, %727 : vector<8x8xf32>
    %729 = tpu.concatenate %723, %728 in 1 : vector<8x8xf32>, vector<8x8xf32> -> vector<8x16xf32>
    %730 = arith.truncf %708 : vector<8x16xf32> to vector<8x16xbf16>
    %731 = arith.truncf %729 : vector<8x16xf32> to vector<8x16xbf16>
    %cst_152 = arith.constant dense<0.000000e+00> : vector<8x8xf32>
    %732 = tpu.matmul %730, %731, %cst_152 {dimension_numbers = #tpu.dot_dimension_numbers<[1], [1], [0], [0], [0, 0, 1, 0], [], []>} : vector<8x16xbf16>, vector<8x16xbf16>, vector<8x8xf32> -> vector<8x8xf32>
    %733 = math.exp %732 : vector<8x8xf32>
    %734 = arith.mulf %733, %21 : vector<8x8xf32>
    %cst_153 = arith.constant dense<0.000000e+00> : vector<8xf32>
    %735 = vector.multi_reduction <add>, %734, %cst_153 [1] : vector<8x8xf32> to vector<8xf32>
    %736 = vector.shape_cast %735 : vector<8xf32> to vector<8x1xf32>
    %737 = tpu.reciprocal %736 {approx = true} : vector<8x1xf32> -> vector<8x1xf32>
    %738 = vector.broadcast %737 : vector<8x1xf32> to vector<8x8xf32>
    %739 = arith.mulf %734, %738 : vector<8x8xf32>
    %740 = arith.truncf %739 : vector<8x8xf32> to vector<8x8xbf16>
    %741 = arith.truncf %685 : vector<8x16xf32> to vector<8x16xbf16>
    %cst_154 = arith.constant dense<0.000000e+00> : vector<8x16xf32>
    %742 = tpu.matmul %740, %741, %cst_154 {dimension_numbers = #tpu.dot_dimension_numbers<[1], [0], [0], [1], [0, 0, 1, 1], [], []>} : vector<8x8xbf16>, vector<8x16xbf16>, vector<8x16xf32> -> vector<8x16xf32>
    %743 = tpu.concatenate %442, %502, %562, %622, %682, %742 in 1 : vector<8x16xf32>, vector<8x16xf32>, vector<8x16xf32>, vector<8x16xf32>, vector<8x16xf32>, vector<8x16xf32> -> vector<8x96xf32>
    %744 = tpu.concatenate %382, %743 in 0 : vector<8x96xf32>, vector<8x96xf32> -> vector<16x96xf32>
    %745 = arith.truncf %744 : vector<16x96xf32> to vector<16x96xbf16>
    %c0_155 = arith.constant 0 : index
    %c0_156 = arith.constant 0 : index
    %746 = vector.load %arg3[%c0_155, %c0_156] : memref<96x128xbf16, #tpu.memory_space<vmem>>, vector<96x128xbf16>
    %cst_157 = arith.constant dense<0.000000e+00> : vector<16x128xf32>
    %747 = tpu.matmul %745, %746, %cst_157 {dimension_numbers = #tpu.dot_dimension_numbers<[1], [0], [0], [1], [0, 0, 1, 1], [], []>} : vector<16x96xbf16>, vector<96x128xbf16>, vector<16x128xf32> -> vector<16x128xf32>
    %748 = arith.addf %1, %747 : vector<16x128xf32>
    %749 = arith.mulf %748, %748 : vector<16x128xf32>
    %cst_158 = arith.constant dense<0.000000e+00> : vector<16xf32>
    %750 = vector.multi_reduction <add>, %749, %cst_158 [1] : vector<16x128xf32> to vector<16xf32>
    %751 = vector.shape_cast %750 : vector<16xf32> to vector<16x1xf32>
    %cst_159 = arith.constant 0.010416667 : f32
    %752 = vector.broadcast %cst_159 : f32 to vector<16x1xf32>
    %753 = arith.mulf %751, %752 : vector<16x1xf32>
    %cst_160 = arith.constant 1.1920929E-7 : f32
    %754 = vector.broadcast %cst_160 : f32 to vector<16x1xf32>
    %755 = arith.addf %753, %754 : vector<16x1xf32>
    %756 = math.rsqrt %755 : vector<16x1xf32>
    %757 = vector.broadcast %756 : vector<16x1xf32> to vector<16x128xf32>
    %758 = arith.mulf %748, %757 : vector<16x128xf32>
    %759 = arith.truncf %758 : vector<16x128xf32> to vector<16x128xbf16>
    %c0_161 = arith.constant 0 : index
    %c0_162 = arith.constant 0 : index
    %760 = vector.load %arg4[%c0_161, %c0_162] : memref<128x384xbf16, #tpu.memory_space<vmem>>, vector<128x384xbf16>
    %cst_163 = arith.constant dense<0.000000e+00> : vector<16x384xf32>
    %761 = tpu.matmul %759, %760, %cst_163 {dimension_numbers = #tpu.dot_dimension_numbers<[1], [0], [0], [1], [0, 0, 1, 1], [], []>} : vector<16x128xbf16>, vector<128x384xbf16>, vector<16x384xf32> -> vector<16x384xf32>
    %cst_164 = arith.constant 0.000000e+00 : f32
    %762 = vector.broadcast %cst_164 : f32 to vector<16x384xf32>
    %763 = arith.maximumf %761, %762 : vector<16x384xf32>
    %764 = arith.mulf %763, %763 : vector<16x384xf32>
    %765 = arith.truncf %764 : vector<16x384xf32> to vector<16x384xbf16>
    %c0_165 = arith.constant 0 : index
    %c0_166 = arith.constant 0 : index
    %766 = vector.load %arg5[%c0_165, %c0_166] : memref<384x128xbf16, #tpu.memory_space<vmem>>, vector<384x128xbf16>
    %cst_167 = arith.constant dense<0.000000e+00> : vector<16x128xf32>
    %767 = tpu.matmul %765, %766, %cst_167 {dimension_numbers = #tpu.dot_dimension_numbers<[1], [0], [0], [1], [0, 0, 1, 1], [], []>} : vector<16x384xbf16>, vector<384x128xbf16>, vector<16x128xf32> -> vector<16x128xf32>
    %768 = arith.addf %748, %767 : vector<16x128xf32>
    %769 = vector.shape_cast %768 : vector<16x128xf32> to vector<2x8x128xf32>
    %c0_168 = arith.constant 0 : index
    %c0_169 = arith.constant 0 : index
    %c0_170 = arith.constant 0 : index
    %770 = vector.load %arg8[%c0_168, %c0_169, %c0_170] : memref<2x8x128xf32, #tpu.memory_space<vmem>>, vector<2x8x128xf32>
    tpu.vector_store %arg8[%c0_168, %c0_169, %c0_170], %769 {strides = array<i32>} : memref<2x8x128xf32, #tpu.memory_space<vmem>>, vector<2x8x128xf32>,
    return
  }
  func.func @transform_0(%arg0: i32) -> (i32, i32, i32) {
    %c0_i32 = arith.constant 0 : i32
    %c0_i32_0 = arith.constant 0 : i32
    %c0_i32_1 = arith.constant 0 : i32
    %c0_i32_2 = arith.constant 0 : i32
    return %c0_i32, %c0_i32_0, %c0_i32_1 : i32, i32, i32
  }
  func.func @transform_1(%arg0: i32) -> (i32, i32) {
    %c0_i32 = arith.constant 0 : i32
    %c0_i32_0 = arith.constant 0 : i32
    %c0_i32_1 = arith.constant 0 : i32
    return %c0_i32, %c0_i32_0 : i32, i32
  }
  func.func @transform_2(%arg0: i32) -> (i32, i32) {
    %c0_i32 = arith.constant 0 : i32
    %c0_i32_0 = arith.constant 0 : i32
    %c0_i32_1 = arith.constant 0 : i32
    return %c0_i32, %c0_i32_0 : i32, i32
  }
  func.func @transform_3(%arg0: i32) -> (i32, i32) {
    %c0_i32 = arith.constant 0 : i32
    %c0_i32_0 = arith.constant 0 : i32
    %c0_i32_1 = arith.constant 0 : i32
    return %c0_i32, %c0_i32_0 : i32, i32
  }
  func.func @transform_4(%arg0: i32) -> (i32, i32) {
    %c0_i32 = arith.constant 0 : i32
    %c0_i32_0 = arith.constant 0 : i32
    %c0_i32_1 = arith.constant 0 : i32
    return %c0_i32, %c0_i32_0 : i32, i32
  }
  func.func @transform_5(%arg0: i32) -> (i32, i32) {
    %c0_i32 = arith.constant 0 : i32
    %c0_i32_0 = arith.constant 0 : i32
    %c0_i32_1 = arith.constant 0 : i32
    return %c0_i32, %c0_i32_0 : i32, i32
  }
  func.func @transform_6(%arg0: i32) -> (i32, i32) {
    %c0_i32 = arith.constant 0 : i32
    %c0_i32_0 = arith.constant 0 : i32
    %c0_i32_1 = arith.constant 0 : i32
    return %c0_i32, %c0_i32_0 : i32, i32
  }
  func.func @transform_7(%arg0: i32) -> (i32, i32, i32) {
    %c0_i32 = arith.constant 0 : i32
    %c0_i32_0 = arith.constant 0 : i32
    %c0_i32_1 = arith.constant 0 : i32
    %c0_i32_2 = arith.constant 0 : i32
    return %c0_i32, %c0_i32_0, %c0_i32_1 : i32, i32, i32
  }
}

</mosaic_0001>

<bundles_post_ra>
// kernel: block_forward.1
= control target key start
LH: loop header
LB: loop body
LE: loop exit
PB: predicated region body
PF: predicated region fallthrough
CT: control target
= control target key end

     0   :  { %12 = vsyncpa [#allocation3], 0  ;;  %s5252_s0 = inlined_call_operand.vmem [shape: f32[2,8,128], index: 0, kind: input, shape index: {}]   ;;  %s5253_s1 = inlined_call_operand.vmem [shape: bf16[128,288], index: 1, kind: input, shape index: {}]   ;;  %s5254_s2 = inlined_call_operand.hbm [shape: bf16[96,128], index: 2, kind: input, shape index: {}]   ;;  %s5255_s3 = inlined_call_operand.vmem [shape: bf16[128,384], index: 3, kind: input, shape index: {}]   ;;  %s5256_s4 = inlined_call_operand.vmem [shape: bf16[384,128], index: 4, kind: input, shape index: {}]   ;;  %s5257_s5 = inlined_call_operand.hbm [shape: f32[8,8], index: 5, kind: input, shape index: {}]   ;;  %s5258_s6 = inlined_call_operand.hbm [shape: f32[8,8], index: 6, kind: input, shape index: {}]   ;;  %s5259_s7 = inlined_call_operand.hbm [shape: f32[2,8,128], index: 7, kind: output, shape index: {}]  }
   0x1   :  { %13 = vsyncpa [#allocation6], 0 }
   0x2   :  { %14 = vsyncpa [#allocation4], 0  ;;  %s3996_s24 = smov [#allocation5]   ;;  %s3997_s26 = smov [#allocation2]  }
   0x3   :  { %s41_s25 = sshll.u32 %s3996_s24, 4  ;;  %s24_s27 = sshll.u32 %s3997_s26, 4  ;;  %s42_s25 = int_to_ptr.vmem [resolvable:$true] %s41_s25  ;;  %s4060_s27 = int_to_ptr.vmem [resolvable:$true] %s24_s27 }
   0x4   :  { %s3902_s30 = scalar_lea.hbm %s5257_s5, 128 }
   0x5   :  { %p3903_p0 = scmp.ne.s32.totalorder %s5257_s5, %s3902_s30  ;;  %p3906_p1 = scmp.lt.u32.totalorder %s3902_s30, %s5257_s5 }
   0x7   :  { %p3908_p2 = pnand %p3906_p1, %p3903_p0 }
   0x9   :  { %3911 = shalt.err (!%p3908_p2)
}
   0xa   :  { %s3912_s12 = scalar_lea.vmem %s42_s25, 128  ;;  %p3917_p4 = scmp.lt.s32.totalorder %s42_s25, %s42_s25 }
   0xb   :  { %p3913_p3 = scmp.ne.s32.totalorder %s42_s25, %s3912_s12  ;;  %p3918_p5 = scmp.lt.s32.totalorder %s3912_s12, %s3912_s12 }
   0xd   :  { %p3919_p6 = por %p3918_p5, %p3917_p4 }
   0xf   :  { %p3920_p7 = pnand %p3919_p6, %p3913_p3 }
  0x11   :  { %3923 = shalt.err (!%p3920_p7)
}
  0x12   :  { %44 = dma.hbm_to_vmem [thread:$0]  %s5257_s5, 128, %s42_s25, [#allocation6]  }
  0x13   :  { %s3924_s17 = scalar_lea.hbm %s5254_s2, 768 }
  0x14   :  { %p3925_p8 = scmp.ne.s32.totalorder %s5254_s2, %s3924_s17  ;;  %p3928_p9 = scmp.lt.u32.totalorder %s3924_s17, %s5254_s2 }
  0x16   :  { %p3930_p10 = pnand %p3928_p9, %p3925_p8 }
  0x18   :  { %3933 = shalt.err (!%p3930_p10)
}
  0x19   :  { %s3934_s22 = scalar_lea.vmem %s4060_s27, 768  ;;  %p3939_p12 = scmp.lt.s32.totalorder %s4060_s27, %s4060_s27 }
  0x1a   :  { %p3935_p11 = scmp.ne.s32.totalorder %s4060_s27, %s3934_s22  ;;  %p3940_p13 = scmp.lt.s32.totalorder %s3934_s22, %s3934_s22 }
  0x1c   :  { %p3941_p0 = por %p3940_p13, %p3939_p12 }
  0x1e   :  { %p3942_p1 = pnand %p3941_p0, %p3935_p11 }
  0x20   :  { %3945 = shalt.err (!%p3942_p1)
}
  0x21   :  { %s3998_s5 = smov 64   ;;  %s3999_s23 = smov 4  }
  0x22   :  { %30 = dma.hbm_to_vmem [thread:$0]  %s5254_s2, 768, %s4060_s27, [#allocation3], %s3998_s5, %s3998_s5, %s3999_s23  }
  0x23   :  { %s4000_s26 = smov [#allocation7]   ;;  %s3946_s8 = scalar_lea.hbm %s5258_s6, 128 }
  0x24   :  { %s51_s28 = sshll.u32 %s4000_s26, 4  ;;  %p3947_p2 = scmp.ne.s32.totalorder %s5258_s6, %s3946_s8  ;;  %s52_s28 = int_to_ptr.vmem [resolvable:$true] %s51_s28 }
  0x25   :  { %p3950_p3 = scmp.lt.u32.totalorder %s3946_s8, %s5258_s6 }
  0x27   :  { %p3952_p4 = pnand %p3950_p3, %p3947_p2 }
  0x29   :  { %3955 = shalt.err (!%p3952_p4)
}
  0x2a   :  { %s3956_s13 = scalar_lea.vmem %s52_s28, 128  ;;  %p3961_p6 = scmp.lt.s32.totalorder %s52_s28, %s52_s28 }
  0x2b   :  { %p3957_p5 = scmp.ne.s32.totalorder %s52_s28, %s3956_s13  ;;  %p3962_p7 = scmp.lt.s32.totalorder %s3956_s13, %s3956_s13 }
  0x2d   :  { %p3963_p8 = por %p3962_p7, %p3961_p6 }
  0x2f   :  { %p3964_p9 = pnand %p3963_p8, %p3957_p5 }
  0x31   :  { %3967 = shalt.err (!%p3964_p9)
}
  0x32   :  { %54 = dma.hbm_to_vmem [thread:$0]  %s5258_s6, 128, %s52_s28, [#allocation6]  }
  0x33   :  { %3990 = dma.done.wait [#allocation3], 768  }
  0x34   :  { %3991 = vsyncadd [#allocation3], 4294966528 }
  0x35   :  { %3992 = dma.done.wait [#allocation6], 256  }
  0x36   :  { %3993 = vsyncadd [#allocation6], 4294967040  ;;  %v5261_v0 = vmov 0.0   ;;  %v4109_v1 = vld [vmem:[%s5252_s0] sm:$0xff]  ;;  %v4114_v2 = vld [vmem:[%s5252_s0 + $0x8] sm:$0xff]  ;;  %v5260_v29 = vmov 0  }
  0x37   :  { %3431 = vmatprep.subr.bf16.mxu1 %v5261_v0  ;;  %v67_v3 = vmul.f32 %v4109_v1, %v4109_v1  ;;  %v3700_v4 = vld [vmem:[%s5253_s1 + $0x4] ss:$12 sps:$4 sm:$0xff]   ;;  %v3702_v5 = vld [vmem:[%s5253_s1] ss:$12 sps:$4 sm:$0xff]   ;;  %v3703_v6 = vld [vmem:[%s5253_s1 + $0x8] ss:$12 sps:$4 sm:$0xff]   ;;  %v68_v7 = vmul.f32 %v4114_v2, %v4114_v2  ;;  %274 = vmatprep.mubr.bf16.mxu0 %v5260_v29 }
  0x38   :  { %242 = vmatprep.subr.bf16.mxu0 %v3700_v4  ;;  %v3704_v8 = vld [vmem:[%s5253_s1 + $0x1c] ss:$12 sps:$4 sm:$0xff]   ;;  %3432 = vmatpush3.bf16.msra.mxu1 %v3703_v6  ;;  %v3706_v9 = vld [vmem:[%s5253_s1 + $0x18] ss:$12 sps:$4 sm:$0xff]   ;;  %v3707_v10 = vld [vmem:[%s5253_s1 + $0x20] ss:$12 sps:$4 sm:$0xff]  }
  0x39   :  { %69 = vadd.xlane.f32.xlu0 %v67_v3  ;;  %243 = vmatpush1.bf16.msra.mxu0 %v3702_v5  ;;  %v3708_v11 = vld [vmem:[%s5253_s1 + $0x34] ss:$12 sps:$4 sm:$0xff]   ;;  %v3710_v12 = vld [vmem:[%s5253_s1 + $0x30] ss:$12 sps:$4 sm:$0xff]   ;;  %v3711_v13 = vld [vmem:[%s5253_s1 + $0x38] ss:$12 sps:$4 sm:$0xff]  }
  0x3a   :  { %244 = vmatprep.subr.bf16.mxu0 %v3704_v8  ;;  %3433 = vmatprep.subr.bf16.mxu1 %v5261_v0  ;;  %v3712_v14 = vld [vmem:[%s5253_s1 + $0x4c] ss:$12 sps:$4 sm:$0xff]   ;;  %v3714_v15 = vld [vmem:[%s5253_s1 + $0x48] ss:$12 sps:$4 sm:$0xff]   ;;  %v3715_v16 = vld [vmem:[%s5253_s1 + $0x50] ss:$12 sps:$4 sm:$0xff]  }
  0x3b   :  { %v3716_v17 = vld [vmem:[%s5253_s1 + $0x64] ss:$12 sps:$4 sm:$0xff]   ;;  %v3718_v18 = vld [vmem:[%s5253_s1 + $0x60] ss:$12 sps:$4 sm:$0xff]   ;;  %v3719_v19 = vld [vmem:[%s5253_s1 + $0x68] ss:$12 sps:$4 sm:$0xff]  }
  0x3c   :  { %3434 = vmatpush3.bf16.msra.mxu1 %v3707_v10  ;;  %v3720_v20 = vld [vmem:[%s5253_s1 + $0x7c] ss:$12 sps:$4 sm:$0xff]   ;;  %v3722_v21 = vld [vmem:[%s5253_s1 + $0x78] ss:$12 sps:$4 sm:$0xff]   ;;  %v3723_v22 = vld [vmem:[%s5253_s1 + $0x80] ss:$12 sps:$4 sm:$0xff]  }
  0x3d   :  { %71 = vadd.xlane.f32.xlu0 %v68_v7  ;;  %245 = vmatpush1.bf16.msra.mxu0 %v3706_v9  ;;  %v3724_v23 = vld [vmem:[%s5253_s1 + $0x94] ss:$12 sps:$4 sm:$0xff]   ;;  %v3726_v24 = vld [vmem:[%s5253_s1 + $0x90] ss:$12 sps:$4 sm:$0xff]   ;;  %v3727_v25 = vld [vmem:[%s5253_s1 + $0x98] ss:$12 sps:$4 sm:$0xff]  }
  0x3e   :  { %246 = vmatprep.subr.bf16.mxu0 %v3708_v11  ;;  %3435 = vmatprep.subr.bf16.mxu1 %v5261_v0  ;;  %v3728_v26 = vld [vmem:[%s5253_s1 + $0xac] ss:$12 sps:$4 sm:$0xff]   ;;  %v3730_v27 = vld [vmem:[%s5253_s1 + $0xa8] ss:$12 sps:$4 sm:$0xff]   ;;  %v3731_v28 = vld [vmem:[%s5253_s1 + $0xb0] ss:$12 sps:$4 sm:$0xff]  }
  0x3f   :  { %vm4003_vm0 = vmmov 0   ;;  %v4204_v30 = vld [vmem:[#allocation7] sm:$0xff]  ;;  %v4206_v31 = vld [vmem:[#allocation5] sm:$0xff]  ;;  %s4004_s1 = smov 104   ;;  %s4005_s16 = smov 24   ;;  %vm336_vm1 = vcmask 130048  }
  0x40   :  { %3436 = vmatpush3.bf16.msra.mxu1 %v3711_v13  ;;  %3447 = vmatprep.mubr.msk.bf16.mxu1 %vm4003_vm0, %v5261_v0  ;;  %s4006_s17 = smov 40   ;;  %s4007_s6 = smov 8   ;;  %vm372_vm2 = vcmask 64512   ;;  %vm486_vm3 = vcmask 1043456   ;;  %vm1488_vm5 = vcmask 261120   ;;  %vm1490_vm6 = vcmask 392192  }
  0x41   :  { %247 = vmatpush1.bf16.msra.mxu0 %v3710_v12  ;;  %3437 = vmatprep.subr.bf16.mxu1 %v5261_v0  ;;  %s4008_s18 = smov 56   ;;  %s4009_s19 = smov 120   ;;  %vm1492_vm7 = vcmask 523264   ;;  %vm1494_vm8 = vcmask 654336   ;;  %vm2606_vm9 = vcmask 785408  }
  0x42   :  { %248 = vmatprep.subr.bf16.mxu0 %v3712_v14  ;;  %544 = vrot.lane.b32.xlu1 %v4204_v30, %s4005_s16  ;;  %s4010_s20 = smov 72   ;;  %s4011_s21 = smov 112  }
  0x43   :  { %s4012_s22 = smov 32   ;;  %s4013_s23 = smov 48  }
  0x44   :  { %3438 = vmatpush3.bf16.msra.mxu1 %v3715_v16  ;;  %s4014_s24 = smov 16   ;;  %s4015_s25 = smov 96  }
  0x45   :  { %249 = vmatpush1.bf16.msra.mxu0 %v3714_v15  ;;  %3439 = vmatprep.subr.bf16.mxu1 %v5261_v0  ;;  %s4016_s26 = smov 80   ;;  %s4017_s28 = smov 88  }
  0x46   :  { %250 = vmatprep.subr.bf16.mxu0 %v3716_v17  ;;  %742 = vrot.lane.b32.xlu1 %v4204_v30, %s4006_s17 }
  0x48   :  { %3440 = vmatpush3.bf16.msra.mxu1 %v3719_v19 }
  0x49   :  { %251 = vmatpush1.bf16.msra.mxu0 %v3718_v18  ;;  %3441 = vmatprep.subr.bf16.mxu1 %v5261_v0 }
  0x4a   :  { %252 = vmatprep.subr.bf16.mxu0 %v3720_v20  ;;  %922 = vrot.lane.b32.xlu1 %v4204_v30, %s4008_s18 }
  0x4c   :  { %3442 = vmatpush3.bf16.msra.mxu1 %v3723_v22 }
  0x4d   :  { %253 = vmatpush1.bf16.msra.mxu0 %v3722_v21  ;;  %3443 = vmatprep.subr.bf16.mxu1 %v5261_v0 }
  0x4e   :  { %254 = vmatprep.subr.bf16.mxu0 %v3724_v23  ;;  %1109 = vrot.lane.b32.xlu1 %v4204_v30, %s4010_s20 }
  0x50   :  { %3444 = vmatpush3.bf16.msra.mxu1 %v3727_v25 }
  0x51   :  { %255 = vmatpush1.bf16.msra.mxu0 %v3726_v24  ;;  %3445 = vmatprep.subr.bf16.mxu1 %v5261_v0 }
  0x52   :  { %256 = vmatprep.subr.bf16.mxu0 %v3728_v26 }
  0x53   :  { %390 = vrot.lane.b32.xlu0 %v4204_v30, %s4004_s1 }
  0x54   :  { %3446 = vmatpush3.bf16.msra.mxu1 %v3731_v28 }
  0x55   :  { %257 = vmatpush1.bf16.msra.mxu0 %v3730_v27  ;;  %3451 = vmatprep.subr.bf16.mxu1 %v5261_v0 }
  0x56   :  { %3463 = vmatprep.subr.bf16.mxu0 %v5261_v0 }
  0x57   :  { %404 = vrot.lane.b32.xlu0 %v4206_v31, %s4004_s1 }
  0x5b   :  { %359 = vrot.lane.b32.xlu0 %v4206_v31, %s4007_s6 }
  0x5f   :  { %591 = vrot.lane.b32.xlu0 %v4204_v30, %s4009_s19 }
  0x63   :  { %605 = vrot.lane.b32.xlu0 %v4206_v31, %s4009_s19 }
  0x67   :  { %558 = vrot.lane.b32.xlu0 %v4206_v31, %s4005_s16 }
  0x6b   :  { %756 = vrot.lane.b32.xlu0 %v4206_v31, %s4006_s17 }
  0x6f   :  { %936 = vrot.lane.b32.xlu0 %v4206_v31, %s4008_s18 }
  0x73   :  { %1123 = vrot.lane.b32.xlu0 %v4206_v31, %s4010_s20 }
  0xb4   :  { %v4290_v62 = vpop.permute.xlu1 %544 }
  0xc6   :  { %v70_v32 = vpop.xlane.xlu0 %69 }
  0xc7   :  { %v73_v33 = vmul.f32 0.010416667, %v70_v32 }
  0xc9   :  { %v75_v34 = vadd.f32 1.1920929e-07, %v73_v33 }
  0xca   :  { %v72_v35 = vpop.xlane.xlu0 %71 }
  0xcb   :  { %v74_v36 = vmul.f32 0.010416667, %v72_v35  ;;  %3794 = vrsqrt.f32 %v75_v34 }
  0xcd   :  { %v76_v37 = vadd.f32 1.1920929e-07, %v74_v36 }
  0xce   :  { %v4279_v56 = vpop.permute.xlu0 %390 }
  0xcf   :  { %3796 = vrsqrt.f32 %v76_v37 }
  0xd2   :  { %v4281_v57 = vpop.permute.xlu0 %404 }
  0xd5   :  { %v3795_v38 = vpop.eup %3794 }
  0xd6   :  { %v79_v40 = vmul.f32 %v3795_v38, %v4109_v1  ;;  %v4283_v58 = vpop.permute.xlu0 %359 }
  0xd9   :  { %v3797_v39 = vpop.eup %3796 }
  0xda   :  { %v80_v41 = vmul.f32 %v3797_v39, %v4114_v2  ;;  %v4286_v60 = vpop.permute.xlu0 %591  ;;  %v4295_v2 = vpop.permute.xlu1 %742 }
  0xdc   :  { %v81_v42 = vpack.c.bf16 %v80_v41, %v79_v40 }
  0xde   :  { %275 = vmatmul.mubr.bf16.vlgmr.msra.gmra.mrb[0].mxu0 %v81_v42  ;;  %3448 = vmatmul.mubr.bf16.vlgmr.msra.gmra.mrb[0].mxu1 %v81_v42  ;;  %v4288_v61 = vpop.permute.xlu0 %605  ;;  %v4299_v4 = vpop.permute.xlu1 %922 }
  0xdf   :  { %3453 = vmatprep.mubr.msk.bf16.mxu1 %vm4003_vm0, %v5261_v0  ;;  %3465 = vmatprep.mubr.msk.bf16.mxu0 %vm4003_vm0, %v5261_v0 }
  0xe2   :  { %v4293_v1 = vpop.permute.xlu0 %558  ;;  %v4303_v6 = vpop.permute.xlu1 %1109 }
  0xe6   :  { %v4297_v3 = vpop.permute.xlu0 %756 }
  0xea   :  { %v4301_v5 = vpop.permute.xlu0 %936 }
  0xee   :  { %v4305_v7 = vpop.permute.xlu0 %1123 }
 0x1b1   :  { %v4240_v43 = vpop.f32.mrb[0].mxu0  ;;  %v4242_v44 = vpop.f32.mrb[0].mxu1 }
 0x1b2   :  { %v335_v45 = vmul.f32 %v4240_v43, %v4240_v43  ;;  %v4246_v46 = vpop.f32.mrb[1].mxu0  ;;  %v3449_v47 = vpop.f32.mrb[1].mxu1 }
 0x1b3   :  { %v4248_v48 = vpop.f32.mrb[2].mxu0  ;;  %v4250_v49 = vpop.f32.mrb[2].mxu1  ;;  %v775_v52 = vmul.f32 %v4246_v46, %v4246_v46 }
 0x1b4   :  { %5263 = vst [vmem:[#allocation12_spill] sm:$0xff] %v4250_v49  ;;  %v3450_v50 = vpop.f32.mrb[3].mxu1  ;;  %530 = vrot.lane.b32.xlu0 %v335_v45, %s4011_s21  ;;  %376 = vrot.lane.b32.xlu1 %v335_v45, %s4012_s22  ;;  %v4254_v51 = vpop.f32.mrb[3].mxu0  ;;  %v1496_v53 = vmul.f32 %v4248_v48, %v4248_v48  ;;  %v337_v54 = vsel %vm336_vm1, %v335_v45, 0.0 }
 0x1b5   :  { %v1876_v55 = vmul.f32 %v4254_v51, %v4254_v51  ;;  %v776_v63 = vsel %vm336_vm1, %v775_v52, 0.0 }
 0x1b6   :  { %v1497_v59 = vsel %vm336_vm1, %v1496_v53, 0.0 }
 0x1b7   :  { %v1877_v23 = vsel %vm336_vm1, %v1876_v55, 0.0 }
 0x1b8   :  { %1280 = vrot.lane.b32.xlu0 %v335_v45, %s4013_s23  ;;  %577 = vrot.lane.b32.xlu1 %v335_v45, %s4014_s24 }
 0x1bc   :  { %728 = vrot.lane.b32.xlu1 %v335_v45, %s4015_s25 }
 0x1c0   :  { %908 = vrot.lane.b32.xlu1 %v335_v45, %s4016_s26 }
 0x1c4   :  { %1095 = vrot.lane.b32.xlu1 %v335_v45, %s3998_s5 }
 0x1c8   :  { %956 = vrot.lane.b32.xlu1 %v775_v52, %s4011_s21 }
 0x1cc   :  { %1142 = vrot.lane.b32.xlu1 %v775_v52, %s4015_s25 }
 0x1d0   :  { %1327 = vrot.lane.b32.xlu1 %v775_v52, %s4016_s26 }
 0x1d4   :  { %1526 = vrot.lane.b32.xlu1 %v1496_v53, %s4012_s22 }
 0x1d7   :  { %338 = vadd.xlane.f32.xlu0 %v337_v54 }
 0x1d8   :  { %2357 = vrot.lane.b32.xlu1 %v1496_v53, %s4013_s23 }
 0x1dc   :  { %2045 = vrot.lane.b32.xlu1 %v1876_v55, %s4011_s21 }
 0x1e0   :  { %2219 = vrot.lane.b32.xlu1 %v1876_v55, %s4015_s25 }
 0x1e4   :  { %2392 = vrot.lane.b32.xlu1 %v1876_v55, %s4016_s26 }
 0x1ed   :  { %1702 = vrot.lane.b32.xlu0 %v1496_v53, %s4014_s24 }
 0x1f1   :  { %1667 = vrot.lane.b32.xlu0 %v1496_v53, %s4011_s21 }
 0x1f5   :  { %1841 = vrot.lane.b32.xlu0 %v1496_v53, %s4015_s25 }
 0x208   :  { %1498 = vadd.xlane.f32.xlu1 %v1497_v59 }
 0x214   :  { %777 = vadd.xlane.f32.xlu0 %v776_v63 }
 0x226   :  { %v377_v8 = vpop.permute.xlu1 %376  ;;  %v531_v12 = vpop.permute.xlu0 %530 }
 0x227   :  { %v379_v9 = vsel %vm336_vm1, %v377_v8, 0.0  ;;  %v533_v14 = vsel %vm336_vm1, %v531_v12, 0.0 }
 0x228   :  { %380 = vadd.xlane.f32.xlu1 %v379_v9 }
 0x22a   :  { %v578_v10 = vpop.permute.xlu1 %577  ;;  %2009 = vrot.lane.b32.xlu0 %v1496_v53, %s4016_s26  ;;  %v1281_v20 = vpop.permute.xlu0 %1280 }
 0x22b   :  { %v580_v11 = vsel %vm336_vm1, %v578_v10, 0.0  ;;  %v1283_v21 = vsel %vm336_vm1, %v1281_v20, 0.0 }
 0x22c   :  { %581 = vadd.xlane.f32.xlu1 %v580_v11 }
 0x22e   :  { %v729_v13 = vpop.permute.xlu1 %728  ;;  %2184 = vrot.lane.b32.xlu0 %v1496_v53, %s3998_s5 }
 0x22f   :  { %v731_v16 = vsel %vm336_vm1, %v729_v13, 0.0 }
 0x230   :  { %534 = vadd.xlane.f32.xlu1 %v533_v14 }
 0x232   :  { %v909_v15 = vpop.permute.xlu1 %908 }
 0x233   :  { %v911_v17 = vsel %vm336_vm1, %v909_v15, 0.0 }
 0x234   :  { %732 = vadd.xlane.f32.xlu1 %v731_v16 }
 0x236   :  { %v1096_v18 = vpop.permute.xlu1 %1095 }
 0x237   :  { %v1098_v19 = vsel %vm336_vm1, %v1096_v18, 0.0 }
 0x238   :  { %912 = vadd.xlane.f32.xlu1 %v911_v17 }
 0x23a   :  { %v957_v22 = vpop.permute.xlu1 %956 }
 0x23b   :  { %v959_v25 = vsel %vm336_vm1, %v957_v22, 0.0 }
 0x23c   :  { %1099 = vadd.xlane.f32.xlu1 %v1098_v19 }
 0x23e   :  { %v1143_v24 = vpop.permute.xlu1 %1142 }
 0x23f   :  { %v1145_v27 = vsel %vm336_vm1, %v1143_v24, 0.0 }
 0x240   :  { %1284 = vadd.xlane.f32.xlu1 %v1283_v21 }
 0x242   :  { %v1328_v26 = vpop.permute.xlu1 %1327 }
 0x243   :  { %v1330_v28 = vsel %vm336_vm1, %v1328_v26, 0.0 }
 0x246   :  { %v1527_v32 = vpop.permute.xlu1 %1526 }
 0x247   :  { %v1529_v33 = vsel %vm336_vm1, %v1527_v32, 0.0 }
 0x24a   :  { %v4321_v34 = vpop.permute.xlu1 %2357 }
 0x24d   :  { %1878 = vadd.xlane.f32.xlu0 %v1877_v23 }
 0x24e   :  { %v2046_v38 = vpop.permute.xlu1 %2045 }
 0x24f   :  { %v2048_v40 = vsel %vm336_vm1, %v2046_v38, 0.0 }
 0x251   :  { %960 = vadd.xlane.f32.xlu0 %v959_v25 }
 0x252   :  { %v2220_v47 = vpop.permute.xlu1 %2219 }
 0x253   :  { %v2222_v52 = vsel %vm336_vm1, %v2220_v47, 0.0 }
 0x255   :  { %1146 = vadd.xlane.f32.xlu0 %v1145_v27 }
 0x256   :  { %v2393_v9 = vpop.permute.xlu1 %2392 }
 0x257   :  { %v2395_v10 = vsel %vm336_vm1, %v2393_v9, 0.0 }
 0x259   :  { %1331 = vadd.xlane.f32.xlu0 %v1330_v28 }
 0x25d   :  { %1530 = vadd.xlane.f32.xlu0 %v1529_v33 }
 0x264   :  { %v339_v35 = vpop.xlane.xlu0 %338 }
 0x265   :  { %v341_v54 = vmul.f32 0.0625, %v339_v35 }
 0x267   :  { %v342_v63 = vadd.f32 1.1920929e-07, %v341_v54 }
 0x268   :  { %v1703_v36 = vpop.permute.xlu0 %1702 }
 0x269   :  { %v1705_v37 = vsel %vm336_vm1, %v1703_v36, 0.0  ;;  %3798 = vrsqrt.f32 %v342_v63 }
 0x26a   :  { %1706 = vadd.xlane.f32.xlu0 %v1705_v37 }
 0x26c   :  { %v1668_v39 = vpop.permute.xlu0 %1667 }
 0x26d   :  { %v1670_v41 = vsel %vm336_vm1, %v1668_v39, 0.0 }
 0x26e   :  { %2049 = vadd.xlane.f32.xlu0 %v2048_v40  ;;  %1671 = vadd.xlane.f32.xlu1 %v1670_v41 }
 0x270   :  { %v1842_v42 = vpop.permute.xlu0 %1841 }
 0x271   :  { %v1844_v45 = vsel %vm336_vm1, %v1842_v42, 0.0 }
 0x272   :  { %1845 = vadd.xlane.f32.xlu1 %v1844_v45  ;;  %v2360_v45 = vsel %vm336_vm1, %v4321_v34, 0.0 }
 0x273   :  { %v3799_v11 = vpop.eup %3798 }
 0x274   :  { %v4338_v13 = vmul.f32 %v3799_v11, %v4240_v43 }
 0x276   :  { %v362_v16 = vmul.f32 %v4283_v58, %v4338_v13 }
 0x283   :  { %1294 = vrot.lane.b32.xlu1 %v4204_v30, %s4017_s28 }
 0x284   :  { %1308 = vrot.lane.b32.xlu0 %v4206_v31, %s4017_s28 }
 0x295   :  { %v4340_v14 = vpop.xlane.xlu1 %1498 }
 0x2a1   :  { %v778_v50 = vpop.xlane.xlu0 %777 }
 0x2a2   :  { %v779_v12 = vmul.f32 0.0625, %v778_v50 }
 0x2a3   :  { %2223 = vadd.xlane.f32.xlu0 %v2222_v52 }
 0x2a4   :  { %v780_v15 = vadd.f32 1.1920929e-07, %v779_v12 }
 0x2a5   :  { %v2010_v53 = vpop.permute.xlu0 %2009 }
 0x2a6   :  { %v2012_v55 = vsel %vm336_vm1, %v2010_v53, 0.0  ;;  %3800 = vrsqrt.f32 %v780_v15 }
 0x2a7   :  { %2013 = vadd.xlane.f32.xlu1 %v2012_v55 }
 0x2a9   :  { %v2185_v59 = vpop.permute.xlu0 %2184 }
 0x2aa   :  { %v2187_v8 = vsel %vm336_vm1, %v2185_v59, 0.0 }
 0x2ab   :  { %2188 = vadd.xlane.f32.xlu1 %v2187_v8 }
 0x2af   :  { %2396 = vadd.xlane.f32.xlu1 %v2395_v10 }
 0x2b0   :  { %v3801_v19 = vpop.eup %3800 }
 0x2b1   :  { %v4356_v22 = vmul.f32 %v3801_v19, %v4246_v46 }
 0x2b3   :  { %v792_v25 = vmul.f32 %v4356_v22, %v4283_v58 }
 0x2b5   :  { %v381_v17 = vpop.xlane.xlu1 %380 }
 0x2b6   :  { %v382_v40 = vmul.f32 0.0625, %v381_v17 }
 0x2b8   :  { %v383_v50 = vadd.f32 1.1920929e-07, %v382_v40 }
 0x2b9   :  { %400 = vrot.lane.b32.xlu0 %v4204_v30, %s4015_s25  ;;  %v582_v18 = vpop.xlane.xlu1 %581 }
 0x2ba   :  { %v583_v21 = vmul.f32 0.0625, %v582_v18 }
 0x2bc   :  { %v584_v23 = vadd.f32 1.1920929e-07, %v583_v21 }
 0x2bd   :  { %347 = vrot.lane.b32.xlu0 %v4204_v30, %s4007_s6  ;;  %v535_v20 = vpop.xlane.xlu1 %534 }
 0x2be   :  { %3802 = vrsqrt.f32 %v584_v23  ;;  %v536_v26 = vmul.f32 0.0625, %v535_v20 }
 0x2c0   :  { %386 = vrot.lane.b32.xlu1 %v4206_v31, %s4015_s25  ;;  %v537_v28 = vadd.f32 1.1920929e-07, %v536_v26 }
 0x2c1   :  { %364 = vrot.lane.b32.xlu0 %v362_v16, %s4009_s19  ;;  %v733_v24 = vpop.xlane.xlu1 %732 }
 0x2c2   :  { %v734_v32 = vmul.f32 0.0625, %v733_v24  ;;  %3804 = vrsqrt.f32 %v537_v28 }
 0x2c4   :  { %v735_v35 = vadd.f32 1.1920929e-07, %v734_v32 }
 0x2c5   :  { %587 = vrot.lane.b32.xlu0 %v4206_v31, %s4011_s21  ;;  %v913_v27 = vpop.xlane.xlu1 %912 }
 0x2c6   :  { %v914_v36 = vmul.f32 0.0625, %v913_v27  ;;  %3806 = vrsqrt.f32 %v735_v35 }
 0x2c8   :  { %v3803_v39 = vpop.eup %3802  ;;  %v915_v41 = vadd.f32 1.1920929e-07, %v914_v36 }
 0x2c9   :  { %601 = vrot.lane.b32.xlu0 %v4204_v30, %s4011_s21  ;;  %v1100_v37 = vpop.xlane.xlu1 %1099  ;;  %v4374_v47 = vmul.f32 %v3803_v39, %v4240_v43 }
 0x2ca   :  { %v1101_v42 = vmul.f32 0.0625, %v1100_v37  ;;  %3808 = vrsqrt.f32 %v915_v41 }
 0x2cb   :  { %v594_v55 = vmul.f32 %v4286_v60, %v4374_v47  ;;  %3810 = vrsqrt.f32 %v383_v50  ;;  %v608_v9 = vmul.f32 %v4288_v61, %v4374_v47  ;;  %v600_v29 = vsub.f32 0.0, %v4374_v47 }
 0x2cc   :  { %v1102_v53 = vadd.f32 1.1920929e-07, %v1101_v42  ;;  %v3805_v59 = vpop.eup %3804 }
 0x2cd   :  { %540 = vrot.lane.b32.xlu0 %v4206_v31, %s4014_s24  ;;  %v4384_v10 = vmul.f32 %v3805_v59, %v4240_v43 }
 0x2ce   :  { %3812 = vrsqrt.f32 %v1102_v53 }
 0x2cf   :  { %v547_v16 = vmul.f32 %v4290_v62, %v4384_v10 }
 0x2d0   :  { %v3807_v11 = vpop.eup %3806 }
 0x2d1   :  { %554 = vrot.lane.b32.xlu0 %v4204_v30, %s4014_s24  ;;  %v4390_v17 = vmul.f32 %v3807_v11, %v4240_v43 }
 0x2d3   :  { %v745_v21 = vmul.f32 %v4295_v2, %v4390_v17 }
 0x2d4   :  { %v3809_v18 = vpop.eup %3808 }
 0x2d5   :  { %794 = vrot.lane.b32.xlu0 %v792_v25, %s4009_s19  ;;  %v3811_v20 = vpop.eup %3810  ;;  %v4396_v23 = vmul.f32 %v3809_v18, %v4240_v43  ;;  %v1285_v25 = vpop.xlane.xlu1 %1284  ;;  %v759_v18 = vmul.f32 %v4297_v3, %v4390_v17 }
 0x2d6   :  { %v4407_v32 = vmul.f32 %v3811_v20, %v4240_v43  ;;  %v1286_v36 = vmul.f32 0.0625, %v1285_v25 }
 0x2d7   :  { %v925_v27 = vmul.f32 %v4299_v4, %v4396_v23  ;;  %v939_v25 = vmul.f32 %v4301_v5, %v4396_v23 }
 0x2d8   :  { %v3813_v24 = vpop.eup %3812  ;;  %v393_v39 = vmul.f32 %v4279_v56, %v4407_v32  ;;  %v1287_v42 = vadd.f32 1.1920929e-07, %v1286_v36  ;;  %v407_v53 = vmul.f32 %v4281_v57, %v4407_v32 }
 0x2d9   :  { %738 = vrot.lane.b32.xlu0 %v4206_v31, %s4012_s22  ;;  %v4404_v28 = vmul.f32 %v3813_v24, %v4240_v43 }
 0x2da   :  { %v4365_v33 = vpop.xlane.xlu0 %1878 }
 0x2dd   :  { %752 = vrot.lane.b32.xlu0 %v4204_v30, %s4012_s22 }
 0x2de   :  { %v961_v38 = vpop.xlane.xlu0 %960 }
 0x2df   :  { %v962_v54 = vmul.f32 0.0625, %v961_v38  ;;  %v1112_v38 = vmul.f32 %v4303_v6, %v4404_v28 }
 0x2e1   :  { %918 = vrot.lane.b32.xlu0 %v4206_v31, %s4013_s23  ;;  %v963_v34 = vadd.f32 1.1920929e-07, %v962_v54 }
 0x2e2   :  { %v1147_v52 = vpop.xlane.xlu0 %1146 }
 0x2e3   :  { %v1148_v63 = vmul.f32 0.0625, %v1147_v52  ;;  %3814 = vrsqrt.f32 %v963_v34 }
 0x2e4   :  { %2361 = vadd.xlane.f32.xlu1 %v2360_v45  ;;  %v1500_v45 = vmul.f32 0.0625, %v4340_v14 }
 0x2e5   :  { %1105 = vrot.lane.b32.xlu0 %v4206_v31, %s3998_s5  ;;  %v1149_v12 = vadd.f32 1.1920929e-07, %v1148_v63 }
 0x2e6   :  { %v1332_v8 = vpop.xlane.xlu0 %1331  ;;  %v1501_v63 = vadd.f32 1.1920929e-07, %v1500_v45 }
 0x2e7   :  { %v1333_v15 = vmul.f32 0.0625, %v1332_v8  ;;  %3816 = vrsqrt.f32 %v1149_v12 }
 0x2e9   :  { %596 = vrot.lane.b32.xlu0 %v594_v55, %s4009_s19  ;;  %v1334_v19 = vadd.f32 1.1920929e-07, %v1333_v15 }
 0x2ea   :  { %v1531_v26 = vpop.xlane.xlu0 %1530 }
 0x2eb   :  { %3818 = vrsqrt.f32 %v1334_v19  ;;  %v1532_v37 = vmul.f32 0.0625, %v1531_v26 }
 0x2ec   :  { %3820 = vrsqrt.f32 %v1287_v42 }
 0x2ed   :  { %610 = vrot.lane.b32.xlu0 %v608_v9, %s4009_s19  ;;  %v3815_v35 = vpop.eup %3814  ;;  %v1533_v50 = vadd.f32 1.1920929e-07, %v1532_v37  ;;  %v561_v9 = vmul.f32 %v4293_v1, %v4384_v10 }
 0x2ee   :  { %v4417_v40 = vmul.f32 %v3815_v35, %v4246_v46 }
 0x2ef   :  { %3822 = vrsqrt.f32 %v1533_v50 }
 0x2f0   :  { %v967_v54 = vmul.f32 %v4417_v40, %v4290_v62  ;;  %3824 = vrsqrt.f32 %v1501_v63  ;;  %v975_v50 = vmul.f32 %v4417_v40, %v4293_v1 }
 0x2f1   :  { %549 = vrot.lane.b32.xlu0 %v547_v16, %s4009_s19  ;;  %v3817_v41 = vpop.eup %3816 }
 0x2f2   :  { %v4427_v55 = vmul.f32 %v3817_v41, %v4246_v46  ;;  %v1126_v41 = vmul.f32 %v4305_v7, %v4404_v28 }
 0x2f4   :  { %v1153_v11 = vmul.f32 %v4427_v55, %v4295_v2 }
 0x2f5   :  { %747 = vrot.lane.b32.xlu0 %v745_v21, %s4009_s19  ;;  %932 = vrot.lane.b32.xlu1 %v4204_v30, %s4013_s23  ;;  %v3819_v59 = vpop.eup %3818  ;;  %v1880_v21 = vmul.f32 0.0625, %v4365_v33 }
 0x2f6   :  { %v4432_v8 = vmul.f32 %v3819_v59, %v4246_v46  ;;  %v3821_v20 = vpop.eup %3820 }
 0x2f7   :  { %v1707_v52 = vpop.xlane.xlu0 %1706  ;;  %v4452_v35 = vmul.f32 %v3821_v20, %v4240_v43  ;;  %v1881_v36 = vadd.f32 1.1920929e-07, %v1880_v21 }
 0x2f8   :  { %v1708_v14 = vmul.f32 0.0625, %v1707_v52  ;;  %v1338_v19 = vmul.f32 %v4432_v8, %v4299_v4 }
 0x2f9   :  { %927 = vrot.lane.b32.xlu0 %v925_v27, %s4009_s19  ;;  %1119 = vrot.lane.b32.xlu1 %v4204_v30, %s3998_s5  ;;  %v3823_v26 = vpop.eup %3822 }
 0x2fa   :  { %v1709_v12 = vadd.f32 1.1920929e-07, %v1708_v14  ;;  %v4458_v33 = vmul.f32 %v3823_v26, %v4248_v48  ;;  %v3825_v43 = vpop.eup %3824 }
 0x2fb   :  { %v1672_v34 = vpop.xlane.xlu1 %1671  ;;  %v4467_v45 = vmul.f32 %v3825_v43, %v4248_v48 }
 0x2fc   :  { %v1673_v15 = vmul.f32 0.0625, %v1672_v34  ;;  %3826 = vrsqrt.f32 %v1709_v12  ;;  %v1537_v52 = vmul.f32 %v4458_v33, %v4279_v56  ;;  %v1161_v34 = vmul.f32 %v4427_v55, %v4297_v3 }
 0x2fd   :  { %1114 = vrot.lane.b32.xlu0 %v1112_v38, %s4009_s19  ;;  %395 = vrot.lane.b32.xlu1 %v393_v39, %s4009_s19  ;;  %v2050_v38 = vpop.xlane.xlu0 %2049  ;;  %v1513_v63 = vmul.f32 %v4467_v45, %v4283_v58 }
 0x2fe   :  { %v1674_v24 = vadd.f32 1.1920929e-07, %v1673_v15 }
 0x2ff   :  { %v1846_v16 = vpop.xlane.xlu1 %1845 }
 0x300   :  { %3828 = vrsqrt.f32 %v1674_v24  ;;  %v1847_v37 = vmul.f32 0.0625, %v1846_v16 }
 0x301   :  { %409 = vrot.lane.b32.xlu1 %v407_v53, %s4009_s19  ;;  %969 = vrot.lane.b32.xlu0 %v967_v54, %s4009_s19  ;;  %3830 = vrsqrt.f32 %v1881_v36  ;;  %v1545_v36 = vmul.f32 %v4458_v33, %v4281_v57 }
 0x302   :  { %v1848_v42 = vadd.f32 1.1920929e-07, %v1847_v37 }
 0x303   :  { %v4449_v27 = vpop.permute.xlu1 %1294 }
 0x304   :  { %v1297_v39 = vmul.f32 %v4449_v27, %v4452_v35  ;;  %3832 = vrsqrt.f32 %v1848_v42 }
 0x305   :  { %563 = vrot.lane.b32.xlu1 %v561_v9, %s4009_s19  ;;  %1155 = vrot.lane.b32.xlu0 %v1153_v11, %s4009_s19  ;;  %v1346_v9 = vmul.f32 %v4432_v8, %v4301_v5 }
 0x306   :  { %v3827_v53 = vpop.eup %3826 }
 0x307   :  { %v4476_v59 = vmul.f32 %v3827_v53, %v4248_v48 }
 0x309   :  { %761 = vrot.lane.b32.xlu1 %v759_v18, %s4009_s19  ;;  %1340 = vrot.lane.b32.xlu0 %v1338_v19, %s4009_s19  ;;  %v1721_v11 = vmul.f32 %v4476_v59, %v4288_v61  ;;  %v4498_v19 = vpop.permute.xlu0 %1308  ;;  %v1713_v37 = vmul.f32 %v4476_v59, %v4286_v60 }
 0x30a   :  { %v3829_v14 = vpop.eup %3828  ;;  %v1311_v20 = vmul.f32 %v4498_v19, %v4452_v35 }
 0x30b   :  { %v4485_v56 = vmul.f32 %v3829_v14, %v4248_v48  ;;  %v3831_v12 = vpop.eup %3830 }
 0x30c   :  { %v4494_v15 = vmul.f32 %v3831_v12, %v4254_v51 }
 0x30d   :  { %941 = vrot.lane.b32.xlu1 %v939_v25, %s4009_s19  ;;  %1290 = vrot.lane.b32.xlu0 %v4206_v31, %s4016_s26  ;;  %v2051_v31 = vmul.f32 0.0625, %v2050_v38  ;;  %v1686_v16 = vmul.f32 %v4485_v56, %v4293_v1  ;;  %v1678_v38 = vmul.f32 %v4485_v56, %v4290_v62 }
 0x30e   :  { %v3833_v18 = vpop.eup %3832  ;;  %v1893_v21 = vmul.f32 %v4494_v15, %v4283_v58 }
 0x30f   :  { %v2052_v54 = vadd.f32 1.1920929e-07, %v2051_v31  ;;  %v4504_v61 = vmul.f32 %v3833_v18, %v4248_v48 }
 0x311   :  { %1128 = vrot.lane.b32.xlu1 %v1126_v41, %s4009_s19  ;;  %1299 = vrot.lane.b32.xlu0 %v1297_v39, %s4009_s19  ;;  %3834 = vrsqrt.f32 %v2052_v54  ;;  %v1852_v26 = vmul.f32 %v4504_v61, %v4295_v2 }
 0x315   :  { %977 = vrot.lane.b32.xlu1 %v975_v50, %s4009_s19  ;;  %1539 = vrot.lane.b32.xlu0 %v1537_v52, %s4009_s19  ;;  %v356_v52 = vsub.f32 0.0, %v4338_v13 }
 0x317   :  { %v357_v14 = vmul.f32 %v356_v52, %v4204_v30 }
 0x319   :  { %1163 = vrot.lane.b32.xlu1 %v1161_v34, %s4009_s19  ;;  %1515 = vrot.lane.b32.xlu0 %v1513_v63, %s4009_s19 }
 0x31b   :  { %v3835_v24 = vpop.eup %3834 }
 0x31c   :  { %v4513_v25 = vmul.f32 %v3835_v24, %v4254_v51 }
 0x31d   :  { %1348 = vrot.lane.b32.xlu1 %v1346_v9, %s4009_s19  ;;  %1723 = vrot.lane.b32.xlu0 %v1721_v11, %s4009_s19 }
 0x31e   :  { %v2056_v58 = vmul.f32 %v4513_v25, %v4290_v62 }
 0x321   :  { %1304 = vrot.lane.b32.xlu1 %v4204_v30, %s4016_s26  ;;  %1688 = vrot.lane.b32.xlu0 %v1686_v16, %s4009_s19  ;;  %v1860_v16 = vmul.f32 %v4504_v61, %v4297_v3 }
 0x325   :  { %1895 = vrot.lane.b32.xlu0 %v1893_v21, %s4009_s19  ;;  %1313 = vrot.lane.b32.xlu1 %v1311_v20, %s4009_s19 }
 0x329   :  { %1854 = vrot.lane.b32.xlu0 %v1852_v26, %s4009_s19  ;;  %1547 = vrot.lane.b32.xlu1 %v1545_v36, %s4009_s19  ;;  %v2064_v26 = vmul.f32 %v4513_v25, %v4293_v1  ;;  %v790_v1 = vsub.f32 0.0, %v4356_v22 }
 0x32d   :  { %2058 = vrot.lane.b32.xlu0 %v2056_v58, %s4009_s19  ;;  %1715 = vrot.lane.b32.xlu1 %v1713_v37, %s4009_s19 }
 0x330   :  { %v2224_v39 = vpop.xlane.xlu0 %2223 }
 0x331   :  { %v2225_v41 = vmul.f32 0.0625, %v2224_v39  ;;  %1680 = vrot.lane.b32.xlu1 %v1678_v38, %s4009_s19 }
 0x333   :  { %v2226_v57 = vadd.f32 1.1920929e-07, %v2225_v41 }
 0x334   :  { %v2014_v43 = vpop.xlane.xlu1 %2013  ;;  %v4530_v31 = vpop.permute.xlu0 %400 }
 0x335   :  { %v2015_v42 = vmul.f32 0.0625, %v2014_v43  ;;  %3836 = vrsqrt.f32 %v2226_v57 }
 0x337   :  { %v2016_v50 = vadd.f32 1.1920929e-07, %v2015_v42  ;;  %v791_v42 = vmul.f32 %v790_v1, %v4204_v30 }
 0x338   :  { %v2189_v60 = vpop.xlane.xlu1 %2188  ;;  %v4533_v53 = vpop.permute.xlu0 %347 }
 0x339   :  { %3838 = vrsqrt.f32 %v2016_v50  ;;  %v2190_v54 = vmul.f32 0.0625, %v2189_v60  ;;  %v350_v62 = vmul.f32 %v4533_v53, %v4338_v13  ;;  %v784_v34 = vmul.f32 %v4356_v22, %v4533_v53 }
 0x33b   :  { %v2191_v63 = vadd.f32 1.1920929e-07, %v2190_v54  ;;  %352 = vrot.lane.b32.xlu1 %v350_v62, %s4009_s19  ;;  %786 = vrot.lane.b32.xlu0 %v784_v34, %s4009_s19 }
 0x33c   :  { %v365_v9 = vpop.permute.xlu0 %364 }
 0x33d   :  { %3840 = vrsqrt.f32 %v2191_v63  ;;  %v367_v11 = vadd.f32 %v365_v9, %v357_v14  ;;  %v2397_v14 = vpop.xlane.xlu1 %2396 }
 0x33f   :  { %369 = vrot.lane.b32.xlu1 %v367_v11, %s4007_s6  ;;  %v3837_v18 = vpop.eup %3836  ;;  %v2398_v11 = vmul.f32 0.0625, %v2397_v14 }
 0x340   :  { %v4543_v12 = vpop.permute.xlu0 %587  ;;  %v4556_v36 = vmul.f32 %v3837_v18, %v4254_v51 }
 0x341   :  { %v2399_v18 = vadd.f32 1.1920929e-07, %v2398_v11 }
 0x342   :  { %v2230_v41 = vmul.f32 %v4556_v36, %v4295_v2 }
 0x343   :  { %v3839_v20 = vpop.eup %3838  ;;  %1862 = vrot.lane.b32.xlu1 %v1860_v16, %s4009_s19  ;;  %3842 = vrsqrt.f32 %v2399_v18 }
 0x344   :  { %v4549_v21 = vmul.f32 %v3839_v20, %v4248_v48  ;;  %v4551_v24 = vpop.permute.xlu0 %601  ;;  %v4595_v20 = vpop.permute.xlu1 %386 }
 0x346   :  { %v2020_v58 = vmul.f32 %v4549_v21, %v4299_v4  ;;  %v2028_v2 = vmul.f32 %v4549_v21, %v4301_v5 }
 0x347   :  { %v3841_v37 = vpop.eup %3840  ;;  %2066 = vrot.lane.b32.xlu1 %v2064_v26, %s4009_s19 }
 0x348   :  { %2022 = vrot.lane.b32.xlu0 %v2020_v58, %s4009_s19  ;;  %v4562_v38 = vpop.permute.xlu0 %540  ;;  %v4565_v39 = vmul.f32 %v3841_v37, %v4248_v48 }
 0x34a   :  { %v2195_v43 = vmul.f32 %v4565_v39, %v4303_v6  ;;  %v2238_v6 = vmul.f32 %v4556_v36, %v4297_v3  ;;  %v2203_v62 = vmul.f32 %v4565_v39, %v4305_v7 }
 0x34c   :  { %2232 = vrot.lane.b32.xlu0 %v2230_v41, %s4009_s19  ;;  %v4571_v57 = vpop.permute.xlu0 %554 }
 0x34d   :  { %v3843_v1 = vpop.eup %3842 }
 0x350   :  { %2197 = vrot.lane.b32.xlu0 %v2195_v43, %s4009_s19  ;;  %v795_v50 = vpop.permute.xlu0 %794  ;;  %v389_v43 = vmul.f32 %v4595_v20, %v4407_v32 }
 0x351   :  { %v797_v52 = vadd.f32 %v795_v50, %v791_v42 }
 0x353   :  { %799 = vrot.lane.b32.xlu1 %v797_v52, %s4007_s6  ;;  %v399_v52 = vsub.f32 0.0, %v4407_v32  ;;  %v604_v32 = vmul.f32 %v4551_v24, %v600_v29 }
 0x354   :  { %v4578_v60 = vpop.permute.xlu0 %738 }
 0x357   :  { %2030 = vrot.lane.b32.xlu1 %v2028_v2, %s4009_s19  ;;  %v4609_v2 = vmul.f32 %v3843_v1, %v4254_v51 }
 0x358   :  { %v4583_v54 = vpop.permute.xlu0 %752 }
 0x359   :  { %v2411_v49 = vmul.f32 %v4609_v2, %v4301_v5 }
 0x35b   :  { %2240 = vrot.lane.b32.xlu1 %v2238_v6, %s4009_s19 }
 0x35c   :  { %v4588_v30 = vpop.permute.xlu0 %918 }
 0x35f   :  { %2205 = vrot.lane.b32.xlu1 %v2203_v62, %s4009_s19  ;;  %v403_v62 = vmul.f32 %v4530_v31, %v399_v52  ;;  %v2403_v52 = vmul.f32 %v4609_v2, %v4299_v4  ;;  %v543_v4 = vmul.f32 %v4562_v38, %v4384_v10 }
 0x360   :  { %v4593_v34 = vpop.permute.xlu0 %1105 }
 0x364   :  { %v597_v63 = vpop.permute.xlu0 %596 }
 0x368   :  { %v611_v9 = vpop.permute.xlu0 %610 }
 0x36c   :  { %v550_v16 = vpop.permute.xlu0 %549 }
 0x370   :  { %v748_v3 = vpop.permute.xlu0 %747 }
 0x371   :  { %v2362_v26 = vpop.xlane.xlu1 %2361 }
 0x372   :  { %v2363_v14 = vmul.f32 0.0625, %v2362_v26  ;;  %v553_v26 = vsub.f32 0.0, %v4384_v10 }
 0x374   :  { %v928_v58 = vpop.permute.xlu0 %927  ;;  %v2364_v1 = vadd.f32 1.1920929e-07, %v2363_v14  ;;  %v557_v5 = vmul.f32 %v4571_v57, %v553_v26 }
 0x375   :  { %v4597_v37 = vpop.permute.xlu1 %932 }
 0x376   :  { %3844 = vrsqrt.f32 %v2364_v1  ;;  %v931_v1 = vsub.f32 0.0, %v4396_v23 }
 0x378   :  { %v4599_v41 = vpop.permute.xlu0 %1114 }
 0x379   :  { %v4601_v7 = vpop.permute.xlu1 %1119 }
 0x37c   :  { %v4605_v42 = vpop.permute.xlu0 %969 }
 0x37d   :  { %v396_v50 = vpop.permute.xlu1 %395 }
 0x37e   :  { %v398_v6 = vadd.f32 %v396_v50, %v389_v43  ;;  %v613_v50 = vadd.f32 %v611_v9, %v604_v32  ;;  %v751_v9 = vsub.f32 0.0, %v4390_v17  ;;  %v552_v32 = vadd.f32 %v550_v16, %v543_v4 }
 0x37f   :  { %v921_v16 = vmul.f32 %v4588_v30, %v4396_v23  ;;  %v966_v4 = vmul.f32 %v4417_v40, %v4562_v38 }
 0x380   :  { %414 = vrot.lane.b32.xlu1 %v398_v6, %s4012_s22  ;;  %v4613_v11 = vpop.permute.xlu0 %1155  ;;  %v755_v14 = vmul.f32 %v4583_v54, %v751_v9 }
 0x381   :  { %v410_v18 = vpop.permute.xlu1 %409  ;;  %v930_v9 = vadd.f32 %v928_v58, %v921_v16  ;;  %v1118_v58 = vsub.f32 0.0, %v4404_v28 }
 0x382   :  { %v412_v0 = vadd.f32 %v410_v18, %v403_v62  ;;  %v590_v62 = vmul.f32 %v4543_v12, %v4374_v47 }
 0x384   :  { %418 = vrot.lane.b32.xlu0 %v412_v0, %s4006_s17  ;;  %2413 = vrot.lane.b32.xlu1 %v2411_v49, %s4009_s19  ;;  %v4624_v6 = vpop.permute.xlu0 %1340  ;;  %v599_v29 = vadd.f32 %v597_v63, %v590_v62  ;;  %v741_v63 = vmul.f32 %v4578_v60, %v4390_v17  ;;  %v973_v62 = vsub.f32 0.0, %v4417_v40 }
 0x385   :  { %v564_v43 = vpop.permute.xlu1 %563 }
 0x386   :  { %v566_v49 = vadd.f32 %v564_v43, %v557_v5  ;;  %v935_v43 = vmul.f32 %v4597_v37, %v931_v1  ;;  %v750_v26 = vadd.f32 %v748_v3, %v741_v63  ;;  %v3845_v5 = vpop.eup %3844  ;;  %v974_v17 = vmul.f32 %v973_v62, %v4571_v57 }
 0x388   :  { %2405 = vrot.lane.b32.xlu0 %v2403_v52, %s4009_s19  ;;  %619 = vrot.lane.b32.xlu1 %v613_v50, %s4005_s16  ;;  %v4637_v47 = vpop.permute.xlu0 %1290 }
 0x389   :  { %v762_v0 = vpop.permute.xlu1 %761 }
 0x38a   :  { %v764_v50 = vadd.f32 %v762_v0, %v755_v14 }
 0x38c   :  { %615 = vrot.lane.b32.xlu0 %v599_v29, %s4014_s24  ;;  %572 = vrot.lane.b32.xlu1 %v566_v49, %s4009_s19  ;;  %v1300_v29 = vpop.permute.xlu0 %1299  ;;  %v4652_v49 = vmul.f32 %v3845_v5, %v4248_v48  ;;  %v1344_v5 = vsub.f32 0.0, %v4432_v8 }
 0x38d   :  { %v942_v18 = vpop.permute.xlu1 %941 }
 0x38e   :  { %v944_v52 = vadd.f32 %v942_v18, %v935_v43  ;;  %v972_v18 = vadd.f32 %v4605_v42, %v966_v4  ;;  %v2368_v63 = vmul.f32 %v4652_v49, %v4449_v27  ;;  %v1122_v42 = vmul.f32 %v4601_v7, %v1118_v58 }
 0x38f   :  { %v1108_v27 = vmul.f32 %v4593_v34, %v4404_v28  ;;  %v1345_v16 = vmul.f32 %v1344_v5, %v4597_v37  ;;  %v4706_v5 = vld [vmem:[#allocation5] sm:$0xff] }
 0x390   :  { %770 = vrot.lane.b32.xlu1 %v764_v50, %s4004_s1  ;;  %568 = vrot.lane.b32.xlu0 %v552_v32, %s4011_s21  ;;  %v1540_v23 = vpop.permute.xlu0 %1539  ;;  %v1159_v32 = vsub.f32 0.0, %v4427_v55  ;;  %v2376_v50 = vmul.f32 %v4652_v49, %v4498_v19 }
 0x391   :  { %v1129_v10 = vpop.permute.xlu1 %1128 }
 0x392   :  { %v1160_v48 = vmul.f32 %v1159_v32, %v4583_v54  ;;  %v1131_v62 = vadd.f32 %v1129_v10, %v1122_v42 }
 0x394   :  { %950 = vrot.lane.b32.xlu1 %v944_v52, %s4017_s28  ;;  %766 = vrot.lane.b32.xlu0 %v750_v26, %s4015_s25  ;;  %v1516_v43 = vpop.permute.xlu0 %1515  ;;  %v1152_v26 = vmul.f32 %v4427_v55, %v4578_v60 }
 0x395   :  { %v978_v0 = vpop.permute.xlu1 %977 }
 0x396   :  { %v980_v3 = vadd.f32 %v978_v0, %v974_v17  ;;  %v1158_v52 = vadd.f32 %v4613_v11, %v1152_v26  ;;  %v1117_v0 = vadd.f32 %v4599_v41, %v1108_v27  ;;  %v1337_v11 = vmul.f32 %v4432_v8, %v4588_v30 }
 0x397   :  { %v1293_v41 = vmul.f32 %v4637_v47, %v4452_v35  ;;  %v345_v27 = vmul.f32 %v4706_v5, %v4338_v13 }
 0x398   :  { %986 = vrot.lane.b32.xlu1 %v980_v3, %s4009_s19  ;;  %946 = vrot.lane.b32.xlu0 %v930_v9, %s4016_s26  ;;  %v1724_v55 = vpop.permute.xlu0 %1723  ;;  %v1303_v3 = vsub.f32 0.0, %v4452_v35  ;;  %v1343_v4 = vadd.f32 %v4624_v6, %v1337_v11  ;;  %v1536_v6 = vmul.f32 %v4458_v33, %v4595_v20  ;;  %v1684_v20 = vsub.f32 0.0, %v4485_v56 }
 0x399   :  { %v1164_v14 = vpop.permute.xlu1 %1163 }
 0x39a   :  { %v1166_v1 = vadd.f32 %v1164_v14, %v1160_v48  ;;  %v1542_v26 = vadd.f32 %v1540_v23, %v1536_v6  ;;  %v1505_v23 = vmul.f32 %v4467_v45, %v4533_v53 }
 0x39c   :  { %2378 = vrot.lane.b32.xlu1 %v2376_v50, %s4009_s19  ;;  %982 = vrot.lane.b32.xlu0 %v972_v18, %s4011_s21  ;;  %v1543_v18 = vsub.f32 0.0, %v4458_v33  ;;  %v1689_v32 = vpop.permute.xlu0 %1688  ;;  %v1511_v50 = vsub.f32 0.0, %v4467_v45 }
 0x39d   :  { %v1349_v40 = vpop.permute.xlu1 %1348 }
 0x39e   :  { %v1351_v9 = vadd.f32 %v1349_v40, %v1345_v16  ;;  %v1544_v8 = vmul.f32 %v1543_v18, %v4530_v31  ;;  %v1302_v40 = vadd.f32 %v1300_v29, %v1293_v41  ;;  %v1891_v16 = vsub.f32 0.0, %v4494_v15 }
 0x3a0   :  { %1172 = vrot.lane.b32.xlu1 %v1166_v1, %s4004_s1  ;;  %2370 = vrot.lane.b32.xlu0 %v2368_v63, %s4009_s19  ;;  %v3898_v1 = vld [vmem:[#allocation7] sm:$0xff]  ;;  %v1896_v35 = vpop.permute.xlu0 %1895 }
 0x3a1   :  { %v4673_v19 = vpop.permute.xlu1 %1304  ;;  %v1512_v63 = vmul.f32 %v3898_v1, %v1511_v50  ;;  %v1892_v11 = vmul.f32 %v3898_v1, %v1891_v16  ;;  %v1885_v50 = vmul.f32 %v4494_v15, %v4533_v53  ;;  %v2055_v53 = vmul.f32 %v4513_v25, %v4562_v38 }
 0x3a2   :  { %v1307_v10 = vmul.f32 %v4673_v19, %v1303_v3 }
 0x3a3   :  { %v1518_v31 = vadd.f32 %v1516_v43, %v1512_v63  ;;  %v2026_v63 = vsub.f32 0.0, %v4549_v21 }
 0x3a4   :  { %1137 = vrot.lane.b32.xlu1 %v1131_v62, %s4010_s20  ;;  %1168 = vrot.lane.b32.xlu0 %v1158_v52, %s4015_s25  ;;  %v1719_v52 = vsub.f32 0.0, %v4476_v59  ;;  %v1855_v43 = vpop.permute.xlu0 %1854 }
 0x3a5   :  { %v1314_v17 = vpop.permute.xlu1 %1313 }
 0x3a6   :  { %v1316_v14 = vadd.f32 %v1314_v17, %v1307_v10  ;;  %v1720_v62 = vmul.f32 %v1719_v52, %v4551_v24  ;;  %v1685_v24 = vmul.f32 %v1684_v20, %v4571_v57  ;;  %v1712_v17 = vmul.f32 %v4476_v59, %v4543_v12 }
 0x3a7   :  { %v1677_v10 = vmul.f32 %v4485_v56, %v4562_v38  ;;  %v2062_v56 = vsub.f32 0.0, %v4513_v25  ;;  %v2019_v52 = vmul.f32 %v4549_v21, %v4588_v30  ;;  %v2201_v20 = vsub.f32 0.0, %v4565_v39 }
 0x3a8   :  { %1357 = vrot.lane.b32.xlu1 %v1351_v9, %s4017_s28  ;;  %1133 = vrot.lane.b32.xlu0 %v1117_v0, %s3998_s5  ;;  %v1726_v33 = vadd.f32 %v1724_v55, %v1720_v62  ;;  %v1691_v9 = vadd.f32 %v1689_v32, %v1685_v24  ;;  %v2059_v59 = vpop.permute.xlu0 %2058 }
 0x3a9   :  { %v1548_v28 = vpop.permute.xlu1 %1547  ;;  %v2202_v21 = vmul.f32 %v2201_v20, %v4601_v7  ;;  %v2367_v20 = vmul.f32 %v4652_v49, %v4637_v47 }
 0x3aa   :  { %v1550_v58 = vadd.f32 %v1548_v28, %v1544_v8  ;;  %v1898_v28 = vadd.f32 %v1896_v35, %v1892_v11 }
 0x3ac   :  { %1322 = vrot.lane.b32.xlu1 %v1316_v14, %s4008_s18  ;;  %1353 = vrot.lane.b32.xlu0 %v1343_v4, %s4016_s26  ;;  %v1858_v14 = vsub.f32 0.0, %v4504_v61 }
 0x3ad   :  { %v1716_v48 = vpop.permute.xlu1 %1715  ;;  %v4732_v8 = vpop.permute.xlu0 %786 }
 0x3ae   :  { %v1718_v13 = vadd.f32 %v1716_v48, %v1712_v17  ;;  %v1859_v18 = vmul.f32 %v1858_v14, %v4583_v54  ;;  %v1851_v48 = vmul.f32 %v4504_v61, %v4578_v60  ;;  %v2027_v61 = vmul.f32 %v2026_v63, %v4597_v37 }
 0x3b0   :  { %1556 = vrot.lane.b32.xlu1 %v1550_v58, %s4006_s17  ;;  %1318 = vrot.lane.b32.xlu0 %v1302_v40, %s4013_s23  ;;  %v2063_v40 = vmul.f32 %v2062_v56, %v4571_v57  ;;  %v1857_v6 = vadd.f32 %v1855_v43, %v1851_v48 }
 0x3b1   :  { %v1681_v42 = vpop.permute.xlu1 %1680 }
 0x3b2   :  { %v1683_v4 = vadd.f32 %v1681_v42, %v1677_v10  ;;  %v2061_v42 = vadd.f32 %v2059_v59, %v2055_v53 }
 0x3b4   :  { %1552 = vrot.lane.b32.xlu0 %v1542_v26, %s4012_s22  ;;  %1520 = vrot.lane.b32.xlu1 %v1518_v31, %s4007_s6  ;;  %v2236_v31 = vsub.f32 0.0, %v4556_v36 }
 0x3b5   :  { %v353_v29 = vpop.permute.xlu1 %352 }
 0x3b6   :  { %v355_v55 = vadd.f32 %v353_v29, %v345_v27  ;;  %v2237_v25 = vmul.f32 %v2236_v31, %v4583_v54  ;;  %v2229_v27 = vmul.f32 %v4556_v36, %v4578_v60  ;;  %v2194_v54 = vmul.f32 %v4565_v39, %v4593_v34 }
 0x3b7   :  { %v2409_v60 = vsub.f32 0.0, %v4609_v2  ;;  %v2402_v39 = vmul.f32 %v4609_v2, %v4588_v30 }
 0x3b8   :  { %1507 = vrot.lane.b32.xlu0 %v1505_v23, %s4009_s19  ;;  %1732 = vrot.lane.b32.xlu1 %v1726_v33, %s4005_s16 }
 0x3b9   :  { %v370_v0 = vpop.permute.xlu1 %369 }
 0x3ba   :  { %v4719_v3 = vsel %vm372_vm2, %v355_v55, %v370_v0  ;;  %v2023_v35 = vpop.permute.xlu0 %2022  ;;  %v2410_v55 = vmul.f32 %v2409_v60, %v4597_v37  ;;  %v5264_v37 = vmov 0.0  }
 0x3bb   :  { %v2025_v29 = vadd.f32 %v2023_v35, %v2019_v52 }
 0x3bc   :  { %1728 = vrot.lane.b32.xlu0 %v1718_v13, %s4014_s24  ;;  %1697 = vrot.lane.b32.xlu1 %v1691_v9, %s4009_s19 }
 0x3bd   :  { %v1863_v12 = vpop.permute.xlu1 %1862 }
 0x3be   :  { %v1865_v41 = vadd.f32 %v1863_v12, %v1859_v18  ;;  %v2233_v38 = vpop.permute.xlu0 %2232  ;;  %v783_v18 = vmul.f32 %v4706_v5, %v4356_v22 }
 0x3bf   :  { %v2235_v43 = vadd.f32 %v2233_v38, %v2229_v27 }
 0x3c0   :  { %1693 = vrot.lane.b32.xlu0 %v1683_v4, %s4011_s21  ;;  %1900 = vrot.lane.b32.xlu1 %v1898_v28, %s4007_s6  ;;  %v374_v28 = vmul.f32 0.25, %v4719_v3 }
 0x3c1   :  { %v2067_v32 = vpop.permute.xlu1 %2066 }
 0x3c2   :  { %v2069_v1 = vadd.f32 %v2067_v32, %v2063_v40  ;;  %v2198_v16 = vpop.permute.xlu0 %2197  ;;  %v422_v30 = vpack.c.bf16 %v374_v28, %v374_v28 }
 0x3c3   :  { %v2200_v17 = vadd.f32 %v2198_v16, %v2194_v54  ;;  %v4813_v16 = vpack.c.bf16 %v4242_v44, %v4242_v44 }
 0x3c4   :  { %1887 = vrot.lane.b32.xlu0 %v1885_v50, %s4009_s19  ;;  %1871 = vrot.lane.b32.xlu1 %v1865_v41, %s4004_s1  ;;  %v789_v41 = vadd.f32 %v4732_v8, %v783_v18 }
 0x3c5   :  { %v4739_v58 = vpop.permute.xlu1 %799 }
 0x3c6   :  { %v802_v48 = vsel %vm372_vm2, %v789_v41, %v4739_v58 }
 0x3c8   :  { %2075 = vrot.lane.b32.xlu1 %v2069_v1, %s4009_s19  ;;  %1867 = vrot.lane.b32.xlu0 %v1857_v6, %s4015_s25  ;;  %v804_v6 = vpack.c.bf16 %v802_v48, %v802_v48 }
 0x3c9   :  { %v2031_v57 = vpop.permute.xlu1 %2030 }
 0x3ca   :  { %v2033_v26 = vadd.f32 %v2031_v57, %v2027_v61  ;;  %v809_v58 = vsel %vm336_vm1, %v804_v6, 0  ;;  %v2374_v57 = vsub.f32 0.0, %v4652_v49 }
 0x3cc   :  { %2039 = vrot.lane.b32.xlu1 %v2033_v26, %s4017_s28  ;;  %2071 = vrot.lane.b32.xlu0 %v2061_v42, %s4011_s21  ;;  %v2375_v26 = vmul.f32 %v2374_v57, %v4673_v19  ;;  %v1884_v57 = vmul.f32 %v4706_v5, %v4494_v15 }
 0x3cd   :  { %v2241_v62 = vpop.permute.xlu1 %2240 }
 0x3ce   :  { %v2243_v33 = vadd.f32 %v2241_v62, %v2237_v25 }
 0x3d0   :  { %2249 = vrot.lane.b32.xlu1 %v2243_v33, %s4004_s1  ;;  %2035 = vrot.lane.b32.xlu0 %v2025_v29, %s4016_s26 }
 0x3d1   :  { %v2206_v23 = vpop.permute.xlu1 %2205 }
 0x3d2   :  { %v2208_v24 = vadd.f32 %v2206_v23, %v2202_v21 }
 0x3d4   :  { %2214 = vrot.lane.b32.xlu1 %v2208_v24, %s4010_s20  ;;  %2245 = vrot.lane.b32.xlu0 %v2235_v43, %s4015_s25  ;;  %v4803_v43 = vpack.c.bf16 %v4246_v46, %v4246_v46 }
 0x3d8   :  { %2210 = vrot.lane.b32.xlu0 %v2200_v17, %s3998_s5 }
 0x3f2   :  { %v415_v36 = vpop.permute.xlu1 %414 }
 0x3f6   :  { %v2414_v7 = vpop.permute.xlu1 %2413  ;;  %v419_v0 = vpop.permute.xlu0 %418 }
 0x3f7   :  { %v2416_v9 = vadd.f32 %v2414_v7, %v2410_v55  ;;  %v421_v13 = vsel %vm372_vm2, %v415_v36, %v419_v0 }
 0x3f8   :  { %v423_v11 = vpack.c.bf16 %v421_v13, %v421_v13 }
 0x3f9   :  { %2422 = vrot.lane.b32.xlu1 %v2416_v9, %s4017_s28 }
 0x3fa   :  { %v620_v34 = vpop.permute.xlu1 %619  ;;  %v2406_v10 = vpop.permute.xlu0 %2405  ;;  %v428_v59 = vsel %vm336_vm1, %v423_v11, 0 }
 0x3fb   :  { %v2408_v12 = vadd.f32 %v2406_v10, %v2402_v39  ;;  %3452 = vmatpush3.bf16.xpose.msra.mxu1 %v428_v59 }
 0x3fc   :  { %3457 = vmatprep.subr.bf16.mxu1 %v5264_v37 }
 0x3fd   :  { %2418 = vrot.lane.b32.xlu0 %v2408_v12, %s4016_s26 }
 0x3fe   :  { %v573_v4 = vpop.permute.xlu1 %572  ;;  %v616_v14 = vpop.permute.xlu0 %615 }
 0x3ff   :  { %v622_v32 = vsel %vm372_vm2, %v616_v14, %v620_v34 }
 0x400   :  { %v624_v2 = vpack.c.bf16 %v622_v32, %v622_v32 }
 0x402   :  { %v771_v56 = vpop.permute.xlu1 %770  ;;  %3454 = vmatmul.mubr.msk.bf16.vlgmr.msra.gmra.mrb[4].mxu1 %vm336_vm1, %v422_v30  ;;  %v569_v50 = vpop.permute.xlu0 %568  ;;  %v629_v3 = vsel %vm336_vm1, %v624_v2, 0  ;;  %v1504_v2 = vmul.f32 %v4706_v5, %v4467_v45 }
 0x403   :  { %v575_v40 = vsel %vm372_vm2, %v569_v50, %v573_v4  ;;  %3464 = vmatpush3.bf16.xpose.msra.mxu0 %v629_v3  ;;  %3459 = vmatprep.mubr.msk.bf16.mxu1 %vm4003_vm0, %v5264_v37 }
 0x404   :  { %v576_v22 = vmul.f32 0.25, %v575_v40  ;;  %3475 = vmatprep.subr.bf16.mxu0 %v5264_v37 }
 0x406   :  { %v951_v8 = vpop.permute.xlu1 %950  ;;  %v767_v1 = vpop.permute.xlu0 %766  ;;  %v623_v63 = vpack.c.bf16 %v576_v22, %v576_v22 }
 0x407   :  { %v773_v35 = vsel %vm372_vm2, %v767_v1, %v771_v56 }
 0x408   :  { %v774_v42 = vmul.f32 0.25, %v773_v35 }
 0x40a   :  { %v987_v53 = vpop.permute.xlu1 %986  ;;  %3466 = vmatmul.mubr.msk.bf16.vlgmr.msra.gmra.mrb[4].mxu0 %vm336_vm1, %v623_v63  ;;  %v947_v61 = vpop.permute.xlu0 %946  ;;  %v803_v62 = vpack.c.bf16 %v774_v42, %v774_v42 }
 0x40b   :  { %3476 = vmatpush3.bf16.xpose.msra.mxu0 %v809_v58  ;;  %3477 = vmatprep.mubr.msk.bf16.mxu0 %vm4003_vm0, %v5264_v37  ;;  %v953_v33 = vsel %vm372_vm2, %v947_v61, %v951_v8 }
 0x40c   :  { %3487 = vmatprep.subr.bf16.mxu0 %v5264_v37  ;;  %v954_v24 = vmul.f32 0.25, %v953_v33 }
 0x40e   :  { %v2379_v31 = vpop.permute.xlu1 %2378  ;;  %v983_v52 = vpop.permute.xlu0 %982  ;;  %v990_v54 = vpack.c.bf16 %v954_v24, %v954_v24 }
 0x40f   :  { %v2381_v25 = vadd.f32 %v2379_v31, %v2375_v26  ;;  %v989_v38 = vsel %vm372_vm2, %v983_v52, %v987_v53 }
 0x410   :  { %v991_v29 = vpack.c.bf16 %v989_v38, %v989_v38 }
 0x411   :  { %2387 = vrot.lane.b32.xlu1 %v2381_v25, %s4008_s18 }
 0x412   :  { %v1173_v27 = vpop.permute.xlu1 %1172  ;;  %3478 = vmatmul.mubr.msk.bf16.vlgmr.msra.gmra.mrb[8].mxu0 %vm336_vm1, %v803_v62  ;;  %v2371_v21 = vpop.permute.xlu0 %2370  ;;  %v996_v19 = vsel %vm336_vm1, %v991_v29, 0 }
 0x413   :  { %v2373_v23 = vadd.f32 %v2371_v21, %v2367_v20  ;;  %3488 = vmatpush3.bf16.xpose.msra.mxu0 %v996_v19  ;;  %3489 = vmatprep.mubr.msk.bf16.mxu0 %vm4003_vm0, %v5264_v37 }
 0x414   :  { %3499 = vmatprep.subr.bf16.mxu0 %v5264_v37 }
 0x415   :  { %680 = vrot.lane.b32.xlu1 %v4803_v43, %s4013_s23  ;;  %2383 = vrot.lane.b32.xlu0 %v2373_v23, %s4013_s23 }
 0x416   :  { %v1138_v47 = vpop.permute.xlu1 %1137  ;;  %v1169_v49 = vpop.permute.xlu0 %1168 }
 0x417   :  { %v1175_v46 = vsel %vm372_vm2, %v1169_v49, %v1173_v27 }
 0x418   :  { %v1177_v17 = vpack.c.bf16 %v1175_v46, %v1175_v46 }
 0x419   :  { %1419 = vrot.lane.b32.xlu1 %v4813_v16, %s4011_s21  ;;  %481 = vrot.lane.b32.xlu0 %v4803_v43, %s3998_s5 }
 0x41a   :  { %v1358_v36 = vpop.permute.xlu1 %1357  ;;  %3490 = vmatmul.mubr.msk.bf16.vlgmr.msra.gmra.mrb[12].mxu0 %vm336_vm1, %v990_v54  ;;  %v1134_v60 = vpop.permute.xlu0 %1133  ;;  %v1182_v55 = vsel %vm336_vm1, %v1177_v17, 0 }
 0x41b   :  { %v1140_v7 = vsel %vm372_vm2, %v1134_v60, %v1138_v47  ;;  %3500 = vmatpush3.bf16.xpose.msra.mxu0 %v1182_v55  ;;  %3501 = vmatprep.mubr.msk.bf16.mxu0 %vm4003_vm0, %v5264_v37 }
 0x41c   :  { %v1141_v44 = vmul.f32 0.25, %v1140_v7  ;;  %3511 = vmatprep.subr.bf16.mxu0 %v5264_v37 }
 0x41d   :  { %860 = vrot.lane.b32.xlu0 %v4803_v43, %s4012_s22 }
 0x41e   :  { %v1323_v0 = vpop.permute.xlu1 %1322  ;;  %v1354_v9 = vpop.permute.xlu0 %1353  ;;  %v1176_v11 = vpack.c.bf16 %v1141_v44, %v1141_v44 }
 0x41f   :  { %v1360_v13 = vsel %vm372_vm2, %v1354_v9, %v1358_v36 }
 0x420   :  { %v1362_v39 = vpack.c.bf16 %v1360_v13, %v1360_v13 }
 0x422   :  { %v1557_v34 = vpop.permute.xlu1 %1556  ;;  %3502 = vmatmul.mubr.msk.bf16.vlgmr.msra.gmra.mrb[16].mxu0 %vm336_vm1, %v1176_v11  ;;  %v1319_v10 = vpop.permute.xlu0 %1318  ;;  %v1367_v59 = vsel %vm336_vm1, %v1362_v39, 0 }
 0x423   :  { %v1325_v12 = vsel %vm372_vm2, %v1319_v10, %v1323_v0  ;;  %3512 = vmatpush3.bf16.xpose.msra.mxu0 %v1367_v59  ;;  %3513 = vmatprep.mubr.msk.bf16.mxu0 %vm4003_vm0, %v5264_v37 }
 0x424   :  { %v1326_v28 = vmul.f32 0.25, %v1325_v12  ;;  %3523 = vmatprep.subr.bf16.mxu0 %v5264_v37 }
 0x426   :  { %v1521_v4 = vpop.permute.xlu1 %1520  ;;  %v1553_v14 = vpop.permute.xlu0 %1552  ;;  %v1361_v32 = vpack.c.bf16 %v1326_v28, %v1326_v28 }
 0x427   :  { %v1559_v18 = vsel %vm372_vm2, %v1553_v14, %v1557_v34 }
 0x428   :  { %v1561_v30 = vpack.c.bf16 %v1559_v18, %v1559_v18 }
 0x42a   :  { %v1733_v41 = vpop.permute.xlu1 %1732  ;;  %3514 = vmatmul.mubr.msk.bf16.vlgmr.msra.gmra.mrb[20].mxu0 %vm336_vm1, %v1361_v32  ;;  %v1508_v56 = vpop.permute.xlu0 %1507  ;;  %v1566_v50 = vsel %vm336_vm1, %v1561_v30, 0 }
 0x42b   :  { %v1510_v3 = vadd.f32 %v1508_v56, %v1504_v2  ;;  %3524 = vmatpush3.bf16.xpose.msra.mxu0 %v1566_v50  ;;  %3525 = vmatprep.mubr.msk.bf16.mxu0 %vm4003_vm0, %v5264_v37  ;;  %v328_v56 = vlaneseq }
 0x42c   :  { %3535 = vmatprep.subr.bf16.mxu0 %v5264_v37 }
 0x42d   :  { %v1523_v48 = vsel %vm372_vm2, %v1510_v3, %v1521_v4 }
 0x42e   :  { %v1524_v40 = vmul.f32 0.25, %v1523_v48  ;;  %v1698_v22 = vpop.permute.xlu1 %1697  ;;  %v1729_v6 = vpop.permute.xlu0 %1728 }
 0x42f   :  { %v1735_v45 = vsel %vm372_vm2, %v1729_v6, %v1733_v41  ;;  %v331_v6 = vand.u32 127, %v328_v56 }
 0x430   :  { %v1560_v8 = vpack.c.bf16 %v1524_v40, %v1524_v40  ;;  %v1737_v1 = vpack.c.bf16 %v1735_v45, %v1735_v45 }
 0x432   :  { %v1901_v63 = vpop.permute.xlu1 %1900  ;;  %3526 = vmatmul.mubr.msk.bf16.vlgmr.msra.gmra.mrb[24].mxu0 %vm336_vm1, %v1560_v8  ;;  %v1694_v35 = vpop.permute.xlu0 %1693  ;;  %v1742_v53 = vsel %vm336_vm1, %v1737_v1, 0 }
 0x433   :  { %v1700_v61 = vsel %vm372_vm2, %v1694_v35, %v1698_v22  ;;  %3536 = vmatpush3.bf16.xpose.msra.mxu0 %v1742_v53  ;;  %3537 = vmatprep.mubr.msk.bf16.mxu0 %vm4003_vm0, %v5264_v37  ;;  %v329_v22 = vshrl.u32 %v328_v56, 7 }
 0x434   :  { %v1701_v58 = vmul.f32 0.25, %v1700_v61  ;;  %3547 = vmatprep.subr.bf16.mxu0 %v5264_v37 }
 0x435   :  { %vm332_vm4 = vcmp.ge.s32.totalorder %v329_v22, %v331_v6 }
 0x436   :  { %v1872_v42 = vpop.permute.xlu1 %1871  ;;  %v1888_v26 = vpop.permute.xlu0 %1887  ;;  %v1736_v52 = vpack.c.bf16 %v1701_v58, %v1701_v58  ;;  %v4887_v53 = vsel %vm332_vm4, 1.0, %v5264_v37 }
 0x437   :  { %v1890_v31 = vadd.f32 %v1888_v26, %v1884_v57 }
 0x439   :  { %v1903_v25 = vsel %vm372_vm2, %v1890_v31, %v1901_v63 }
 0x43a   :  { %v1905_v38 = vpack.c.bf16 %v1903_v25, %v1903_v25  ;;  %v2076_v62 = vpop.permute.xlu1 %2075  ;;  %3538 = vmatmul.mubr.msk.bf16.vlgmr.msra.gmra.mrb[28].mxu0 %vm336_vm1, %v1736_v52  ;;  %v1868_v29 = vpop.permute.xlu0 %1867 }
 0x43b   :  { %v1874_v33 = vsel %vm372_vm2, %v1868_v29, %v1872_v42  ;;  %3549 = vmatprep.mubr.msk.bf16.mxu0 %vm4003_vm0, %v5264_v37 }
 0x43c   :  { %v1910_v20 = vsel %vm336_vm1, %v1905_v38, 0  ;;  %v1875_v15 = vmul.f32 0.25, %v1874_v33 }
 0x43d   :  { %3548 = vmatpush3.bf16.xpose.msra.mxu0 %v1910_v20 }
 0x43e   :  { %v2040_v5 = vpop.permute.xlu1 %2039  ;;  %v2072_v27 = vpop.permute.xlu0 %2071  ;;  %3559 = vmatprep.subr.bf16.mxu0 %v5264_v37  ;;  %v1904_v23 = vpack.c.bf16 %v1875_v15, %v1875_v15 }
 0x43f   :  { %v2078_v21 = vsel %vm372_vm2, %v2072_v27, %v2076_v62 }
 0x440   :  { %v2080_v19 = vpack.c.bf16 %v2078_v21, %v2078_v21 }
 0x442   :  { %v2036_v24 = vpop.permute.xlu0 %2035  ;;  %v2250_v49 = vpop.permute.xlu1 %2249  ;;  %v2085_v46 = vsel %vm336_vm1, %v2080_v19, 0 }
 0x443   :  { %v2042_v47 = vsel %vm372_vm2, %v2036_v24, %v2040_v5 }
 0x444   :  { %3550 = vmatmul.mubr.msk.bf16.vlgmr.msra.gmra.mrb[32].mxu0 %vm336_vm1, %v1904_v23  ;;  %v2043_v54 = vmul.f32 0.25, %v2042_v47 }
 0x445   :  { %3560 = vmatpush3.bf16.xpose.msra.mxu0 %v2085_v46  ;;  %3561 = vmatprep.mubr.msk.bf16.mxu0 %vm4003_vm0, %v5264_v37 }
 0x446   :  { %v2246_v17 = vpop.permute.xlu0 %2245  ;;  %3571 = vmatprep.subr.bf16.mxu0 %v5264_v37  ;;  %v2079_v55 = vpack.c.bf16 %v2043_v54, %v2043_v54  ;;  %v2215_v7 = vpop.permute.xlu1 %2214 }
 0x447   :  { %v2252_v36 = vsel %vm372_vm2, %v2246_v17, %v2250_v49 }
 0x448   :  { %v2254_v60 = vpack.c.bf16 %v2252_v36, %v2252_v36 }
 0x44a   :  { %v2211_v44 = vpop.permute.xlu0 %2210  ;;  %v2259_v9 = vsel %vm336_vm1, %v2254_v60, 0 }
 0x44b   :  { %v2217_v0 = vsel %vm372_vm2, %v2211_v44, %v2215_v7 }
 0x44c   :  { %3562 = vmatmul.mubr.msk.bf16.vlgmr.msra.gmra.mrb[36].mxu0 %vm336_vm1, %v2079_v55  ;;  %v2218_v13 = vmul.f32 0.25, %v2217_v0 }
 0x44d   :  { %3572 = vmatpush3.bf16.xpose.msra.mxu0 %v2259_v9  ;;  %3573 = vmatprep.mubr.msk.bf16.mxu0 %vm4003_vm0, %v5264_v37 }
 0x44e   :  { %3583 = vmatprep.subr.bf16.mxu0 %v5264_v37  ;;  %v2253_v11 = vpack.c.bf16 %v2218_v13, %v2218_v13 }
 0x454   :  { %3574 = vmatmul.mubr.msk.bf16.vlgmr.msra.gmra.mrb[40].mxu0 %vm336_vm1, %v2253_v11 }
 0x455   :  { %3585 = vmatprep.mubr.msk.bf16.mxu0 %vm4003_vm0, %v5264_v37 }
 0x46b   :  { %v2423_v39 = vpop.permute.xlu1 %2422 }
 0x46f   :  { %v2419_v34 = vpop.permute.xlu0 %2418 }
 0x470   :  { %v2425_v10 = vsel %vm372_vm2, %v2419_v34, %v2423_v39 }
 0x471   :  { %v2427_v59 = vpack.c.bf16 %v2425_v10, %v2425_v10 }
 0x473   :  { %v2432_v12 = vsel %vm336_vm1, %v2427_v59, 0  ;;  %v4908_v59 = vpack.c.bf16 %v4254_v51, %v4254_v51 }
 0x474   :  { %3584 = vmatpush3.bf16.xpose.msra.mxu0 %v2432_v12 }
 0x475   :  { %3595 = vmatprep.subr.bf16.mxu0 %v5264_v37 }
 0x483   :  { %v2388_v28 = vpop.permute.xlu1 %2387 }
 0x487   :  { %v2384_v4 = vpop.permute.xlu0 %2383 }
 0x488   :  { %v2390_v14 = vsel %vm372_vm2, %v2384_v4, %v2388_v28 }
 0x489   :  { %v2391_v18 = vmul.f32 0.25, %v2390_v14 }
 0x48b   :  { %v2426_v32 = vpack.c.bf16 %v2391_v18, %v2391_v18  ;;  %v482_v30 = vpop.permute.xlu0 %481 }
 0x48c   :  { %v488_v2 = vsel %vm486_vm3, %v482_v30, 0 }
 0x48d   :  { %3458 = vmatpush3.bf16.msra.mxu1 %v488_v2  ;;  %3586 = vmatmul.mubr.msk.bf16.vlgmr.msra.gmra.mrb[44].mxu0 %vm336_vm1, %v2426_v32 }
 0x48e   :  { %3469 = vmatprep.subr.bf16.mxu1 %v5264_v37  ;;  %3607 = vmatprep.mubr.msk.bf16.mxu0 %vm4003_vm0, %v5264_v37 }
 0x4d5   :  { %v464_v41 = vpop.f32.mrb[4].mxu1 }
 0x4d6   :  { %v470_v50 = vmul.f32 1.442695, %v464_v41  ;;  %v3455_v3 = vpop.f32.mrb[5].mxu1 }
 0x4d7   :  { %v467_v48 = vpop.f32.mrb[6].mxu1 }
 0x4d8   :  { %3846 = vpow2.f32 %v470_v50  ;;  %v3456_v40 = vpop.f32.mrb[7].mxu1 }
 0x4dd   :  { %v665_v45 = vpop.f32.mrb[4].mxu0 }
 0x4de   :  { %v671_v8 = vmul.f32 1.442695, %v665_v45  ;;  %v3467_v1 = vpop.f32.mrb[5].mxu0 }
 0x4df   :  { %v668_v63 = vpop.f32.mrb[6].mxu0 }
 0x4e0   :  { %3848 = vpow2.f32 %v671_v8  ;;  %v3468_v35 = vpop.f32.mrb[7].mxu0 }
 0x4e2   :  { %v3847_v61 = vpop.eup %3846 }
 0x4e3   :  { %v4890_v58 = vmul.f32 %v3847_v61, %v4887_v53 }
 0x4e5   :  { %v845_v57 = vpop.f32.mrb[8].mxu0  ;;  %v473_v42 = vsel %vm372_vm2, %v4890_v58, 0.0 }
 0x4e6   :  { %v3479_v26 = vpop.f32.mrb[9].mxu0  ;;  %474 = vadd.xlane.f32.xlu0 %v473_v42  ;;  %v851_v36 = vmul.f32 1.442695, %v845_v57 }
 0x4e7   :  { %v848_v31 = vpop.f32.mrb[10].mxu0 }
 0x4e8   :  { %v3480_v52 = vpop.f32.mrb[11].mxu0 }
 0x4ea   :  { %v3849_v25 = vpop.eup %3848 }
 0x4eb   :  { %v4895_v38 = vmul.f32 %v3849_v25, %v4887_v53 }
 0x4ed   :  { %v1032_v62 = vpop.f32.mrb[12].mxu0  ;;  %v674_v29 = vsel %vm372_vm2, %v4895_v38, 0.0 }
 0x4ee   :  { %675 = vadd.xlane.f32.xlu1 %v674_v29  ;;  %v3491_v33 = vpop.f32.mrb[13].mxu0  ;;  %v1038_v9 = vmul.f32 1.442695, %v1032_v62 }
 0x4ef   :  { %v1035_v20 = vpop.f32.mrb[14].mxu0 }
 0x4f0   :  { %v3492_v15 = vpop.f32.mrb[15].mxu0 }
 0x4f5   :  { %v1218_v5 = vpop.f32.mrb[16].mxu0 }
 0x4f6   :  { %v1224_v27 = vmul.f32 1.442695, %v1218_v5  ;;  %v3503_v21 = vpop.f32.mrb[17].mxu0 }
 0x4f7   :  { %v1221_v19 = vpop.f32.mrb[18].mxu0 }
 0x4f8   :  { %3850 = vpow2.f32 %v1224_v27  ;;  %v3504_v23 = vpop.f32.mrb[19].mxu0 }
 0x4f9   :  { %3852 = vpow2.f32 %v851_v36 }
 0x4fa   :  { %3854 = vpow2.f32 %v1038_v9 }
 0x4fc   :  { %1047 = vrot.lane.b32.xlu0 %v4803_v43, %s4014_s24 }
 0x4fd   :  { %v1403_v24 = vpop.f32.mrb[20].mxu0 }
 0x4fe   :  { %v3515_v47 = vpop.f32.mrb[21].mxu0  ;;  %v1409_v6 = vmul.f32 1.442695, %v1403_v24 }
 0x4ff   :  { %v1406_v49 = vpop.f32.mrb[22].mxu0 }
 0x500   :  { %v3516_v46 = vpop.f32.mrb[23].mxu0 }
 0x502   :  { %v3851_v54 = vpop.eup %3850 }
 0x503   :  { %v4902_v17 = vmul.f32 %v3851_v54, %v4887_v53  ;;  %v3853_v10 = vpop.eup %3852 }
 0x504   :  { %v4911_v12 = vmul.f32 %v3853_v10, %v4887_v53  ;;  %v3855_v28 = vpop.eup %3854 }
 0x505   :  { %v1602_v60 = vpop.f32.mrb[24].mxu0  ;;  %v1227_v55 = vsel %vm372_vm2, %v4902_v17, 0.0  ;;  %v4918_v2 = vmul.f32 %v3855_v28, %v4887_v53 }
 0x506   :  { %1228 = vadd.xlane.f32.xlu1 %v1227_v55  ;;  %v3527_v7 = vpop.f32.mrb[25].mxu0  ;;  %v1608_v43 = vmul.f32 1.442695, %v1602_v60  ;;  %v854_v30 = vsel %vm372_vm2, %v4911_v12, 0.0 }
 0x507   :  { %v1605_v44 = vpop.f32.mrb[26].mxu0  ;;  %v1041_v51 = vsel %vm372_vm2, %v4918_v2, 0.0  ;;  %v861_v7 = vpop.permute.xlu0 %860 }
 0x508   :  { %v3528_v0 = vpop.f32.mrb[27].mxu0  ;;  %3856 = vpow2.f32 %v1608_v43  ;;  %v5265_v44 = vld [vmem:[#allocation12_spill] sm:$0xff]  ;;  %v681_v43 = vpop.permute.xlu1 %680 }
 0x509   :  { %3858 = vpow2.f32 %v1409_v6  ;;  %v4961_v0 = vpack.c.bf16 %v5265_v44, %v5265_v44  ;;  %v686_v28 = vsel %vm486_vm3, %v681_v43, 0 }
 0x50b   :  { %v2315_v43 = vsel %vm486_vm3, %v4961_v0, 0 }
 0x50d   :  { %v1778_v13 = vpop.f32.mrb[28].mxu0 }
 0x50e   :  { %v3539_v11 = vpop.f32.mrb[29].mxu0  ;;  %v1784_v1 = vmul.f32 1.442695, %v1778_v13 }
 0x50f   :  { %v1781_v39 = vpop.f32.mrb[30].mxu0  ;;  %v1420_v11 = vpop.permute.xlu1 %1419 }
 0x510   :  { %v3540_v34 = vpop.f32.mrb[31].mxu0  ;;  %3860 = vpow2.f32 %v1784_v1 }
 0x512   :  { %v3857_v41 = vpop.eup %3856 }
 0x513   :  { %v4923_v56 = vmul.f32 %v3857_v41, %v4887_v53  ;;  %v3859_v42 = vpop.eup %3858 }
 0x514   :  { %v4928_v26 = vmul.f32 %v3859_v42, %v4887_v53 }
 0x515   :  { %v1611_v22 = vsel %vm372_vm2, %v4923_v56, 0.0 }
 0x516   :  { %v1412_v52 = vsel %vm372_vm2, %v4928_v26, 0.0 }
 0x517   :  { %1619 = vrot.lane.b32.xlu1 %v4908_v59, %s3998_s5  ;;  %v1946_v4 = vpop.f32.mrb[32].mxu0 }
 0x518   :  { %v3551_v14 = vpop.f32.mrb[33].mxu0  ;;  %v1952_v61 = vmul.f32 1.442695, %v1946_v4 }
 0x519   :  { %v1949_v18 = vpop.f32.mrb[34].mxu0 }
 0x51a   :  { %v3552_v32 = vpop.f32.mrb[35].mxu0  ;;  %3862 = vpow2.f32 %v1952_v61  ;;  %v3861_v31 = vpop.eup %3860 }
 0x51b   :  { %855 = vadd.xlane.f32.xlu0 %v854_v30  ;;  %v4935_v25 = vmul.f32 %v3861_v31, %v4887_v53 }
 0x51d   :  { %v1787_v29 = vsel %vm372_vm2, %v4935_v25, 0.0 }
 0x51f   :  { %1042 = vadd.xlane.f32.xlu0 %v1041_v51  ;;  %v2121_v50 = vpop.f32.mrb[36].mxu0 }
 0x520   :  { %v3563_v3 = vpop.f32.mrb[37].mxu0  ;;  %v2127_v15 = vmul.f32 1.442695, %v2121_v50 }
 0x521   :  { %v2124_v48 = vpop.f32.mrb[38].mxu0 }
 0x522   :  { %v3564_v40 = vpop.f32.mrb[39].mxu0 }
 0x523   :  { %1612 = vadd.xlane.f32.xlu0 %v1611_v22 }
 0x524   :  { %v3863_v62 = vpop.eup %3862 }
 0x525   :  { %v4940_v33 = vmul.f32 %v3863_v62, %v4887_v53 }
 0x527   :  { %v2295_v45 = vpop.f32.mrb[40].mxu0  ;;  %v1955_v5 = vsel %vm372_vm2, %v4940_v33, 0.0 }
 0x528   :  { %v3575_v8 = vpop.f32.mrb[41].mxu0  ;;  %v2301_v57 = vmul.f32 1.442695, %v2295_v45 }
 0x529   :  { %v2298_v63 = vpop.f32.mrb[42].mxu0 }
 0x52a   :  { %v3576_v35 = vpop.f32.mrb[43].mxu0  ;;  %3864 = vpow2.f32 %v2301_v57 }
 0x52b   :  { %3866 = vpow2.f32 %v2127_v15 }
 0x534   :  { %v3865_v20 = vpop.eup %3864 }
 0x535   :  { %v4945_v27 = vmul.f32 %v3865_v20, %v4887_v53  ;;  %v3867_v19 = vpop.eup %3866 }
 0x536   :  { %v4950_v23 = vmul.f32 %v3867_v19, %v4887_v53 }
 0x537   :  { %v2304_v21 = vsel %vm372_vm2, %v4945_v27, 0.0 }
 0x538   :  { %v2130_v24 = vsel %vm372_vm2, %v4950_v23, 0.0 }
 0x539   :  { %1793 = vrot.lane.b32.xlu0 %v4908_v59, %s4013_s23 }
 0x53b   :  { %1413 = vadd.xlane.f32.xlu1 %v1412_v52 }
 0x53f   :  { %1788 = vadd.xlane.f32.xlu1 %v1787_v29 }
 0x543   :  { %1956 = vadd.xlane.f32.xlu1 %v1955_v5 }
 0x547   :  { %2305 = vadd.xlane.f32.xlu1 %v2304_v21 }
 0x558   :  { %2131 = vadd.xlane.f32.xlu0 %v2130_v24 }
 0x560   :  { %v2468_v47 = vpop.f32.mrb[44].mxu0 }
 0x561   :  { %v2474_v49 = vmul.f32 1.442695, %v2468_v47  ;;  %v3587_v46 = vpop.f32.mrb[45].mxu0 }
 0x562   :  { %v2471_v54 = vpop.f32.mrb[46].mxu0 }
 0x563   :  { %3868 = vpow2.f32 %v2474_v49  ;;  %v3588_v36 = vpop.f32.mrb[47].mxu0 }
 0x56d   :  { %v3869_v60 = vpop.eup %3868 }
 0x56e   :  { %2136 = vrot.lane.b32.xlu0 %v4908_v59, %s4014_s24  ;;  %v4957_v55 = vmul.f32 %v3869_v60, %v4887_v53 }
 0x570   :  { %v2477_v9 = vsel %vm372_vm2, %v4957_v55, 0.0 }
 0x571   :  { %2478 = vadd.xlane.f32.xlu1 %v2477_v9 }
 0x572   :  { %2484 = vrot.lane.b32.xlu0 %v4961_v0, %s4011_s21 }
 0x573   :  { %v475_v13 = vpop.xlane.xlu0 %474 }
 0x574   :  { %3870 = vrcp.f32 %v475_v13 }
 0x57b   :  { %v676_v39 = vpop.xlane.xlu1 %675 }
 0x57c   :  { %3872 = vrcp.f32 %v676_v39 }
 0x57e   :  { %v3871_v53 = vpop.eup %3870 }
 0x57f   :  { %v477_v34 = vmul.f32 %v3871_v53, %v4890_v58  ;;  %v866_v58 = vsel %vm486_vm3, %v861_v7, 0 }
 0x581   :  { %v478_v10 = vpack.c.bf16 %v477_v34, %v477_v34 }
 0x582   :  { %1961 = vrot.lane.b32.xlu1 %v4908_v59, %s4012_s22  ;;  %v1048_v59 = vpop.permute.xlu0 %1047 }
 0x583   :  { %3460 = vmatmul.mubr.msk.bf16.vlgmr.msra.gmra.mrb[8].mxu1 %vm372_vm2, %v478_v10  ;;  %v1053_v48 = vsel %vm486_vm3, %v1048_v59, 0  ;;  %v5266_v10 = vmov 0  }
 0x584   :  { %3470 = vmatpush3.bf16.msra.mxu1 %v686_v28  ;;  %3471 = vmatprep.mubr.msk.bf16.mxu1 %vm4003_vm0, %v5264_v37 }
 0x585   :  { %3481 = vmatprep.subr.bf16.mxu1 %v5264_v37 }
 0x586   :  { %v3873_v4 = vpop.eup %3872 }
 0x587   :  { %v678_v14 = vmul.f32 %v3873_v4, %v4895_v38 }
 0x589   :  { %v679_v18 = vpack.c.bf16 %v678_v14, %v678_v14 }
 0x58b   :  { %3472 = vmatmul.mubr.msk.bf16.vlgmr.msra.gmra.mrb[12].mxu1 %vm372_vm2, %v679_v18 }
 0x58c   :  { %3482 = vmatpush3.bf16.msra.mxu1 %v866_v58  ;;  %3483 = vmatprep.mubr.msk.bf16.mxu1 %vm4003_vm0, %v5264_v37 }
 0x58d   :  { %3493 = vmatprep.subr.bf16.mxu1 %v5264_v37 }
 0x593   :  { %v1229_v41 = vpop.xlane.xlu1 %1228 }
 0x597   :  { %v1620_v8 = vpop.permute.xlu1 %1619 }
 0x598   :  { %v1625_v31 = vsel %vm486_vm3, %v1620_v8, 0 }
 0x5a8   :  { %v856_v32 = vpop.xlane.xlu0 %855 }
 0x5a9   :  { %3874 = vrcp.f32 %v856_v32 }
 0x5ac   :  { %v1043_v30 = vpop.xlane.xlu0 %1042 }
 0x5ad   :  { %3876 = vrcp.f32 %v1043_v30 }
 0x5ae   :  { %3878 = vrcp.f32 %v1229_v41 }
 0x5b3   :  { %v3875_v51 = vpop.eup %3874 }
 0x5b4   :  { %v858_v38 = vmul.f32 %v3875_v51, %v4911_v12  ;;  %v1238_v12 = vsel %vm486_vm3, %v4813_v16, 0  ;;  %v1613_v16 = vpop.xlane.xlu0 %1612 }
 0x5b6   :  { %v859_v50 = vpack.c.bf16 %v858_v38, %v858_v38 }
 0x5b7   :  { %v3877_v3 = vpop.eup %3876 }
 0x5b8   :  { %3484 = vmatmul.mubr.msk.bf16.vlgmr.msra.gmra.mrb[16].mxu1 %vm372_vm2, %v859_v50  ;;  %v1045_v40 = vmul.f32 %v3877_v3, %v4918_v2  ;;  %v3879_v6 = vpop.eup %3878  ;;  %v1425_v2 = vsel %vm486_vm3, %v1420_v11, 0  ;;  %v1794_v62 = vpop.permute.xlu0 %1793 }
 0x5b9   :  { %3494 = vmatpush3.bf16.msra.mxu1 %v1053_v48  ;;  %3495 = vmatprep.mubr.msk.bf16.mxu1 %vm4003_vm0, %v5264_v37  ;;  %v1231_v45 = vmul.f32 %v3879_v6, %v4902_v17 }
 0x5ba   :  { %3505 = vmatprep.subr.bf16.mxu1 %v5264_v37  ;;  %v1046_v22 = vpack.c.bf16 %v1045_v40, %v1045_v40 }
 0x5bb   :  { %v1232_v1 = vpack.c.bf16 %v1231_v45, %v1231_v45 }
 0x5c0   :  { %3496 = vmatmul.mubr.msk.bf16.vlgmr.msra.gmra.mrb[20].mxu1 %vm372_vm2, %v1046_v22 }
 0x5c1   :  { %3506 = vmatpush3.bf16.msra.mxu1 %v1238_v12  ;;  %3507 = vmatprep.mubr.msk.bf16.mxu1 %vm4003_vm0, %v5264_v37 }
 0x5c2   :  { %3517 = vmatprep.subr.bf16.mxu1 %v5264_v37 }
 0x5c8   :  { %v1414_v63 = vpop.xlane.xlu1 %1413  ;;  %3508 = vmatmul.mubr.msk.bf16.vlgmr.msra.gmra.mrb[24].mxu1 %vm372_vm2, %v1232_v1 }
 0x5c9   :  { %3880 = vrcp.f32 %v1414_v63  ;;  %3518 = vmatpush3.bf16.msra.mxu1 %v1425_v2  ;;  %3519 = vmatprep.mubr.msk.bf16.mxu1 %vm4003_vm0, %v5264_v37 }
 0x5ca   :  { %3529 = vmatprep.subr.bf16.mxu1 %v5264_v37  ;;  %3882 = vrcp.f32 %v1613_v16 }
 0x5cc   :  { %v1789_v35 = vpop.xlane.xlu1 %1788 }
 0x5cd   :  { %3884 = vrcp.f32 %v1789_v35 }
 0x5d3   :  { %v3881_v17 = vpop.eup %3880 }
 0x5d4   :  { %v1416_v61 = vmul.f32 %v3881_v17, %v4928_v26  ;;  %v3883_v42 = vpop.eup %3882  ;;  %v1799_v26 = vsel %vm486_vm3, %v1794_v62, 0  ;;  %v3732_v62 = vld [vmem:[#allocation2] sm:$0xff]  }
 0x5d5   :  { %v1615_v52 = vmul.f32 %v3883_v42, %v4923_v56  ;;  %v1957_v56 = vpop.xlane.xlu1 %1956  ;;  %3596 = vmatpush3.bf16.msra.mxu0 %v3732_v62 }
 0x5d6   :  { %v1417_v57 = vpack.c.bf16 %v1416_v61, %v1416_v61  ;;  %3886 = vrcp.f32 %v1957_v56  ;;  %3597 = vmatprep.subr.bf16.mxu0 %v5264_v37 }
 0x5d7   :  { %v1616_v29 = vpack.c.bf16 %v1615_v52, %v1615_v52  ;;  %v3885_v20 = vpop.eup %3884 }
 0x5d8   :  { %3520 = vmatmul.mubr.msk.bf16.vlgmr.msra.gmra.mrb[28].mxu1 %vm372_vm2, %v1417_v57  ;;  %v1791_v15 = vmul.f32 %v3885_v20, %v4935_v25 }
 0x5d9   :  { %3530 = vmatpush3.bf16.msra.mxu1 %v1625_v31  ;;  %3531 = vmatprep.mubr.msk.bf16.mxu1 %vm4003_vm0, %v5264_v37  ;;  %v2306_v19 = vpop.xlane.xlu1 %2305 }
 0x5da   :  { %3541 = vmatprep.subr.bf16.mxu1 %v5264_v37  ;;  %v1792_v5 = vpack.c.bf16 %v1791_v15, %v1791_v15 }
 0x5e0   :  { %3532 = vmatmul.mubr.msk.bf16.vlgmr.msra.gmra.mrb[32].mxu1 %vm372_vm2, %v1616_v29  ;;  %v3887_v24 = vpop.eup %3886  ;;  %v3733_v29 = vld [vmem:[#allocation2 + $0x8] sm:$0xff]  }
 0x5e1   :  { %3542 = vmatpush3.bf16.msra.mxu1 %v1799_v26  ;;  %3543 = vmatprep.mubr.msk.bf16.mxu1 %vm4003_vm0, %v5264_v37  ;;  %v1959_v49 = vmul.f32 %v3887_v24, %v4940_v33 }
 0x5e2   :  { %3553 = vmatprep.subr.bf16.mxu1 %v5264_v37  ;;  %3598 = vmatpush3.bf16.msra.mxu0 %v3733_v29 }
 0x5e3   :  { %v1960_v36 = vpack.c.bf16 %v1959_v49, %v1959_v49  ;;  %3599 = vmatprep.subr.bf16.mxu0 %v5264_v37 }
 0x5e5   :  { %v2132_v21 = vpop.xlane.xlu0 %2131 }
 0x5e6   :  { %3888 = vrcp.f32 %v2132_v21 }
 0x5e7   :  { %3890 = vrcp.f32 %v2306_v19  ;;  %v3735_v19 = vld [vmem:[#allocation2 + $0x18] sm:$0xff]  }
 0x5e8   :  { %3544 = vmatmul.mubr.msk.bf16.vlgmr.msra.gmra.mrb[36].mxu1 %vm372_vm2, %v1792_v5  ;;  %v3734_v5 = vld [vmem:[#allocation2 + $0x10] sm:$0xff]  }
 0x5e9   :  { %3555 = vmatprep.mubr.msk.bf16.mxu1 %vm4003_vm0, %v5264_v37  ;;  %v2137_v54 = vpop.permute.xlu0 %2136  ;;  %3600 = vmatpush3.bf16.msra.mxu0 %v3734_v5 }
 0x5ea   :  { %v2142_v7 = vsel %vm486_vm3, %v2137_v54, 0  ;;  %3601 = vmatprep.subr.bf16.mxu0 %v5264_v37 }
 0x5ed   :  { %v2485_v11 = vpop.permute.xlu0 %2484  ;;  %3602 = vmatpush3.bf16.msra.mxu0 %v3735_v19  ;;  %v3752_v19 = vld [vmem:[%s5255_s3 + $0x4c] ss:$12 sps:$4 sm:$0xff]  }
 0x5ee   :  { %v2490_v53 = vsel %vm486_vm3, %v2485_v11, 0  ;;  %3603 = vmatprep.subr.bf16.mxu0 %v5264_v37 }
 0x5f0   :  { %v3889_v60 = vpop.eup %3888 }
 0x5f1   :  { %v2134_v33 = vmul.f32 %v3889_v60, %v4950_v23  ;;  %v3891_v9 = vpop.eup %3890 }
 0x5f2   :  { %v2308_v13 = vmul.f32 %v3891_v9, %v4945_v27 }
 0x5f3   :  { %v2135_v44 = vpack.c.bf16 %v2134_v33, %v2134_v33 }
 0x5f4   :  { %v2309_v23 = vpack.c.bf16 %v2308_v13, %v2308_v13 }
 0x5fe   :  { %v2479_v47 = vpop.xlane.xlu1 %2478 }
 0x5ff   :  { %3892 = vrcp.f32 %v2479_v47 }
 0x602   :  { %v1962_v46 = vpop.permute.xlu1 %1961 }
 0x603   :  { %v1967_v25 = vsel %vm486_vm3, %v1962_v46, 0  ;;  %v3736_v46 = vld [vmem:[#allocation2 + $0x20] sm:$0xff]  }
 0x604   :  { %3554 = vmatpush3.bf16.msra.mxu1 %v1967_v25  ;;  %3604 = vmatpush3.bf16.msra.mxu0 %v3736_v46  ;;  %v3754_v46 = vld [vmem:[%s5255_s3 + $0x60] ss:$12 sps:$4 sm:$0xff]  }
 0x605   :  { %3565 = vmatprep.subr.bf16.mxu1 %v5264_v37  ;;  %3605 = vmatprep.subr.bf16.mxu0 %v5264_v37 }
 0x607   :  { %3556 = vmatmul.mubr.msk.bf16.vlgmr.msra.gmra.mrb[40].mxu1 %vm372_vm2, %v1960_v36  ;;  %v3737_v36 = vld [vmem:[#allocation2 + $0x28] sm:$0xff]  }
 0x608   :  { %3566 = vmatpush3.bf16.msra.mxu1 %v2142_v7  ;;  %3567 = vmatprep.mubr.msk.bf16.mxu1 %vm4003_vm0, %v5264_v37 }
 0x609   :  { %3577 = vmatprep.subr.bf16.mxu1 %v5264_v37  ;;  %v3893_v39 = vpop.eup %3892  ;;  %3606 = vmatpush3.bf16.msra.mxu0 %v3737_v36  ;;  %v3758_v36 = vld [vmem:[%s5255_s3 + $0x78] ss:$12 sps:$4 sm:$0xff]  }
 0x60a   :  { %v2481_v0 = vmul.f32 %v3893_v39, %v4957_v55  ;;  %3611 = vmatprep.subr.bf16.mxu0 %v5264_v37 }
 0x60c   :  { %v2482_v34 = vpack.c.bf16 %v2481_v0, %v2481_v0 }
 0x60f   :  { %3568 = vmatmul.mubr.msk.bf16.vlgmr.msra.gmra.mrb[44].mxu1 %vm372_vm2, %v2135_v44 }
 0x610   :  { %3578 = vmatpush3.bf16.msra.mxu1 %v2315_v43  ;;  %3579 = vmatprep.mubr.msk.bf16.mxu1 %vm4003_vm0, %v5264_v37 }
 0x611   :  { %3589 = vmatprep.subr.bf16.mxu1 %v5264_v37 }
 0x617   :  { %3580 = vmatmul.mubr.msk.bf16.vlgmr.msra.gmra.mrb[48].mxu1 %vm372_vm2, %v2309_v23 }
 0x618   :  { %3590 = vmatpush3.bf16.msra.mxu1 %v2490_v53  ;;  %3591 = vmatprep.mubr.msk.bf16.mxu1 %vm4003_vm0, %v5264_v37 }
 0x61f   :  { %3592 = vmatmul.mubr.msk.bf16.vlgmr.msra.gmra.mrb[52].mxu1 %vm372_vm2, %v2482_v34 }
 0x620   :  { %2860 = vmatprep.mubr.bf16.mxu1 %v5266_v10 }
 0x656   :  { %v5039_v27 = vpop.f32.mrb[8].mxu1 }
 0x657   :  { %v3461_v28 = vpop.f32.mrb[9].mxu1 }
 0x658   :  { %v527_v4 = vpop.f32.mrb[10].mxu1 }
 0x659   :  { %v3462_v14 = vpop.f32.mrb[11].mxu1 }
 0x65e   :  { %v722_v18 = vpop.f32.mrb[12].mxu1 }
 0x65f   :  { %v3473_v58 = vpop.f32.mrb[13].mxu1 }
 0x660   :  { %v725_v59 = vpop.f32.mrb[14].mxu1 }
 0x661   :  { %v3474_v32 = vpop.f32.mrb[15].mxu1 }
 0x68b   :  { %v902_v30 = vpop.f32.mrb[16].mxu1 }
 0x68c   :  { %v3485_v41 = vpop.f32.mrb[17].mxu1 }
 0x68d   :  { %v905_v51 = vpop.f32.mrb[18].mxu1 }
 0x68e   :  { %v3486_v38 = vpop.f32.mrb[19].mxu1 }
 0x693   :  { %v1089_v50 = vpop.f32.mrb[20].mxu1 }
 0x694   :  { %v3497_v55 = vpop.f32.mrb[21].mxu1 }
 0x695   :  { %v1092_v3 = vpop.f32.mrb[22].mxu1 }
 0x696   :  { %v3498_v48 = vpop.f32.mrb[23].mxu1 }
 0x69b   :  { %v1274_v40 = vpop.f32.mrb[24].mxu1 }
 0x69c   :  { %v3509_v22 = vpop.f32.mrb[25].mxu1 }
 0x69d   :  { %v1277_v6 = vpop.f32.mrb[26].mxu1 }
 0x69e   :  { %v3510_v12 = vpop.f32.mrb[27].mxu1 }
 0x6ab   :  { %v1461_v45 = vpop.f32.mrb[28].mxu1 }
 0x6ac   :  { %v3521_v8 = vpop.f32.mrb[29].mxu1 }
 0x6ad   :  { %v1464_v1 = vpop.f32.mrb[30].mxu1 }
 0x6ae   :  { %v3522_v2 = vpop.f32.mrb[31].mxu1 }
 0x6af   :  { %v3740_v2 = vld [vmem:[%s5255_s3 + $0x4] ss:$12 sps:$4 sm:$0xff]  }
 0x6b0   :  { %2828 = vmatprep.subr.bf16.mxu1 %v3740_v2  ;;  %v3789_v2 = vld [vmem:[%s5256_s4 + $0x70] sm:$0xff]  }
 0x6b3   :  { %v5041_v63 = vpop.f32.mrb[32].mxu1 }
 0x6b4   :  { %v3533_v16 = vpop.f32.mrb[33].mxu1 }
 0x6b5   :  { %v1664_v35 = vpop.f32.mrb[34].mxu1  ;;  %v3744_v16 = vld [vmem:[%s5255_s3 + $0x1c] ss:$12 sps:$4 sm:$0xff]  }
 0x6b6   :  { %v3534_v17 = vpop.f32.mrb[35].mxu1  ;;  %v3745_v35 = vld [vmem:[%s5255_s3 + $0x20] ss:$12 sps:$4 sm:$0xff]  }
 0x6b7   :  { %v3742_v17 = vld [vmem:[%s5255_s3 + $0x18] ss:$12 sps:$4 sm:$0xff]  }
 0x6bb   :  { %v1835_v61 = vpop.f32.mrb[36].mxu1 }
 0x6bc   :  { %v3675_v57 = vpack.i.bf16 %v1835_v61, %v722_v18  ;;  %v3545_v42 = vpop.f32.mrb[37].mxu1  ;;  %v3748_v61 = vld [vmem:[%s5255_s3 + $0x34] ss:$12 sps:$4 sm:$0xff]  }
 0x6bd   :  { %v1838_v31 = vpop.f32.mrb[38].mxu1  ;;  %v3746_v42 = vld [vmem:[%s5255_s3 + $0x30] ss:$12 sps:$4 sm:$0xff]  }
 0x6be   :  { %3676 = vrot.lane.b32.xlu0 %v3675_v57, %s4014_s24  ;;  %v3546_v52 = vpop.f32.mrb[39].mxu1  ;;  %v3749_v57 = vld [vmem:[%s5255_s3 + $0x38] ss:$12 sps:$4 sm:$0xff]  }
 0x6bf   :  { %v3900_v52 = vld [vmem:[%s5252_s0] sm:$0xff] }
 0x6da   :  { %v2003_v20 = vpop.f32.mrb[40].mxu1 }
 0x6db   :  { %v3680_v26 = vpack.i.bf16 %v2003_v20, %v902_v30  ;;  %v3557_v15 = vpop.f32.mrb[41].mxu1 }
 0x6dc   :  { %v2006_v56 = vpop.f32.mrb[42].mxu1 }
 0x6dd   :  { %3681 = vrot.lane.b32.xlu1 %v3680_v26, %s4012_s22  ;;  %v3558_v21 = vpop.f32.mrb[43].mxu1  ;;  %v3901_v26 = vld [vmem:[%s5252_s0 + $0x8] sm:$0xff] }
 0x6e2   :  { %v2178_v24 = vpop.f32.mrb[44].mxu1 }
 0x6e3   :  { %v3685_v47 = vpack.i.bf16 %v2178_v24, %v1089_v50  ;;  %v3569_v49 = vpop.f32.mrb[45].mxu1  ;;  %v3750_v24 = vld [vmem:[%s5255_s3 + $0x48] ss:$12 sps:$4 sm:$0xff]  }
 0x6e4   :  { %v2181_v25 = vpop.f32.mrb[46].mxu1  ;;  %v3756_v49 = vld [vmem:[%s5255_s3 + $0x64] ss:$12 sps:$4 sm:$0xff]  }
 0x6e5   :  { %3686 = vrot.lane.b32.xlu0 %v3685_v47, %s4013_s23  ;;  %v3570_v54 = vpop.f32.mrb[47].mxu1  ;;  %v3753_v47 = vld [vmem:[%s5255_s3 + $0x50] ss:$12 sps:$4 sm:$0xff]   ;;  %v3757_v25 = vld [vmem:[%s5255_s3 + $0x68] ss:$12 sps:$4 sm:$0xff]  }
 0x6e6   :  { %v3760_v54 = vld [vmem:[%s5255_s3 + $0x7c] ss:$12 sps:$4 sm:$0xff]  }
 0x6ea   :  { %v2351_v60 = vpop.f32.mrb[48].mxu1 }
 0x6eb   :  { %v3690_v7 = vpack.i.bf16 %v2351_v60, %v1274_v40  ;;  %v3581_v33 = vpop.f32.mrb[49].mxu1  ;;  %v3761_v60 = vld [vmem:[%s5255_s3 + $0x80] ss:$12 sps:$4 sm:$0xff]  }
 0x6ec   :  { %v2354_v44 = vpop.f32.mrb[50].mxu1  ;;  %v3762_v33 = vld [vmem:[%s5255_s3 + $0x90] ss:$12 sps:$4 sm:$0xff]  }
 0x6ed   :  { %3691 = vrot.lane.b32.xlu1 %v3690_v7, %s3998_s5  ;;  %v3582_v9 = vpop.f32.mrb[51].mxu1  ;;  %v3764_v7 = vld [vmem:[%s5255_s3 + $0x94] ss:$12 sps:$4 sm:$0xff]   ;;  %v3765_v44 = vld [vmem:[%s5255_s3 + $0x98] ss:$12 sps:$4 sm:$0xff]  }
 0x6ee   :  { %v3768_v9 = vld [vmem:[%s5255_s3 + $0xac] ss:$12 sps:$4 sm:$0xff]  }
 0x6f2   :  { %v2526_v43 = vpop.f32.mrb[52].mxu1 }
 0x6f3   :  { %v3695_v13 = vpack.i.bf16 %v2526_v43, %v1461_v45  ;;  %v3593_v11 = vpop.f32.mrb[53].mxu1  ;;  %v3766_v43 = vld [vmem:[%s5255_s3 + $0xa8] ss:$12 sps:$4 sm:$0xff]  }
 0x6f4   :  { %v2529_v23 = vpop.f32.mrb[54].mxu1  ;;  %v3771_v11 = vld [vmem:[%s5256_s4 + $0x40] sm:$0xff]  }
 0x6f5   :  { %3696 = vrot.lane.b32.xlu0 %v3695_v13, %s4016_s26  ;;  %v3594_v39 = vpop.f32.mrb[55].mxu1  ;;  %v3769_v13 = vld [vmem:[%s5255_s3 + $0xb0] ss:$12 sps:$4 sm:$0xff]  }
 0x730   :  { %v3677_v53 = vpop.permute.xlu0 %3676 }
 0x731   :  { %v3679_v10 = vunpack.i.h.bf16 %v3677_v53  ;;  %v3678_v28 = vunpack.i.l.bf16 %v3677_v53 }
 0x733   :  { %v2552_v41 = vsel %vm336_vm1, %v5041_v63, %v3679_v10  ;;  %v1487_v51 = vsel %vm336_vm1, %v5039_v27, %v3678_v28  ;;  %v3738_v27 = vld [vmem:[%s5255_s3] ss:$12 sps:$4 sm:$0xff]   ;;  %v3741_v63 = vld [vmem:[%s5255_s3 + $0x8] ss:$12 sps:$4 sm:$0xff]  }
 0x734   :  { %2829 = vmatpush1.bf16.msra.mxu1 %v3738_v27  ;;  %v3788_v27 = vld [vmem:[%s5256_s4 + $0xb0] sm:$0xff]  }
 0x735   :  { %2830 = vmatprep.subr.bf16.mxu1 %v3744_v16  ;;  %v3791_v16 = vld [vmem:[%s5256_s4 + $0xb8] sm:$0xff]  }
 0x738   :  { %2831 = vmatpush1.bf16.msra.mxu1 %v3742_v17  ;;  %v3793_v17 = vld [vmem:[%s5256_s4 + $0x38] sm:$0xff]  }
 0x739   :  { %2832 = vmatprep.subr.bf16.mxu1 %v3748_v61 }
 0x73c   :  { %2833 = vmatpush1.bf16.msra.mxu1 %v3746_v42 }
 0x73d   :  { %2834 = vmatprep.subr.bf16.mxu1 %v3752_v19 }
 0x740   :  { %2835 = vmatpush1.bf16.msra.mxu1 %v3750_v24 }
 0x741   :  { %2836 = vmatprep.subr.bf16.mxu1 %v3756_v49 }
 0x744   :  { %2837 = vmatpush1.bf16.msra.mxu1 %v3754_v46 }
 0x745   :  { %2838 = vmatprep.subr.bf16.mxu1 %v3760_v54 }
 0x748   :  { %2839 = vmatpush1.bf16.msra.mxu1 %v3758_v36 }
 0x749   :  { %2840 = vmatprep.subr.bf16.mxu1 %v3764_v7 }
 0x74c   :  { %2841 = vmatpush1.bf16.msra.mxu1 %v3762_v33 }
 0x74d   :  { %2842 = vmatprep.subr.bf16.mxu1 %v3768_v9 }
 0x74f   :  { %v3682_v0 = vpop.permute.xlu1 %3681 }
 0x750   :  { %v3684_v14 = vunpack.i.h.bf16 %v3682_v0  ;;  %v3683_v18 = vunpack.i.l.bf16 %v3682_v0  ;;  %2843 = vmatpush1.bf16.msra.mxu1 %v3766_v43 }
 0x751   :  { %3400 = vmatprep.subr.bf16.mxu1 %v3771_v11 }
 0x752   :  { %v1489_v38 = vsel %vm1488_vm5, %v1487_v51, %v3683_v18  ;;  %v2553_v50 = vsel %vm1488_vm5, %v2552_v41, %v3684_v14  ;;  %v3773_v41 = vld [vmem:[%s5256_s4 + $0x88] sm:$0xff]  }
 0x753   :  { %v3775_v51 = vld [vmem:[%s5256_s4 + $0x8] sm:$0xff]  }
 0x757   :  { %v3687_v34 = vpop.permute.xlu0 %3686 }
 0x758   :  { %v3689_v58 = vunpack.i.h.bf16 %v3687_v34  ;;  %v3688_v59 = vunpack.i.l.bf16 %v3687_v34 }
 0x75a   :  { %v1491_v3 = vsel %vm1490_vm6, %v1489_v38, %v3688_v59  ;;  %v2554_v48 = vsel %vm1490_vm6, %v2553_v50, %v3689_v58  ;;  %v3770_v58 = vld [vmem:[%s5256_s4 + $0x80] sm:$0xff]   ;;  %v3777_v38 = vld [vmem:[%s5256_s4 + $0x50] sm:$0xff]  }
 0x75b   :  { %v3772_v59 = vld [vmem:[%s5256_s4] sm:$0xff]   ;;  %v3776_v50 = vld [vmem:[%s5256_s4 + $0x90] sm:$0xff]  }
 0x75f   :  { %v3692_v4 = vpop.permute.xlu1 %3691 }
 0x760   :  { %v3694_v32 = vunpack.i.h.bf16 %v3692_v4  ;;  %v3693_v30 = vunpack.i.l.bf16 %v3692_v4 }
 0x762   :  { %v1493_v6 = vsel %vm1492_vm7, %v1491_v3, %v3693_v30  ;;  %v2555_v12 = vsel %vm1492_vm7, %v2554_v48, %v3694_v32  ;;  %v3774_v30 = vld [vmem:[%s5256_s4 + $0x48] sm:$0xff]   ;;  %v3780_v3 = vld [vmem:[%s5256_s4 + $0x58] sm:$0xff]  }
 0x763   :  { %v3779_v48 = vld [vmem:[%s5256_s4 + $0x98] sm:$0xff]  }
 0x767   :  { %v3697_v55 = vpop.permute.xlu0 %3696 }
 0x768   :  { %v3699_v40 = vunpack.i.h.bf16 %v3697_v55  ;;  %v3698_v22 = vunpack.i.l.bf16 %v3697_v55  ;;  %v3778_v55 = vld [vmem:[%s5256_s4 + $0x10] sm:$0xff]  }
 0x76a   :  { %v1495_v45 = vsel %vm1494_vm8, %v1493_v6, %v3698_v22  ;;  %v2556_v8 = vsel %vm1494_vm8, %v2555_v12, %v3699_v40  ;;  %v3781_v40 = vld [vmem:[%s5256_s4 + $0x18] sm:$0xff]   ;;  %v3783_v22 = vld [vmem:[%s5256_s4 + $0x60] sm:$0xff]  }
 0x76b   :  { %v2557_v1 = vpack.c.bf16 %v2556_v8, %v1495_v45  ;;  %v3782_v6 = vld [vmem:[%s5256_s4 + $0xa0] sm:$0xff]   ;;  %v3786_v45 = vld [vmem:[%s5256_s4 + $0x68] sm:$0xff]  }
 0x76c   :  { %v3784_v12 = vld [vmem:[%s5256_s4 + $0x20] sm:$0xff]   ;;  %v3785_v8 = vld [vmem:[%s5256_s4 + $0xa8] sm:$0xff]  }
 0x76d   :  { %3608 = vmatmul.mubr.msk.bf16.vlgmr.msra.gmra.mrb[48].mxu0 %vm2606_vm9, %v2557_v1  ;;  %v3787_v1 = vld [vmem:[%s5256_s4 + $0x28] sm:$0xff]  }
 0x76e   :  { %3627 = vmatprep.mubr.msk.bf16.mxu0 %vm4003_vm0, %v5264_v37  ;;  %3612 = vmatpush3.bf16.msra.mxu0 %v3741_v63  ;;  %v3790_v63 = vld [vmem:[%s5256_s4 + $0x30] sm:$0xff]  }
 0x76f   :  { %3613 = vmatprep.subr.bf16.mxu0 %v5264_v37 }
 0x772   :  { %3614 = vmatpush3.bf16.msra.mxu0 %v3745_v35  ;;  %v3792_v35 = vld [vmem:[%s5256_s4 + $0x78] sm:$0xff]   ;;  %s4018_s4 = smov [#allocation8]  }
 0x773   :  { %3615 = vmatprep.subr.bf16.mxu0 %v5264_v37  ;;  %s3210_s19 = sshll.u32 %s4018_s4, 4  ;;  %s3211_s19 = int_to_ptr.vmem [resolvable:$true] %s3210_s19 }
 0x774   :  { %s3968_s20 = scalar_lea.vmem %s3211_s19, 256  ;;  %p3973_p11 = scmp.lt.s32.totalorder %s3211_s19, %s3211_s19 }
 0x775   :  { %p3969_p10 = scmp.ne.s32.totalorder %s3211_s19, %s3968_s20  ;;  %p3974_p12 = scmp.lt.s32.totalorder %s3968_s20, %s3968_s20 }
 0x776   :  { %3616 = vmatpush3.bf16.msra.mxu0 %v3749_v57 }
 0x777   :  { %3617 = vmatprep.subr.bf16.mxu0 %v5264_v37  ;;  %p3975_p13 = por %p3974_p12, %p3973_p11 }
 0x779   :  { %p3976_p0 = pnand %p3975_p13, %p3969_p10 }
 0x77a   :  { %3618 = vmatpush3.bf16.msra.mxu0 %v3753_v47 }
 0x77b   :  { %3619 = vmatprep.subr.bf16.mxu0 %v5264_v37 }
 0x77e   :  { %3620 = vmatpush3.bf16.msra.mxu0 %v3757_v25 }
 0x77f   :  { %3621 = vmatprep.subr.bf16.mxu0 %v5264_v37 }
 0x782   :  { %3622 = vmatpush3.bf16.msra.mxu0 %v3761_v60 }
 0x783   :  { %3623 = vmatprep.subr.bf16.mxu0 %v5264_v37 }
 0x786   :  { %3624 = vmatpush3.bf16.msra.mxu0 %v3765_v44 }
 0x787   :  { %3625 = vmatprep.subr.bf16.mxu0 %v5264_v37 }
 0x78a   :  { %3626 = vmatpush3.bf16.msra.mxu0 %v3769_v13 }
 0x78b   :  { %3631 = vmatprep.subr.bf16.mxu0 %v5264_v37 }
 0x840   :  { %v2644_v31 = vpop.f32.mrb[48].mxu0 }
 0x841   :  { %v5093_v62 = vadd.f32 %v3900_v52, %v2644_v31  ;;  %v3609_v29 = vpop.f32.mrb[49].mxu0 }
 0x842   :  { %v2647_v20 = vpop.f32.mrb[50].mxu0 }
 0x843   :  { %v5098_v15 = vadd.f32 %v3901_v26, %v2647_v20  ;;  %v3610_v5 = vpop.f32.mrb[51].mxu0  ;;  %v2653_v56 = vmul.f32 %v5093_v62, %v5093_v62 }
 0x845   :  { %2655 = vadd.xlane.f32.xlu1 %v2653_v56  ;;  %v2654_v21 = vmul.f32 %v5098_v15, %v5098_v15 }
 0x847   :  { %2657 = vadd.xlane.f32.xlu0 %v2654_v21 }
 0x8d2   :  { %v2656_v23 = vpop.xlane.xlu1 %2655 }
 0x8d3   :  { %v2659_v39 = vmul.f32 0.010416667, %v2656_v23 }
 0x8d4   :  { %v2658_v53 = vpop.xlane.xlu0 %2657 }
 0x8d5   :  { %v2661_v0 = vadd.f32 1.1920929e-07, %v2659_v39  ;;  %v2660_v34 = vmul.f32 0.010416667, %v2658_v53 }
 0x8d7   :  { %3894 = vrsqrt.f32 %v2661_v0  ;;  %v2662_v10 = vadd.f32 1.1920929e-07, %v2660_v34 }
 0x8d9   :  { %3896 = vrsqrt.f32 %v2662_v10 }
 0x8e1   :  { %v3895_v28 = vpop.eup %3894 }
 0x8e2   :  { %v2665_v14 = vmul.f32 %v3895_v28, %v5093_v62 }
 0x8e3   :  { %v3897_v4 = vpop.eup %3896 }
 0x8e4   :  { %v2666_v18 = vmul.f32 %v3897_v4, %v5098_v15 }
 0x8e6   :  { %v2667_v32 = vpack.c.bf16 %v2666_v18, %v2665_v14 }
 0x8e8   :  { %2861 = vmatmul.mubr.bf16.vlgmr.msra.gmra.mrb[56].mxu1 %v2667_v32  ;;  %3628 = vmatmul.mubr.bf16.vlgmr.msra.gmra.mrb[52].mxu0 %v2667_v32 }
 0x8e9   :  { %3632 = vmatpush3.bf16.msra.mxu0 %v3770_v58  ;;  %3401 = vmatpush3.bf16.msra.mxu1 %v3772_v59 }
 0x8ea   :  { %3633 = vmatprep.subr.bf16.mxu0 %v5264_v37  ;;  %3402 = vmatprep.subr.bf16.mxu1 %v3774_v30 }
 0x8eb   :  { %3647 = vmatprep.mubr.msk.bf16.mxu0 %vm4003_vm0, %v5264_v37 }
 0x8ed   :  { %3634 = vmatpush3.bf16.msra.mxu0 %v3773_v41  ;;  %3403 = vmatpush3.bf16.msra.mxu1 %v3775_v51 }
 0x8ee   :  { %3635 = vmatprep.subr.bf16.mxu0 %v5264_v37  ;;  %3404 = vmatprep.subr.bf16.mxu1 %v3777_v38 }
 0x8f1   :  { %3636 = vmatpush3.bf16.msra.mxu0 %v3776_v50  ;;  %3405 = vmatpush3.bf16.msra.mxu1 %v3778_v55 }
 0x8f2   :  { %3637 = vmatprep.subr.bf16.mxu0 %v5264_v37  ;;  %3406 = vmatprep.subr.bf16.mxu1 %v3780_v3 }
 0x8f5   :  { %3638 = vmatpush3.bf16.msra.mxu0 %v3779_v48  ;;  %3407 = vmatpush3.bf16.msra.mxu1 %v3781_v40 }
 0x8f6   :  { %3639 = vmatprep.subr.bf16.mxu0 %v5264_v37  ;;  %3408 = vmatprep.subr.bf16.mxu1 %v3783_v22 }
 0x8f9   :  { %3640 = vmatpush3.bf16.msra.mxu0 %v3782_v6  ;;  %3409 = vmatpush3.bf16.msra.mxu1 %v3784_v12 }
 0x8fa   :  { %3641 = vmatprep.subr.bf16.mxu0 %v5264_v37  ;;  %3410 = vmatprep.subr.bf16.mxu1 %v3786_v45 }
 0x8fd   :  { %3642 = vmatpush3.bf16.msra.mxu0 %v3785_v8  ;;  %3411 = vmatpush3.bf16.msra.mxu1 %v3787_v1 }
 0x8fe   :  { %3643 = vmatprep.subr.bf16.mxu0 %v5264_v37  ;;  %3412 = vmatprep.subr.bf16.mxu1 %v3789_v2 }
 0x901   :  { %3644 = vmatpush3.bf16.msra.mxu0 %v3788_v27  ;;  %3413 = vmatpush3.bf16.msra.mxu1 %v3790_v63 }
 0x902   :  { %3645 = vmatprep.subr.bf16.mxu0 %v5264_v37  ;;  %3414 = vmatprep.subr.bf16.mxu1 %v3792_v35 }
 0x905   :  { %3646 = vmatpush3.bf16.msra.mxu0 %v3791_v16  ;;  %3415 = vmatpush3.bf16.msra.mxu1 %v3793_v17 }
 0x9bb   :  { %v2862_v61 = vpop.f32.mrb[56].mxu1  ;;  %v2905_v57 = vpop.f32.mrb[52].mxu0 }
 0x9bc   :  { %v2912_v42 = vmax.f32 %v2862_v61, 0.0  ;;  %v2914_v37 = vmax.f32 %v2905_v57, 0.0  ;;  %v2864_v31 = vpop.f32.mrb[57].mxu1  ;;  %v3629_v52 = vpop.f32.mrb[53].mxu0 }
 0x9bd   :  { %v2913_v29 = vmax.f32 %v2864_v31, 0.0  ;;  %v2866_v20 = vpop.f32.mrb[58].mxu1  ;;  %v2908_v26 = vpop.f32.mrb[54].mxu0 }
 0x9be   :  { %v2915_v5 = vmax.f32 %v2866_v20, 0.0  ;;  %v2917_v56 = vmax.f32 %v2908_v26, 0.0  ;;  %v2868_v21 = vpop.f32.mrb[59].mxu1  ;;  %v3630_v19 = vpop.f32.mrb[55].mxu0  ;;  %v2918_v47 = vmul.f32 %v2912_v42, %v2912_v42  ;;  %v2920_v49 = vmul.f32 %v2914_v37, %v2914_v37 }
 0x9bf   :  { %v2916_v24 = vmax.f32 %v2868_v21, 0.0  ;;  %v2919_v54 = vmul.f32 %v2913_v29, %v2913_v29 }
 0x9c0   :  { %v2921_v46 = vmul.f32 %v2915_v5, %v2915_v5  ;;  %v2923_v25 = vmul.f32 %v2917_v56, %v2917_v56 }
 0x9c1   :  { %v2922_v36 = vmul.f32 %v2916_v24, %v2916_v24 }
 0x9c2   :  { %v2924_v60 = vpack.c.bf16 %v2921_v46, %v2918_v47  ;;  %v2926_v7 = vpack.c.bf16 %v2923_v25, %v2920_v49 }
 0x9c3   :  { %v2925_v33 = vpack.c.bf16 %v2922_v36, %v2919_v54 }
 0x9c4   :  { %3648 = vmatmul.mubr.bf16.vlgmr.msra.gmra.mrb[56].mxu0 %v2926_v7 }
 0x9c5   :  { %3151 = vmatprep.mubr.bf16.mxu1 %v2925_v33 }
 0x9c6   :  { %3152 = vmatmul.mubr.bf16.vlgmr.msra.gmra.mrb[60].mxu1 %v2924_v60 }
 0xa97   :  { %v3194_v44 = vpop.f32.mrb[56].mxu0 }
 0xa98   :  { %v3649_v9 = vpop.f32.mrb[57].mxu0 }
 0xa99   :  { %v3416_v43 = vpop.f32.mrb[60].mxu1  ;;  %v3197_v13 = vpop.f32.mrb[58].mxu0 }
 0xa9a   :  { %v3417_v11 = vpop.f32.mrb[61].mxu1  ;;  %v3650_v23 = vpop.f32.mrb[59].mxu0 }
 0xa9b   :  { %v3418_v39 = vadd.f32 %v3417_v11, %v3416_v43  ;;  %v3419_v53 = vpop.f32.mrb[62].mxu1 }
 0xa9c   :  { %v3420_v0 = vpop.f32.mrb[63].mxu1 }
 0xa9d   :  { %v3195_v34 = vadd.f32 %v3418_v39, %v3194_v44  ;;  %v3421_v10 = vadd.f32 %v3420_v0, %v3419_v53 }
 0xa9f   :  { %v3201_v28 = vadd.f32 %v3195_v34, %v5093_v62  ;;  %v3198_v4 = vadd.f32 %v3421_v10, %v3197_v13 }
 0xaa1   :  { %3203 = vst [vmem:[#allocation8] sm:$0xff] %v3201_v28  ;;  %v3202_v14 = vadd.f32 %v3198_v4, %v5098_v15 }
 0xaa3   :  { %3204 = vst [vmem:[#allocation8 + $0x8] sm:$0xff] %v3202_v14 }
 0xaa4   :  { %3979 = shalt.err (!%p3976_p0)
}
 0xaa5   :  { %s3980_s23 = scalar_lea.hbm %s5259_s7, 256 }
 0xaa6   :  { %p3981_p1 = scmp.ne.s32.totalorder %s5259_s7, %s3980_s23  ;;  %p3984_p2 = scmp.lt.u32.totalorder %s3980_s23, %s5259_s7 }
 0xaa8   :  { %p3986_p3 = pnand %p3984_p2, %p3981_p1 }
 0xaaa   :  { %3989 = shalt.err (!%p3986_p3)
}
 0xaab   :  { %s4019_s0 = smov 128  }
 0xaac   :  { %3216 = dma.vmem_to_hbm [thread:$0]  %s3211_s19, 256, %s5259_s7, [#allocation4], %s4019_s0, %s4019_s0, %s4007_s6  }
 0xaad   :  { %3994 = dma.done.wait [#allocation4], 256  }
 0xaae   :  { %3995 = vsyncadd [#allocation4], 4294967040 }
 0xaaf   :  { %3220 = vsyncpa [#allocation3], 1 }
 0xab0   :  { %3221 = vsyncpa [#allocation6], 1 }
 0xab1   :  { %3222 = vsyncpa [#allocation4], 1 }

</bundles_post_ra>
